<compile_context>
chip_gen: v5e
topology: v5e:2x2
jax: 0.10.0
libtpu: 0.0.40
codegen_flags: <defaults>
</compile_context>

<pallas_src>
import functools

import numpy as np
import jax
import jax.numpy as jnp
from jax.experimental import pallas as pl
from jax.experimental.pallas import tpu as pltpu

HIDDEN = 32            # dudt hidden dim
N_QUAD = 15            # Gauss-Legendre order (module default n=15)
NP = N_QUAD + 1        # quadrature nodes + the point t itself (encoded as node u = +1)
B_TILE_MAX = 128       # samples per grid step (128 -> lane-dense output & reductions)


def _softplus(x):
    return jnp.maximum(x, 0.0) + jnp.log(1.0 + jnp.exp(-jnp.abs(x)))


def cdfnet_kernel(t_ref, rt_ref, w2t_ref, cp_ref, rp_ref, mq_ref, msel_ref, o_ref,
                  *, hidden_dtype):
    """One batch tile (BT samples, L = BT*NP lane-dense evaluation points).

    layout:
      t_ref    (1, 1, BT)  times of this tile (lanes)
      rt_ref   (BT, L)     expansion: tau_row = t_row @ RT, RT[i, i*NP+k] = (u_k+1)/2
      w2t_ref  (H, H)      W2^T (column-major MLP layer 2)
      cp_ref   (H, 3)      packed column params [w1, b1, b2]
      rp_ref   (2, H)      packed row params   [w3^T ; b3 (broadcast)]
      mq_ref   (L, BT)     quadrature weights  kron(I, w_ext)
      msel_ref (L, BT)     one-hot selector of the u=+1 slot (tau = t_i)
      o_ref    (1, 1, BT)  output
    """
    hd = hidden_dtype
    t_row = t_ref[0]                                                       # (1, BT) f32
    cp = cp_ref[...]
    w1, b1, b2 = cp[:, 0:1], cp[:, 1:2], cp[:, 2:3]                        # (H, 1) each
    rp = rp_ref[...]
    w3_row = rp[0:1, :]                                                    # (1, H)
    b3 = rp[1:2, 0:1]                                                      # (1, 1)

    # All L evaluation points of this tile, lane-dense: tau[i*NP+k] = t_i/2*(u_k+1).
    tau = jnp.dot(t_row, rt_ref[...], preferred_element_type=jnp.float32)  # (1, L)

    # dudt MLP in column layout (H on sublanes, L on lanes); rank-1 contractions on MXU.
    pre1 = jnp.dot(w1.astype(hd), tau.astype(hd),
                   preferred_element_type=jnp.float32) + b1                # (H, L) f32
    h1 = jnp.tanh(pre1.astype(hd))                                         # (H, L) hd
    pre2 = jnp.dot(w2t_ref[...].astype(hd), h1,
                   preferred_element_type=jnp.float32) + b2                # (H, L) f32
    h2 = jnp.tanh(pre2.astype(hd))                                         # (H, L) hd
    z = jnp.dot(w3_row.astype(hd), h2,
                preferred_element_type=jnp.float32) + b3                   # (1, L) f32
    f = _softplus(z)                                                       # (1, L) f32

    # Split reductions (no concat): quadrature sum of f; pick z at the u=+1 slot (tau=t).
    quad = jnp.dot(f, mq_ref[...], preferred_element_type=jnp.float32)     # (1, BT)
    z_t = jnp.dot(z, msel_ref[...], preferred_element_type=jnp.float32)    # (1, BT)

    Fq = 0.5 * t_row * quad                                                # (1, BT)
    sp_F = _softplus(Fq)                           # stable log(1 + exp(F))
    sp_t = _softplus(z_t)                          # du = softplus(MLP(t))
    # stable log(du): for very negative z_t, log(softplus(z)) -> z; the clamp keeps the
    # discarded jnp.where branch finite (no -inf anywhere).
    log_du = jnp.where(z_t < -15.0, z_t, jnp.log(jnp.maximum(sp_t, 1e-30)))

    o_ref[0] = -(log_du + Fq - 2.0 * sp_F)


def make_params(key, hidden=HIDDEN):
    """Deterministic synthetic init of the dudt MLP (PyTorch-Linear-like uniform)."""
    ks = jax.random.split(key, 6)

    def unif(k, shape, fan_in):
        bound = 1.0 / np.sqrt(fan_in)
        return jax.random.uniform(k, shape, jnp.float32, -bound, bound)

    return {
        "W1": unif(ks[0], (1, hidden), 1),
        "b1": unif(ks[1], (1, hidden), 1),
        "W2": unif(ks[2], (hidden, hidden), hidden),
        "b2": unif(ks[3], (1, hidden), hidden),
        "W3": unif(ks[4], (hidden, 1), hidden),
        "b3": unif(ks[5], (1, 1), hidden),
    }


def pack_params(params):
    """W2^T, packed column params [w1,b1,b2] (H,3), packed row params [w3^T; b3] (2,H)."""
    h = params["W2"].shape[0]
    colpack = jnp.concatenate(
        [params["W1"].T, params["b1"].T, params["b2"].T], axis=1)           # (H, 3)
    rowpack = jnp.concatenate(
        [params["W3"].T, jnp.full((1, h), params["b3"][0, 0], jnp.float32)], axis=0)  # (2, H)
    return (params["W2"].T.astype(jnp.float32),
            colpack.astype(jnp.float32),
            rowpack.astype(jnp.float32))


@functools.lru_cache(maxsize=None)
def _tile_consts_np(b_tile):
    """Per-tile constant matrices (kron-structured), cached per tile size."""
    u_n, w_n = np.polynomial.legendre.leggauss(N_QUAD)
    u_ext = np.concatenate([u_n, [1.0]]).astype(np.float32)   # last slot: tau = t itself
    w_ext = np.concatenate([w_n, [0.0]]).astype(np.float32)   # excluded from quadrature
    eye = np.eye(b_tile, dtype=np.float32)
    scale = (0.5 * (u_ext + 1.0)).astype(np.float32)          # (NP,)
    rt = np.kron(eye, scale[None, :])                         # (BT, L)  tau expansion
    mq = np.kron(eye, w_ext[:, None])                         # (L, BT)  quadrature sum
    sel = np.zeros((NP, 1), np.float32)
    sel[-1, 0] = 1.0
    msel = np.kron(eye, sel)                                  # (L, BT)  pick u=+1 slot
    return rt, mq, msel


def gauss_legendre(n=N_QUAD):
    u, w = np.polynomial.legendre.leggauss(n)
    return jnp.asarray(u, jnp.float32), jnp.asarray(w, jnp.float32)


def _pick_tile(b):
    """128 when possible (lane-dense); smaller power of two so small batches still get
    >=2 grid steps (keeps both v7x TensorCores busy)."""
    if b >= 2 * B_TILE_MAX:
        return B_TILE_MAX
    return int(max(8, min(B_TILE_MAX, pl.next_power_of_2(max(1, (b + 1) // 2)))))


def _default_hidden_dtype():
    """bf16 hidden math on v6e/v7x (bf16-native VPU/EUP); f32 on v5e and older."""
    try:
        kind = jax.devices()[0].device_kind.lower()
    except Exception:
        return jnp.float32
    if "v6" in kind or "v7" in kind or "7x" in kind:
        return jnp.bfloat16
    return jnp.float32


def cdfnet_forward(t, params, hidden_dtype=None, b_tile=None):
    b = t.shape[0]
    if hidden_dtype is None:
        hidden_dtype = _default_hidden_dtype()
    if b_tile is None:
        b_tile = _pick_tile(b)
    L = b_tile * NP
    g = pl.cdiv(b, b_tile)
    bp = g * b_tile

    w2t, colpack, rowpack = pack_params(params)
    rt_np, mq_np, msel_np = _tile_consts_np(b_tile)
    rt, mq, msel = jnp.asarray(rt_np), jnp.asarray(mq_np), jnp.asarray(msel_np)

    tp = t.astype(jnp.float32)
    if bp != b:
        # pad the batch; padded samples are computed (value is arbitrary) and sliced off.
        tp = jnp.pad(tp, (0, bp - b), constant_values=1.0)
    t3 = tp.reshape(g, 1, b_tile)

    kern = functools.partial(cdfnet_kernel, hidden_dtype=hidden_dtype)
    out = pl.pallas_call(
        kern,
        out_shape=jax.ShapeDtypeStruct((g, 1, b_tile), jnp.float32),
        grid=(g,),
        in_specs=[
            pl.BlockSpec((1, 1, b_tile), lambda i: (i, 0, 0)),     # t tile (lanes)
            pl.BlockSpec((b_tile, L), lambda i: (0, 0)),           # RT      (resident)
            pl.BlockSpec((HIDDEN, HIDDEN), lambda i: (0, 0)),      # W2^T    (resident)
            pl.BlockSpec((HIDDEN, 3), lambda i: (0, 0)),           # [w1, b1, b2]
            pl.BlockSpec((2, HIDDEN), lambda i: (0, 0)),           # [w3^T ; b3]
            pl.BlockSpec((L, b_tile), lambda i: (0, 0)),           # MQ      (resident)
            pl.BlockSpec((L, b_tile), lambda i: (0, 0)),           # MSEL    (resident)
        ],
        out_specs=pl.BlockSpec((1, 1, b_tile), lambda i: (i, 0, 0)),
        compiler_params=pltpu.CompilerParams(
            dimension_semantics=("parallel",)),   # batch tiles shard across v7x's 2 TCs
    )(t3, rt, w2t, colpack, rowpack, mq, msel)
    return out.reshape(bp)[:b]


def reference_forward(t, params, u_n, w_n):
    """Plain-JAX, numerically-stable transcription of CDFNet.forward for validation."""
    hp = jax.lax.Precision.HIGHEST
    W1, b1 = params["W1"], params["b1"]
    W2, b2 = params["W2"], params["b2"]
    W3, b3 = params["W3"], params["b3"]

    def mlp(x):  # x: (..., 1)
        h1 = jnp.tanh(jnp.dot(x, W1, precision=hp) + b1)
        h2 = jnp.tanh(jnp.dot(h1, W2, precision=hp) + b2)
        return jax.nn.softplus(jnp.dot(h2, W3, precision=hp) + b3)

    tau = 0.5 * t[:, None] * (u_n[None, :] + 1.0)                 # (B, n)
    f_n = mlp(tau.reshape(-1, 1)).reshape(t.shape[0], N_QUAD)     # (B, n)
    F = 0.5 * t * jnp.sum(w_n[None, :] * f_n, axis=1)             # (B,)
    du = mlp(t[:, None])[:, 0]                                    # (B,)
    return -(jnp.log(du) + F - 2.0 * jax.nn.softplus(F))


# TODO(synk): first_layer / sum_forward / optimise (Adam training loop), LogisticNet and
# mapping_logistic are training-time / auxiliary utilities, not part of forward(t);
# sign_fn inside mapping() is dead code w.r.t. the output — all omitted.

if __name__ == "__main__":
    key = jax.random.PRNGKey(0)
    kp, kt, kt2 = jax.random.split(key, 3)

    params = make_params(kp)
    u_n, w_n = gauss_legendre()

    # Main check: B not a multiple of 128 -> exercises batch padding; 4 grid steps of
    # B_TILE=128 (2048 lane-dense evaluation points each) over a "parallel" grid.
    B = 500
    t = jax.random.uniform(kt, (B,), jnp.float32, 0.1, 2.0)
    ref = reference_forward(t, params, u_n, w_n)

    out_f32 = jax.block_until_ready(cdfnet_forward(t, params, hidden_dtype=jnp.float32))
    assert out_f32.shape == (B,)
    err = float(jnp.max(jnp.abs(out_f32 - ref)))
    assert err < 1e-3, f"f32 kernel/reference mismatch: {err}"

    # bf16 hidden-layer path (the v6e/v7x perf path).  Loose sanity bound: bf16 rel
    # error ~2^-8 amplified through two 32-wide hidden layers.
    out_bf16 = jax.block_until_ready(cdfnet_forward(t, params, hidden_dtype=jnp.bfloat16))
    err_bf = float(jnp.max(jnp.abs(out_bf16 - ref)))
    assert err_bf < 0.2, f"bf16 kernel/reference sanity mismatch: {err_bf}"

    # Small-batch path: tile shrinks (here to 16) so the grid still has >=2 steps.
    B2 = 24
    t2 = jax.random.uniform(kt2, (B2,), jnp.float32, 0.1, 2.0)
    out2 = jax.block_until_ready(cdfnet_forward(t2, params, hidden_dtype=jnp.float32))
    ref2 = reference_forward(t2, params, u_n, w_n)
    err2 = float(jnp.max(jnp.abs(out2 - ref2)))
    assert err2 < 1e-3, f"small-batch kernel/reference mismatch: {err2}"

    print("KERNEL_OK")
</pallas_src>

<mosaic_0001>
module attributes {stable_mosaic.version = 11 : i64} {
  func.func @cdfnet_kernel(%arg0: i32, %arg1: memref<1x1x128xf32, #tpu.memory_space<vmem>>, %arg2: memref<128x2048xf32, #tpu.memory_space<vmem>>, %arg3: memref<32x32xf32, #tpu.memory_space<vmem>>, %arg4: memref<32x3xf32, #tpu.memory_space<vmem>>, %arg5: memref<2x32xf32, #tpu.memory_space<vmem>>, %arg6: memref<2048x128xf32, #tpu.memory_space<vmem>>, %arg7: memref<2048x128xf32, #tpu.memory_space<vmem>>, %arg8: memref<1x1x128xf32, #tpu.memory_space<vmem>>) attributes {dimension_semantics = [#tpu.dimension_semantics<parallel>], iteration_bounds = array<i64: 4>, scalar_prefetch = 0 : i64, scratch_operands = 0 : i64, tpu.core_type = #tpu.core_type<tc>, window_params = [{transform_indices = @transform_0, window_bounds = array<i64: 1, 1, 128>}, {pipeline_mode = #tpu.pipeline_mode<synchronous>, transform_indices = @transform_1, window_bounds = array<i64: 128, 2048>}, {pipeline_mode = #tpu.pipeline_mode<synchronous>, transform_indices = @transform_2, window_bounds = array<i64: 32, 32>}, {pipeline_mode = #tpu.pipeline_mode<synchronous>, transform_indices = @transform_3, window_bounds = array<i64: 32, 3>}, {pipeline_mode = #tpu.pipeline_mode<synchronous>, transform_indices = @transform_4, window_bounds = array<i64: 2, 32>}, {pipeline_mode = #tpu.pipeline_mode<synchronous>, transform_indices = @transform_5, window_bounds = array<i64: 2048, 128>}, {pipeline_mode = #tpu.pipeline_mode<synchronous>, transform_indices = @transform_6, window_bounds = array<i64: 2048, 128>}, {transform_indices = @transform_7, window_bounds = array<i64: 1, 1, 128>}]} {
    %c0 = arith.constant 0 : index
    %c0_0 = arith.constant 0 : index
    %c0_1 = arith.constant 0 : index
    %0 = vector.load %arg1[%c0, %c0_0, %c0_1] : memref<1x1x128xf32, #tpu.memory_space<vmem>>, vector<1x1x128xf32>
    %1 = vector.shape_cast %0 : vector<1x1x128xf32> to vector<1x128xf32>
    %c0_2 = arith.constant 0 : index
    %c0_3 = arith.constant 0 : index
    %2 = vector.load %arg4[%c0_2, %c0_3] : memref<32x3xf32, #tpu.memory_space<vmem>>, vector<32x3xf32>
    %3 = vector.extract_strided_slice %2 {offsets = [0, 0], sizes = [32, 1], strides = [1, 1]} : vector<32x3xf32> to vector<32x1xf32>
    %4 = vector.extract_strided_slice %2 {offsets = [0, 1], sizes = [32, 1], strides = [1, 1]} : vector<32x3xf32> to vector<32x1xf32>
    %5 = vector.extract_strided_slice %2 {offsets = [0, 2], sizes = [32, 1], strides = [1, 1]} : vector<32x3xf32> to vector<32x1xf32>
    %c0_4 = arith.constant 0 : index
    %c0_5 = arith.constant 0 : index
    %6 = vector.load %arg5[%c0_4, %c0_5] : memref<2x32xf32, #tpu.memory_space<vmem>>, vector<2x32xf32>
    %7 = vector.extract_strided_slice %6 {offsets = [0, 0], sizes = [1, 32], strides = [1, 1]} : vector<2x32xf32> to vector<1x32xf32>
    %8 = vector.extract_strided_slice %6 {offsets = [1, 0], sizes = [1, 1], strides = [1, 1]} : vector<2x32xf32> to vector<1x1xf32>
    %c0_6 = arith.constant 0 : index
    %c0_7 = arith.constant 0 : index
    %9 = vector.load %arg2[%c0_6, %c0_7] : memref<128x2048xf32, #tpu.memory_space<vmem>>, vector<128x2048xf32>
    %cst = arith.constant dense<0.000000e+00> : vector<1x2048xf32>
    %10 = tpu.matmul %1, %9, %cst {dimension_numbers = #tpu.dot_dimension_numbers<[1], [0], [0], [1], [0, 0, 1, 1], [], []>} : vector<1x128xf32>, vector<128x2048xf32>, vector<1x2048xf32> -> vector<1x2048xf32>
    %cst_8 = arith.constant dense<0.000000e+00> : vector<32x2048xf32>
    %11 = tpu.matmul %3, %10, %cst_8 {dimension_numbers = #tpu.dot_dimension_numbers<[1], [0], [0], [1], [0, 0, 1, 1], [], []>} : vector<32x1xf32>, vector<1x2048xf32>, vector<32x2048xf32> -> vector<32x2048xf32>
    %12 = vector.broadcast %4 : vector<32x1xf32> to vector<32x2048xf32>
    %13 = arith.addf %11, %12 : vector<32x2048xf32>
    %14 = math.tanh %13 : vector<32x2048xf32>
    %c0_9 = arith.constant 0 : index
    %c0_10 = arith.constant 0 : index
    %15 = vector.load %arg3[%c0_9, %c0_10] : memref<32x32xf32, #tpu.memory_space<vmem>>, vector<32x32xf32>
    %cst_11 = arith.constant dense<0.000000e+00> : vector<32x2048xf32>
    %16 = tpu.matmul %15, %14, %cst_11 {dimension_numbers = #tpu.dot_dimension_numbers<[1], [0], [0], [1], [0, 0, 1, 1], [], []>} : vector<32x32xf32>, vector<32x2048xf32>, vector<32x2048xf32> -> vector<32x2048xf32>
    %17 = vector.broadcast %5 : vector<32x1xf32> to vector<32x2048xf32>
    %18 = arith.addf %16, %17 : vector<32x2048xf32>
    %19 = math.tanh %18 : vector<32x2048xf32>
    %cst_12 = arith.constant dense<0.000000e+00> : vector<1x2048xf32>
    %20 = tpu.matmul %7, %19, %cst_12 {dimension_numbers = #tpu.dot_dimension_numbers<[1], [0], [0], [1], [0, 0, 1, 1], [], []>} : vector<1x32xf32>, vector<32x2048xf32>, vector<1x2048xf32> -> vector<1x2048xf32>
    %21 = vector.broadcast %8 : vector<1x1xf32> to vector<1x2048xf32>
    %22 = arith.addf %20, %21 : vector<1x2048xf32>
    %cst_13 = arith.constant 0.000000e+00 : f32
    %23 = vector.broadcast %cst_13 : f32 to vector<1x2048xf32>
    %24 = arith.maximumf %22, %23 : vector<1x2048xf32>
    %25 = math.absf %22 : vector<1x2048xf32>
    %cst_14 = arith.constant 0.000000e+00 : f32
    %26 = vector.broadcast %cst_14 : f32 to vector<1x2048xf32>
    %27 = arith.subf %26, %25 : vector<1x2048xf32>
    %28 = math.exp %27 : vector<1x2048xf32>
    %cst_15 = arith.constant 1.000000e+00 : f32
    %29 = vector.broadcast %cst_15 : f32 to vector<1x2048xf32>
    %30 = arith.addf %29, %28 : vector<1x2048xf32>
    %31 = math.log %30 : vector<1x2048xf32>
    %32 = arith.addf %24, %31 : vector<1x2048xf32>
    %c0_16 = arith.constant 0 : index
    %c0_17 = arith.constant 0 : index
    %33 = vector.load %arg6[%c0_16, %c0_17] : memref<2048x128xf32, #tpu.memory_space<vmem>>, vector<2048x128xf32>
    %cst_18 = arith.constant dense<0.000000e+00> : vector<1x128xf32>
    %34 = tpu.matmul %32, %33, %cst_18 {dimension_numbers = #tpu.dot_dimension_numbers<[1], [0], [0], [1], [0, 0, 1, 1], [], []>} : vector<1x2048xf32>, vector<2048x128xf32>, vector<1x128xf32> -> vector<1x128xf32>
    %c0_19 = arith.constant 0 : index
    %c0_20 = arith.constant 0 : index
    %35 = vector.load %arg7[%c0_19, %c0_20] : memref<2048x128xf32, #tpu.memory_space<vmem>>, vector<2048x128xf32>
    %cst_21 = arith.constant dense<0.000000e+00> : vector<1x128xf32>
    %36 = tpu.matmul %22, %35, %cst_21 {dimension_numbers = #tpu.dot_dimension_numbers<[1], [0], [0], [1], [0, 0, 1, 1], [], []>} : vector<1x2048xf32>, vector<2048x128xf32>, vector<1x128xf32> -> vector<1x128xf32>
    %cst_22 = arith.constant 5.000000e-01 : f32
    %37 = vector.broadcast %cst_22 : f32 to vector<1x128xf32>
    %38 = arith.mulf %37, %1 : vector<1x128xf32>
    %39 = arith.mulf %38, %34 : vector<1x128xf32>
    %cst_23 = arith.constant 0.000000e+00 : f32
    %40 = vector.broadcast %cst_23 : f32 to vector<1x128xf32>
    %41 = arith.maximumf %39, %40 : vector<1x128xf32>
    %42 = math.absf %39 : vector<1x128xf32>
    %cst_24 = arith.constant 0.000000e+00 : f32
    %43 = vector.broadcast %cst_24 : f32 to vector<1x128xf32>
    %44 = arith.subf %43, %42 : vector<1x128xf32>
    %45 = math.exp %44 : vector<1x128xf32>
    %cst_25 = arith.constant 1.000000e+00 : f32
    %46 = vector.broadcast %cst_25 : f32 to vector<1x128xf32>
    %47 = arith.addf %46, %45 : vector<1x128xf32>
    %48 = math.log %47 : vector<1x128xf32>
    %49 = arith.addf %41, %48 : vector<1x128xf32>
    %cst_26 = arith.constant 0.000000e+00 : f32
    %50 = vector.broadcast %cst_26 : f32 to vector<1x128xf32>
    %51 = arith.maximumf %36, %50 : vector<1x128xf32>
    %52 = math.absf %36 : vector<1x128xf32>
    %cst_27 = arith.constant 0.000000e+00 : f32
    %53 = vector.broadcast %cst_27 : f32 to vector<1x128xf32>
    %54 = arith.subf %53, %52 : vector<1x128xf32>
    %55 = math.exp %54 : vector<1x128xf32>
    %cst_28 = arith.constant 1.000000e+00 : f32
    %56 = vector.broadcast %cst_28 : f32 to vector<1x128xf32>
    %57 = arith.addf %56, %55 : vector<1x128xf32>
    %58 = math.log %57 : vector<1x128xf32>
    %59 = arith.addf %51, %58 : vector<1x128xf32>
    %cst_29 = arith.constant -1.500000e+01 : f32
    %60 = vector.broadcast %cst_29 : f32 to vector<1x128xf32>
    %61 = arith.cmpf olt, %36, %60 : vector<1x128xf32>
    %cst_30 = arith.constant 1.000000e-30 : f32
    %62 = vector.broadcast %cst_30 : f32 to vector<1x128xf32>
    %63 = arith.maximumf %59, %62 : vector<1x128xf32>
    %64 = math.log %63 : vector<1x128xf32>
    %65 = arith.select %61, %36, %64 : vector<1x128xi1>, vector<1x128xf32>
    %66 = arith.addf %65, %39 : vector<1x128xf32>
    %cst_31 = arith.constant 2.000000e+00 : f32
    %67 = vector.broadcast %cst_31 : f32 to vector<1x128xf32>
    %68 = arith.mulf %67, %49 : vector<1x128xf32>
    %69 = arith.subf %66, %68 : vector<1x128xf32>
    %cst_32 = arith.constant 0.000000e+00 : f32
    %70 = vector.broadcast %cst_32 : f32 to vector<1x128xf32>
    %71 = arith.subf %70, %69 : vector<1x128xf32>
    %c0_33 = arith.constant 0 : index
    %c0_34 = arith.constant 0 : index
    %c0_35 = arith.constant 0 : index
    %72 = vector.load %arg8[%c0_33, %c0_34, %c0_35] : memref<1x1x128xf32, #tpu.memory_space<vmem>>, vector<1x1x128xf32>
    %73 = vector.shape_cast %72 : vector<1x1x128xf32> to vector<1x128xf32>
    %74 = vector.shape_cast %71 : vector<1x128xf32> to vector<1x1x128xf32>
    tpu.vector_store %arg8[%c0_33, %c0_34, %c0_35], %74 {strides = array<i32>} : memref<1x1x128xf32, #tpu.memory_space<vmem>>, vector<1x1x128xf32>,
    return
  }
  func.func @transform_0(%arg0: i32) -> (i32, i32, i32) {
    %c0_i32 = arith.constant 0 : i32
    %c0_i32_0 = arith.constant 0 : i32
    %c0_i32_1 = arith.constant 0 : i32
    return %arg0, %c0_i32, %c0_i32_0 : i32, i32, i32
  }
  func.func @transform_1(%arg0: i32) -> (i32, i32) {
    %c0_i32 = arith.constant 0 : i32
    %c0_i32_0 = arith.constant 0 : i32
    %c0_i32_1 = arith.constant 0 : i32
    return %c0_i32, %c0_i32_0 : i32, i32
  }
  func.func @transform_2(%arg0: i32) -> (i32, i32) {
    %c0_i32 = arith.constant 0 : i32
    %c0_i32_0 = arith.constant 0 : i32
    %c0_i32_1 = arith.constant 0 : i32
    return %c0_i32, %c0_i32_0 : i32, i32
  }
  func.func @transform_3(%arg0: i32) -> (i32, i32) {
    %c0_i32 = arith.constant 0 : i32
    %c0_i32_0 = arith.constant 0 : i32
    %c0_i32_1 = arith.constant 0 : i32
    return %c0_i32, %c0_i32_0 : i32, i32
  }
  func.func @transform_4(%arg0: i32) -> (i32, i32) {
    %c0_i32 = arith.constant 0 : i32
    %c0_i32_0 = arith.constant 0 : i32
    %c0_i32_1 = arith.constant 0 : i32
    return %c0_i32, %c0_i32_0 : i32, i32
  }
  func.func @transform_5(%arg0: i32) -> (i32, i32) {
    %c0_i32 = arith.constant 0 : i32
    %c0_i32_0 = arith.constant 0 : i32
    %c0_i32_1 = arith.constant 0 : i32
    return %c0_i32, %c0_i32_0 : i32, i32
  }
  func.func @transform_6(%arg0: i32) -> (i32, i32) {
    %c0_i32 = arith.constant 0 : i32
    %c0_i32_0 = arith.constant 0 : i32
    %c0_i32_1 = arith.constant 0 : i32
    return %c0_i32, %c0_i32_0 : i32, i32
  }
  func.func @transform_7(%arg0: i32) -> (i32, i32, i32) {
    %c0_i32 = arith.constant 0 : i32
    %c0_i32_0 = arith.constant 0 : i32
    %c0_i32_1 = arith.constant 0 : i32
    return %arg0, %c0_i32, %c0_i32_0 : i32, i32, i32
  }
}

</mosaic_0001>

<bundles_post_ra>
// kernel: tpu_custom_call.1
= control target key start
LH: loop header
LB: loop body
LE: loop exit
PB: predicated region body
PF: predicated region fallthrough
CT: control target
= control target key end

     0   :  { %s5438_s0 = inlined_call_operand.vmem [shape: f32[4,1,128], index: 0, kind: input, shape index: {}]   ;;  %s5439_s1 = inlined_call_operand.hbm [shape: f32[128,2048], index: 1, kind: input, shape index: {}]   ;;  %s5440_s2 = inlined_call_operand.vmem [shape: f32[32,32], index: 2, kind: input, shape index: {}]   ;;  %s5441_s3 = inlined_call_operand.vmem [shape: f32[32,3], index: 3, kind: input, shape index: {}]   ;;  %s5442_s4 = inlined_call_operand.vmem [shape: f32[2,32], index: 4, kind: input, shape index: {}]   ;;  %s5443_s5 = inlined_call_operand.hbm [shape: f32[2048,128], index: 5, kind: input, shape index: {}]   ;;  %s5444_s6 = inlined_call_operand.hbm [shape: f32[2048,128], index: 6, kind: input, shape index: {}]   ;;  %s5445_s7 = inlined_call_operand.hbm [shape: f32[4,1,128], index: 7, kind: output, shape index: {}]  }
   0x1   :  { %5446 = sst [smem:[#allocation13_spill]] %s5443_s5 }
   0x2   :  { %12 = vsyncpa [#allocation3], 0 }
   0x3   :  { %13 = vsyncpa [#allocation6], 0 }
   0x4   :  { %14 = vsyncpa [#allocation4], 0 }
   0x5   :  { %16 = vsyncpa [#allocation4 + $0x1], 0  ;;  %s4616_s24 = smov 0   ;;  %s4618_s25 = smov 0  }
   0x6   :  { %s4620_s26 = smov 0   ;;  %s4622_s27 = smov 0  }
   0x7 LB: > { %s4637_s28 = sadd.s32 4294967295, %s4565_s27   ;;  %s3819_s29 = sadd.s32 4294967294, %s4565_s27   ;;  %s4565_s27 = sphi %s4622_s27, %s5457_s27   ;;  %s4561_s26 = sphi %s4620_s26, %s5456_s26   ;;  %s4557_s25 = sphi %s4618_s25, %s5455_s25   ;;  %s4553_s24 = sphi %s4616_s24, %s5454_s24  }
   0x8   : > { %s4641_s30 = sadd.s32 1, %s4565_s27   ;;  %s181_s8 = sadd.s32 1, %s4561_s26 }
   0x9   : > { %s178_s9 = ssub.s32 %s4565_s27, %s4641_s30  ;;  %p191_p0 = scmp.ne.s32.totalorder %s4561_s26, %s4557_s25 }
   0xa   : > { %p179_p1 = scmp.eq.s32.totalorder %s178_s9, 0  ;;  %p192_p2 = scmp.eq.s32.totalorder %s4637_s28, 3 }
   0xb   : > { %p197_p3 = scmp.ne.s32.totalorder %s4557_s25, %s4553_s24  ;;  %p198_p4 = scmp.eq.s32.totalorder %s3819_s29, 3 }
   0xc   : > { %s4652_s10 = scalar_select %p179_p1, %s4561_s26, %s181_s8  }
   0xd   : > { %p4654_p5 = por %p192_p2, %p191_p0  ;;  %p4658_p6 = por %p198_p4, %p197_p3 }
   0xe   : > { %5447 = sst [smem:[#allocation12_spill]] %s4652_s10  ;;  %p3820_p7 = scmp.ge.s32.totalorder %s4565_s27, 1 }
   0xf   : > { %p205_p8 = scmp.lt.s32.totalorder %s4565_s27, 5  ;;  %p4019_p9 = scmp.eq.s32.totalorder %s4637_s28, 0 }
  0x10   : > { %s5451_s5 = sld [smem:[#allocation13_spill]]  ;;  %s4567_s17 = smov [#allocation5]  }
  0x11   : > { %p4665_p10 = pnand %p3820_p7, %p205_p8  ;;  %s241_s18 = sshll.u32 %s4567_s17, 4  ;;  %s242_s18 = int_to_ptr.vmem [resolvable:$true] %s241_s18 }
  0x12   : > { %s216_s22 = sshll.u32 %s5439_s1, 4  ;;  %s4568_s23 = smov 128   ;;  %s217_s22 = int_to_ptr.hbm [resolvable:$true] %s216_s22 }
  0x13   : > { %p4005_p11 = pneg %p4665_p10  ;;  %s4569_s29 = smov 8  }
  0x14   : > { %s4570_s8 = smov [#allocation2]   ;;  %s253_s17 = sshll.u32 %s5444_s6, 4  ;;  %s254_s17 = int_to_ptr.hbm [resolvable:$true] %s253_s17 }
  0x15   : > { %p4676_p12 = pnand %p4019_p9, %p4005_p11  ;;  %s218_s9 = sshll.u32 %s4570_s8, 4  ;;  %s219_s9 = int_to_ptr.vmem [resolvable:$true] %s218_s9 }
  0x16   : > { %s239_s16 = sshll.u32 %s5451_s5, 4  ;;  %s4571_s5 = smov 2048   ;;  %s240_s16 = int_to_ptr.hbm [resolvable:$true] %s239_s16 }
  0x17   : > { %4011 = dma.hbm_to_vmem [thread:$0]  (!%p4676_p12), %s240_s16, 32768, %s242_s18, [#allocation6], %s4568_s23, %s4568_s23, %s4569_s29  }
  0x18   : > { %4008 = dma.hbm_to_vmem [thread:$0]  (!%p4676_p12), %s217_s22, 32768, %s219_s9, [#allocation3], %s4571_s5, %s4571_s5, %s4568_s23  }
  0x19   : > { %s4572_s10 = smov [#allocation7]   ;;  %277 = sbr.rel (%p4665_p10) target bundleno = 1104 (0x450), region = 48 }
  0x1a   : > { %s255_s20 = sshll.u32 %s4572_s10, 4  ;;  %s256_s20 = int_to_ptr.vmem [resolvable:$true] %s255_s20 }
  0x1b   : > { %4014 = dma.hbm_to_vmem [thread:$0]  (!%p4676_p12), %s254_s17, 32768, %s256_s20, [#allocation6], %s4568_s23, %s4568_s23, %s4569_s29  }
  0x1e   : > { %4540 = dma.done.wait (%p4019_p9), [#allocation3], 32768  }
  0x1f   : > { %4542 = vsyncadd (%p4019_p9), [#allocation3], 4294934528 }
  0x20   : > { %4544 = dma.done.wait (%p4019_p9), [#allocation6], 65536  }
  0x21   : > { %4546 = vsyncadd (%p4019_p9), [#allocation6], 4294901760  ;;  %v566_v0 = vld [vmem:[#allocation2 + $0x780] sm:$0xff]  ;;  %v567_v1 = vld [vmem:[#allocation2 + $0x788] sm:$0xff]  ;;  %p317_p13 = scmp.lt.s32.totalorder %s4637_s28, 3  ;;  %vm931_vm0 = vcmask 1040384   ;;  %s3732_s29 = scalar_lea.hbm %s5445_s7, %s4637_s28 }
  0x22   : > { %v568_v2 = vld [vmem:[#allocation2 + $0x790] sm:$0xff]  ;;  %582 = vmatpush.msra.mxu0 %v566_v0  ;;  %602 = vmatpush.msra.mxu1 %v567_v1  ;;  %v569_v3 = vld [vmem:[#allocation2 + $0x798] sm:$0xff]  ;;  %v550_v4 = vld [vmem:[#allocation2 + $0x700] sm:$0xff]  ;;  %vm922_vm1 = vcmask 7168   ;;  %vm1528_vm2 = vcmask 261120   ;;  %s3736_s14 = sshll.u32 %s3732_s29, 4  ;;  %s3737_s14 = int_to_ptr.hbm [resolvable:$true] %s3736_s14 }
  0x23   : > { %v551_v5 = vld [vmem:[#allocation2 + $0x708] sm:$0xff]  ;;  %622 = vmatpush.msra.mxu2 %v568_v2  ;;  %642 = vmatpush.msra.mxu3 %v569_v3  ;;  %v552_v6 = vld [vmem:[#allocation2 + $0x710] sm:$0xff]  ;;  %v553_v7 = vld [vmem:[#allocation2 + $0x718] sm:$0xff]  ;;  %s318_s5 = scalar_select %p317_p13, %s4637_s28, 3 }
  0x24   : > { %v534_v8 = vld [vmem:[#allocation2 + $0x680] sm:$0xff]  ;;  %583 = vmatpush.msra.mxu0 %v550_v4  ;;  %603 = vmatpush.msra.mxu1 %v551_v5  ;;  %v535_v9 = vld [vmem:[#allocation2 + $0x688] sm:$0xff]  ;;  %v536_v10 = vld [vmem:[#allocation2 + $0x690] sm:$0xff]  ;;  %s4509_s17 = sshra.s32 %s3737_s14, 4  ;;  %s4515_s10 = scalar_lea.hbm %s5445_s7, 4  ;;  %s4510_s17 = int_to_ptr.hbm [resolvable:$true] %s4509_s17 }
  0x25   : > { %v537_v11 = vld [vmem:[#allocation2 + $0x698] sm:$0xff]  ;;  %623 = vmatpush.msra.mxu2 %v552_v6  ;;  %643 = vmatpush.msra.mxu3 %v553_v7  ;;  %v518_v12 = vld [vmem:[#allocation2 + $0x600] sm:$0xff]  ;;  %v519_v13 = vld [vmem:[#allocation2 + $0x608] sm:$0xff]  ;;  %s4709_s16 = scalar_lea.vmem %s5438_s0, %s318_s5  ;;  %s4511_s20 = scalar_lea.hbm %s4510_s17, 1 }
  0x26   : > { %584 = vmatpush.msra.mxu0 %v534_v8  ;;  %604 = vmatpush.msra.mxu1 %v535_v9  ;;  %v520_v14 = vld [vmem:[#allocation2 + $0x610] sm:$0xff]  ;;  %v521_v15 = vld [vmem:[#allocation2 + $0x618] sm:$0xff]  ;;  %v502_v16 = vld [vmem:[#allocation2 + $0x580] sm:$0xff]  ;;  %p4512_p0 = scmp.ne.s32.totalorder %s4510_s17, %s4511_s20  ;;  %p4516_p3 = scmp.lt.s32.totalorder %s4510_s17, %s5445_s7 }
  0x27   : > { %624 = vmatpush.msra.mxu2 %v536_v10  ;;  %644 = vmatpush.msra.mxu3 %v537_v11  ;;  %v503_v17 = vld [vmem:[#allocation2 + $0x588] sm:$0xff]  ;;  %v504_v18 = vld [vmem:[#allocation2 + $0x590] sm:$0xff]  ;;  %v505_v19 = vld [vmem:[#allocation2 + $0x598] sm:$0xff]  ;;  %p4517_p4 = scmp.lt.s32.totalorder %s4515_s10, %s4511_s20 }
  0x28   : > { %585 = vmatpush.msra.mxu0 %v518_v12  ;;  %605 = vmatpush.msra.mxu1 %v519_v13  ;;  %v486_v20 = vld [vmem:[#allocation2 + $0x500] sm:$0xff]  ;;  %v487_v21 = vld [vmem:[#allocation2 + $0x508] sm:$0xff]  ;;  %v488_v22 = vld [vmem:[#allocation2 + $0x510] sm:$0xff]  ;;  %p4513_p1 = pnand %p4512_p0, %p4654_p5 }
  0x29   : > { %625 = vmatpush.msra.mxu2 %v520_v14  ;;  %645 = vmatpush.msra.mxu3 %v521_v15  ;;  %v489_v23 = vld [vmem:[#allocation2 + $0x518] sm:$0xff]  ;;  %v470_v24 = vld [vmem:[#allocation2 + $0x480] sm:$0xff]  ;;  %v471_v25 = vld [vmem:[#allocation2 + $0x488] sm:$0xff]  ;;  %p4518_p7 = por %p4517_p4, %p4516_p3 }
  0x2a   : > { %586 = vmatpush.msra.mxu0 %v502_v16  ;;  %606 = vmatpush.msra.mxu1 %v503_v17  ;;  %v472_v26 = vld [vmem:[#allocation2 + $0x490] sm:$0xff]  ;;  %v473_v27 = vld [vmem:[#allocation2 + $0x498] sm:$0xff]  ;;  %v454_v28 = vld [vmem:[#allocation2 + $0x400] sm:$0xff]  ;;  %p4514_p2 = pneg %p4513_p1 }
  0x2b   : > { %626 = vmatpush.msra.mxu2 %v504_v18  ;;  %646 = vmatpush.msra.mxu3 %v505_v19  ;;  %v455_v29 = vld [vmem:[#allocation2 + $0x408] sm:$0xff]  ;;  %v456_v30 = vld [vmem:[#allocation2 + $0x410] sm:$0xff]  ;;  %v457_v31 = vld [vmem:[#allocation2 + $0x418] sm:$0xff] }
  0x2c   : > { %587 = vmatpush.msra.mxu0 %v486_v20  ;;  %607 = vmatpush.msra.mxu1 %v487_v21  ;;  %v438_v32 = vld [vmem:[#allocation2 + $0x380] sm:$0xff]  ;;  %v439_v33 = vld [vmem:[#allocation2 + $0x388] sm:$0xff]  ;;  %v440_v34 = vld [vmem:[#allocation2 + $0x390] sm:$0xff]  ;;  %p4519_p8 = pnand %p4518_p7, %p4514_p2 }
  0x2d   : > { %627 = vmatpush.msra.mxu2 %v488_v22  ;;  %647 = vmatpush.msra.mxu3 %v489_v23  ;;  %v441_v35 = vld [vmem:[#allocation2 + $0x398] sm:$0xff]  ;;  %v422_v36 = vld [vmem:[#allocation2 + $0x300] sm:$0xff]  ;;  %v423_v37 = vld [vmem:[#allocation2 + $0x308] sm:$0xff] }
  0x2e   : > { %588 = vmatpush.msra.mxu0 %v470_v24  ;;  %608 = vmatpush.msra.mxu1 %v471_v25  ;;  %v424_v38 = vld [vmem:[#allocation2 + $0x310] sm:$0xff]  ;;  %v425_v39 = vld [vmem:[#allocation2 + $0x318] sm:$0xff]  ;;  %v406_v40 = vld [vmem:[#allocation2 + $0x280] sm:$0xff] }
  0x2f   : > { %628 = vmatpush.msra.mxu2 %v472_v26  ;;  %648 = vmatpush.msra.mxu3 %v473_v27  ;;  %v407_v41 = vld [vmem:[#allocation2 + $0x288] sm:$0xff]  ;;  %v408_v42 = vld [vmem:[#allocation2 + $0x290] sm:$0xff]  ;;  %v409_v43 = vld [vmem:[#allocation2 + $0x298] sm:$0xff] }
  0x30   : > { %589 = vmatpush.msra.mxu0 %v454_v28  ;;  %609 = vmatpush.msra.mxu1 %v455_v29  ;;  %v390_v44 = vld [vmem:[#allocation2 + $0x200] sm:$0xff]  ;;  %v391_v45 = vld [vmem:[#allocation2 + $0x208] sm:$0xff]  ;;  %v392_v46 = vld [vmem:[#allocation2 + $0x210] sm:$0xff] }
  0x31   : > { %629 = vmatpush.msra.mxu2 %v456_v30  ;;  %649 = vmatpush.msra.mxu3 %v457_v31  ;;  %v393_v47 = vld [vmem:[#allocation2 + $0x218] sm:$0xff]  ;;  %v374_v48 = vld [vmem:[#allocation2 + $0x180] sm:$0xff]  ;;  %v375_v49 = vld [vmem:[#allocation2 + $0x188] sm:$0xff] }
  0x32   : > { %590 = vmatpush.msra.mxu0 %v438_v32  ;;  %610 = vmatpush.msra.mxu1 %v439_v33  ;;  %v376_v50 = vld [vmem:[#allocation2 + $0x190] sm:$0xff]  ;;  %v377_v51 = vld [vmem:[#allocation2 + $0x198] sm:$0xff]  ;;  %v358_v52 = vld [vmem:[#allocation2 + $0x100] sm:$0xff] }
  0x33   : > { %630 = vmatpush.msra.mxu2 %v440_v34  ;;  %650 = vmatpush.msra.mxu3 %v441_v35  ;;  %v359_v53 = vld [vmem:[#allocation2 + $0x108] sm:$0xff]  ;;  %v360_v54 = vld [vmem:[#allocation2 + $0x110] sm:$0xff]  ;;  %v361_v55 = vld [vmem:[#allocation2 + $0x118] sm:$0xff] }
  0x34   : > { %591 = vmatpush.msra.mxu0 %v422_v36  ;;  %611 = vmatpush.msra.mxu1 %v423_v37  ;;  %v342_v56 = vld [vmem:[#allocation2 + $0x80] sm:$0xff]  ;;  %v343_v57 = vld [vmem:[#allocation2 + $0x88] sm:$0xff]  ;;  %v344_v58 = vld [vmem:[#allocation2 + $0x90] sm:$0xff] }
  0x35   : > { %631 = vmatpush.msra.mxu2 %v424_v38  ;;  %651 = vmatpush.msra.mxu3 %v425_v39  ;;  %v345_v59 = vld [vmem:[#allocation2 + $0x98] sm:$0xff]  ;;  %v326_v60 = vld [vmem:[#allocation2] sm:$0xff]  ;;  %v327_v61 = vld [vmem:[#allocation2 + $0x8] sm:$0xff] }
  0x36   : > { %592 = vmatpush.msra.mxu0 %v406_v40  ;;  %612 = vmatpush.msra.mxu1 %v407_v41  ;;  %v328_v62 = vld [vmem:[#allocation2 + $0x10] sm:$0xff]  ;;  %v329_v63 = vld [vmem:[#allocation2 + $0x18] sm:$0xff]  ;;  %v4712_v0 = vld [vmem:[%s4709_s16] sm:$0x1] }
  0x37   : > { %632 = vmatpush.msra.mxu2 %v408_v42  ;;  %652 = vmatpush.msra.mxu3 %v409_v43  ;;  %v572_v1 = vld [vmem:[#allocation2 + $0x7b0] sm:$0xff]  ;;  %v570_v2 = vld [vmem:[#allocation2 + $0x7a0] sm:$0xff]  ;;  %v571_v3 = vld [vmem:[#allocation2 + $0x7a8] sm:$0xff] }
  0x38   : > { %593 = vmatpush.msra.mxu0 %v390_v44  ;;  %613 = vmatpush.msra.mxu1 %v391_v45  ;;  %v573_v4 = vld [vmem:[#allocation2 + $0x7b8] sm:$0xff]  ;;  %v556_v5 = vld [vmem:[#allocation2 + $0x730] sm:$0xff]  ;;  %v554_v6 = vld [vmem:[#allocation2 + $0x720] sm:$0xff] }
  0x39   : > { %633 = vmatpush.msra.mxu2 %v392_v46  ;;  %653 = vmatpush.msra.mxu3 %v393_v47  ;;  %v555_v7 = vld [vmem:[#allocation2 + $0x728] sm:$0xff]  ;;  %v557_v8 = vld [vmem:[#allocation2 + $0x738] sm:$0xff]  ;;  %v540_v9 = vld [vmem:[#allocation2 + $0x6b0] sm:$0xff] }
  0x3a   : > { %594 = vmatpush.msra.mxu0 %v374_v48  ;;  %614 = vmatpush.msra.mxu1 %v375_v49  ;;  %v538_v10 = vld [vmem:[#allocation2 + $0x6a0] sm:$0xff]  ;;  %v539_v11 = vld [vmem:[#allocation2 + $0x6a8] sm:$0xff]  ;;  %v541_v12 = vld [vmem:[#allocation2 + $0x6b8] sm:$0xff] }
  0x3b   : > { %634 = vmatpush.msra.mxu2 %v376_v50  ;;  %654 = vmatpush.msra.mxu3 %v377_v51  ;;  %v524_v13 = vld [vmem:[#allocation2 + $0x630] sm:$0xff]  ;;  %v522_v14 = vld [vmem:[#allocation2 + $0x620] sm:$0xff]  ;;  %v523_v15 = vld [vmem:[#allocation2 + $0x628] sm:$0xff] }
  0x3c   : > { %595 = vmatpush.msra.mxu0 %v358_v52  ;;  %615 = vmatpush.msra.mxu1 %v359_v53  ;;  %v525_v16 = vld [vmem:[#allocation2 + $0x638] sm:$0xff]  ;;  %v508_v17 = vld [vmem:[#allocation2 + $0x5b0] sm:$0xff]  ;;  %v506_v18 = vld [vmem:[#allocation2 + $0x5a0] sm:$0xff] }
  0x3d   : > { %635 = vmatpush.msra.mxu2 %v360_v54  ;;  %655 = vmatpush.msra.mxu3 %v361_v55  ;;  %v507_v19 = vld [vmem:[#allocation2 + $0x5a8] sm:$0xff]  ;;  %v509_v20 = vld [vmem:[#allocation2 + $0x5b8] sm:$0xff]  ;;  %v492_v21 = vld [vmem:[#allocation2 + $0x530] sm:$0xff] }
  0x3e   : > { %596 = vmatpush.msra.mxu0 %v342_v56  ;;  %616 = vmatpush.msra.mxu1 %v343_v57  ;;  %v490_v22 = vld [vmem:[#allocation2 + $0x520] sm:$0xff]  ;;  %v491_v23 = vld [vmem:[#allocation2 + $0x528] sm:$0xff]  ;;  %v493_v24 = vld [vmem:[#allocation2 + $0x538] sm:$0xff] }
  0x3f   : > { %636 = vmatpush.msra.mxu2 %v344_v58  ;;  %656 = vmatpush.msra.mxu3 %v345_v59  ;;  %v476_v25 = vld [vmem:[#allocation2 + $0x4b0] sm:$0xff]  ;;  %v474_v26 = vld [vmem:[#allocation2 + $0x4a0] sm:$0xff]  ;;  %v475_v27 = vld [vmem:[#allocation2 + $0x4a8] sm:$0xff] }
  0x40   : > { %597 = vmatpush.msra.mxu0 %v326_v60  ;;  %617 = vmatpush.msra.mxu1 %v327_v61  ;;  %v477_v28 = vld [vmem:[#allocation2 + $0x4b8] sm:$0xff]  ;;  %v460_v29 = vld [vmem:[#allocation2 + $0x430] sm:$0xff]  ;;  %v458_v30 = vld [vmem:[#allocation2 + $0x420] sm:$0xff] }
  0x41   : > { %637 = vmatpush.msra.mxu2 %v328_v62  ;;  %657 = vmatpush.msra.mxu3 %v329_v63  ;;  %v459_v31 = vld [vmem:[#allocation2 + $0x428] sm:$0xff]  ;;  %v461_v32 = vld [vmem:[#allocation2 + $0x438] sm:$0xff]  ;;  %v444_v33 = vld [vmem:[#allocation2 + $0x3b0] sm:$0xff] }
  0x42   : > { %598 = vmatmul.f32.vlgmr.msra.gmra.mxu0 %v4712_v0  ;;  %618 = vmatmul.f32.vlgmr.msra.gmra.mxu1 %v4712_v0  ;;  %v442_v34 = vld [vmem:[#allocation2 + $0x3a0] sm:$0xff]  ;;  %v443_v35 = vld [vmem:[#allocation2 + $0x3a8] sm:$0xff]  ;;  %v445_v36 = vld [vmem:[#allocation2 + $0x3b8] sm:$0xff] }
  0x43   : > { %638 = vmatmul.f32.vlgmr.msra.gmra.mxu2 %v4712_v0  ;;  %658 = vmatmul.f32.vlgmr.msra.gmra.mxu3 %v4712_v0  ;;  %v428_v37 = vld [vmem:[#allocation2 + $0x330] sm:$0xff]  ;;  %v426_v38 = vld [vmem:[#allocation2 + $0x320] sm:$0xff]  ;;  %v427_v39 = vld [vmem:[#allocation2 + $0x328] sm:$0xff] }
  0x44   : > { %702 = vmatpush.msrb.mxu2 %v572_v1  ;;  %662 = vmatpush.msrb.mxu0 %v570_v2  ;;  %v429_v40 = vld [vmem:[#allocation2 + $0x338] sm:$0xff]  ;;  %v412_v41 = vld [vmem:[#allocation2 + $0x2b0] sm:$0xff]  ;;  %v410_v42 = vld [vmem:[#allocation2 + $0x2a0] sm:$0xff] }
  0x45   : > { %682 = vmatpush.msrb.mxu1 %v571_v3  ;;  %722 = vmatpush.msrb.mxu3 %v573_v4  ;;  %v411_v43 = vld [vmem:[#allocation2 + $0x2a8] sm:$0xff]  ;;  %v413_v44 = vld [vmem:[#allocation2 + $0x2b8] sm:$0xff]  ;;  %v396_v45 = vld [vmem:[#allocation2 + $0x230] sm:$0xff] }
  0x46   : > { %703 = vmatpush.msrb.mxu2 %v556_v5  ;;  %663 = vmatpush.msrb.mxu0 %v554_v6  ;;  %v394_v46 = vld [vmem:[#allocation2 + $0x220] sm:$0xff]  ;;  %v395_v47 = vld [vmem:[#allocation2 + $0x228] sm:$0xff]  ;;  %v397_v48 = vld [vmem:[#allocation2 + $0x238] sm:$0xff] }
  0x47   : > { %683 = vmatpush.msrb.mxu1 %v555_v7  ;;  %723 = vmatpush.msrb.mxu3 %v557_v8  ;;  %v380_v49 = vld [vmem:[#allocation2 + $0x1b0] sm:$0xff]  ;;  %v378_v50 = vld [vmem:[#allocation2 + $0x1a0] sm:$0xff]  ;;  %v379_v51 = vld [vmem:[#allocation2 + $0x1a8] sm:$0xff] }
  0x48   : > { %704 = vmatpush.msrb.mxu2 %v540_v9  ;;  %664 = vmatpush.msrb.mxu0 %v538_v10  ;;  %v381_v52 = vld [vmem:[#allocation2 + $0x1b8] sm:$0xff]  ;;  %v364_v53 = vld [vmem:[#allocation2 + $0x130] sm:$0xff]  ;;  %v362_v54 = vld [vmem:[#allocation2 + $0x120] sm:$0xff] }
  0x49   : > { %684 = vmatpush.msrb.mxu1 %v539_v11  ;;  %724 = vmatpush.msrb.mxu3 %v541_v12  ;;  %v363_v55 = vld [vmem:[#allocation2 + $0x128] sm:$0xff]  ;;  %v365_v56 = vld [vmem:[#allocation2 + $0x138] sm:$0xff]  ;;  %v348_v57 = vld [vmem:[#allocation2 + $0xb0] sm:$0xff] }
  0x4a   : > { %705 = vmatpush.msrb.mxu2 %v524_v13  ;;  %665 = vmatpush.msrb.mxu0 %v522_v14  ;;  %v346_v58 = vld [vmem:[#allocation2 + $0xa0] sm:$0xff]  ;;  %v347_v59 = vld [vmem:[#allocation2 + $0xa8] sm:$0xff]  ;;  %v349_v60 = vld [vmem:[#allocation2 + $0xb8] sm:$0xff] }
  0x4b   : > { %685 = vmatpush.msrb.mxu1 %v523_v15  ;;  %725 = vmatpush.msrb.mxu3 %v525_v16  ;;  %v332_v61 = vld [vmem:[#allocation2 + $0x30] sm:$0xff]  ;;  %v330_v62 = vld [vmem:[#allocation2 + $0x20] sm:$0xff]  ;;  %v331_v63 = vld [vmem:[#allocation2 + $0x28] sm:$0xff] }
  0x4c   : > { %706 = vmatpush.msrb.mxu2 %v508_v17  ;;  %666 = vmatpush.msrb.mxu0 %v506_v18  ;;  %v333_v1 = vld [vmem:[#allocation2 + $0x38] sm:$0xff]  ;;  %v576_v2 = vld [vmem:[#allocation2 + $0x7d0] sm:$0xff]  ;;  %v574_v3 = vld [vmem:[#allocation2 + $0x7c0] sm:$0xff] }
  0x4d   : > { %686 = vmatpush.msrb.mxu1 %v507_v19  ;;  %726 = vmatpush.msrb.mxu3 %v509_v20  ;;  %v575_v4 = vld [vmem:[#allocation2 + $0x7c8] sm:$0xff]  ;;  %v577_v5 = vld [vmem:[#allocation2 + $0x7d8] sm:$0xff]  ;;  %v560_v6 = vld [vmem:[#allocation2 + $0x750] sm:$0xff] }
  0x4e   : > { %707 = vmatpush.msrb.mxu2 %v492_v21  ;;  %667 = vmatpush.msrb.mxu0 %v490_v22  ;;  %v558_v7 = vld [vmem:[#allocation2 + $0x740] sm:$0xff]  ;;  %v559_v8 = vld [vmem:[#allocation2 + $0x748] sm:$0xff]  ;;  %v561_v9 = vld [vmem:[#allocation2 + $0x758] sm:$0xff] }
  0x4f   : > { %687 = vmatpush.msrb.mxu1 %v491_v23  ;;  %727 = vmatpush.msrb.mxu3 %v493_v24  ;;  %v544_v10 = vld [vmem:[#allocation2 + $0x6d0] sm:$0xff]  ;;  %v542_v11 = vld [vmem:[#allocation2 + $0x6c0] sm:$0xff]  ;;  %v543_v12 = vld [vmem:[#allocation2 + $0x6c8] sm:$0xff] }
  0x50   : > { %708 = vmatpush.msrb.mxu2 %v476_v25  ;;  %668 = vmatpush.msrb.mxu0 %v474_v26  ;;  %v545_v13 = vld [vmem:[#allocation2 + $0x6d8] sm:$0xff]  ;;  %v528_v14 = vld [vmem:[#allocation2 + $0x650] sm:$0xff]  ;;  %v526_v15 = vld [vmem:[#allocation2 + $0x640] sm:$0xff] }
  0x51   : > { %688 = vmatpush.msrb.mxu1 %v475_v27  ;;  %728 = vmatpush.msrb.mxu3 %v477_v28  ;;  %v527_v16 = vld [vmem:[#allocation2 + $0x648] sm:$0xff]  ;;  %v529_v17 = vld [vmem:[#allocation2 + $0x658] sm:$0xff]  ;;  %v512_v18 = vld [vmem:[#allocation2 + $0x5d0] sm:$0xff] }
  0x52   : > { %709 = vmatpush.msrb.mxu2 %v460_v29  ;;  %669 = vmatpush.msrb.mxu0 %v458_v30  ;;  %v510_v19 = vld [vmem:[#allocation2 + $0x5c0] sm:$0xff]  ;;  %v511_v20 = vld [vmem:[#allocation2 + $0x5c8] sm:$0xff]  ;;  %v513_v21 = vld [vmem:[#allocation2 + $0x5d8] sm:$0xff] }
  0x53   : > { %689 = vmatpush.msrb.mxu1 %v459_v31  ;;  %729 = vmatpush.msrb.mxu3 %v461_v32  ;;  %v496_v22 = vld [vmem:[#allocation2 + $0x550] sm:$0xff]  ;;  %v494_v23 = vld [vmem:[#allocation2 + $0x540] sm:$0xff]  ;;  %v495_v24 = vld [vmem:[#allocation2 + $0x548] sm:$0xff] }
  0x54   : > { %710 = vmatpush.msrb.mxu2 %v444_v33  ;;  %670 = vmatpush.msrb.mxu0 %v442_v34  ;;  %v497_v25 = vld [vmem:[#allocation2 + $0x558] sm:$0xff]  ;;  %v480_v26 = vld [vmem:[#allocation2 + $0x4d0] sm:$0xff]  ;;  %v478_v27 = vld [vmem:[#allocation2 + $0x4c0] sm:$0xff] }
  0x55   : > { %690 = vmatpush.msrb.mxu1 %v443_v35  ;;  %730 = vmatpush.msrb.mxu3 %v445_v36  ;;  %v479_v28 = vld [vmem:[#allocation2 + $0x4c8] sm:$0xff]  ;;  %v481_v29 = vld [vmem:[#allocation2 + $0x4d8] sm:$0xff]  ;;  %v464_v30 = vld [vmem:[#allocation2 + $0x450] sm:$0xff] }
  0x56   : > { %711 = vmatpush.msrb.mxu2 %v428_v37  ;;  %671 = vmatpush.msrb.mxu0 %v426_v38  ;;  %v462_v31 = vld [vmem:[#allocation2 + $0x440] sm:$0xff]  ;;  %v463_v32 = vld [vmem:[#allocation2 + $0x448] sm:$0xff]  ;;  %v465_v33 = vld [vmem:[#allocation2 + $0x458] sm:$0xff] }
  0x57   : > { %691 = vmatpush.msrb.mxu1 %v427_v39  ;;  %731 = vmatpush.msrb.mxu3 %v429_v40  ;;  %v448_v34 = vld [vmem:[#allocation2 + $0x3d0] sm:$0xff]  ;;  %v446_v35 = vld [vmem:[#allocation2 + $0x3c0] sm:$0xff]  ;;  %v447_v36 = vld [vmem:[#allocation2 + $0x3c8] sm:$0xff] }
  0x58   : > { %712 = vmatpush.msrb.mxu2 %v412_v41  ;;  %672 = vmatpush.msrb.mxu0 %v410_v42  ;;  %v449_v37 = vld [vmem:[#allocation2 + $0x3d8] sm:$0xff]  ;;  %v432_v38 = vld [vmem:[#allocation2 + $0x350] sm:$0xff]  ;;  %v430_v39 = vld [vmem:[#allocation2 + $0x340] sm:$0xff] }
  0x59   : > { %692 = vmatpush.msrb.mxu1 %v411_v43  ;;  %732 = vmatpush.msrb.mxu3 %v413_v44  ;;  %v431_v40 = vld [vmem:[#allocation2 + $0x348] sm:$0xff]  ;;  %v433_v41 = vld [vmem:[#allocation2 + $0x358] sm:$0xff]  ;;  %v416_v42 = vld [vmem:[#allocation2 + $0x2d0] sm:$0xff] }
  0x5a   : > { %713 = vmatpush.msrb.mxu2 %v396_v45  ;;  %673 = vmatpush.msrb.mxu0 %v394_v46  ;;  %v414_v43 = vld [vmem:[#allocation2 + $0x2c0] sm:$0xff]  ;;  %v415_v44 = vld [vmem:[#allocation2 + $0x2c8] sm:$0xff]  ;;  %v417_v45 = vld [vmem:[#allocation2 + $0x2d8] sm:$0xff] }
  0x5b   : > { %693 = vmatpush.msrb.mxu1 %v395_v47  ;;  %733 = vmatpush.msrb.mxu3 %v397_v48  ;;  %v400_v46 = vld [vmem:[#allocation2 + $0x250] sm:$0xff]  ;;  %v398_v47 = vld [vmem:[#allocation2 + $0x240] sm:$0xff]  ;;  %v399_v48 = vld [vmem:[#allocation2 + $0x248] sm:$0xff] }
  0x5c   : > { %714 = vmatpush.msrb.mxu2 %v380_v49  ;;  %674 = vmatpush.msrb.mxu0 %v378_v50  ;;  %v401_v49 = vld [vmem:[#allocation2 + $0x258] sm:$0xff]  ;;  %v384_v50 = vld [vmem:[#allocation2 + $0x1d0] sm:$0xff] }
  0x5d   : > { %694 = vmatpush.msrb.mxu1 %v379_v51  ;;  %734 = vmatpush.msrb.mxu3 %v381_v52  ;;  %v382_v51 = vld [vmem:[#allocation2 + $0x1c0] sm:$0xff]  ;;  %v383_v52 = vld [vmem:[#allocation2 + $0x1c8] sm:$0xff] }
  0x5e   : > { %715 = vmatpush.msrb.mxu2 %v364_v53  ;;  %675 = vmatpush.msrb.mxu0 %v362_v54  ;;  %v385_v53 = vld [vmem:[#allocation2 + $0x1d8] sm:$0xff]  ;;  %v368_v54 = vld [vmem:[#allocation2 + $0x150] sm:$0xff] }
  0x5f   : > { %695 = vmatpush.msrb.mxu1 %v363_v55  ;;  %735 = vmatpush.msrb.mxu3 %v365_v56  ;;  %v366_v55 = vld [vmem:[#allocation2 + $0x140] sm:$0xff]  ;;  %v367_v56 = vld [vmem:[#allocation2 + $0x148] sm:$0xff] }
  0x60   : > { %716 = vmatpush.msrb.mxu2 %v348_v57  ;;  %676 = vmatpush.msrb.mxu0 %v346_v58  ;;  %v369_v57 = vld [vmem:[#allocation2 + $0x158] sm:$0xff]  ;;  %v352_v58 = vld [vmem:[#allocation2 + $0xd0] sm:$0xff] }
  0x61   : > { %696 = vmatpush.msrb.mxu1 %v347_v59  ;;  %736 = vmatpush.msrb.mxu3 %v349_v60  ;;  %v350_v59 = vld [vmem:[#allocation2 + $0xc0] sm:$0xff]  ;;  %v351_v60 = vld [vmem:[#allocation2 + $0xc8] sm:$0xff] }
  0x62   : > { %717 = vmatpush.msrb.mxu2 %v332_v61  ;;  %677 = vmatpush.msrb.mxu0 %v330_v62  ;;  %v353_v61 = vld [vmem:[#allocation2 + $0xd8] sm:$0xff]  ;;  %v336_v62 = vld [vmem:[#allocation2 + $0x50] sm:$0xff] }
  0x63   : > { %697 = vmatpush.msrb.mxu1 %v331_v63  ;;  %718 = vmatmul.f32.vlgmr.msrb.gmra.mxu2 %v4712_v0  ;;  %v334_v63 = vld [vmem:[#allocation2 + $0x40] sm:$0xff] }
  0x64   : > { %737 = vmatpush.msrb.mxu3 %v333_v1  ;;  %678 = vmatmul.f32.vlgmr.msrb.gmra.mxu0 %v4712_v0  ;;  %v335_v1 = vld [vmem:[#allocation2 + $0x48] sm:$0xff] }
  0x65   : > { %698 = vmatmul.f32.vlgmr.msrb.gmra.mxu1 %v4712_v0  ;;  %738 = vmatmul.f32.vlgmr.msrb.gmra.mxu3 %v4712_v0 }
  0x66   : > { %782 = vmatpush.msra.mxu2 %v576_v2  ;;  %742 = vmatpush.msra.mxu0 %v574_v3  ;;  %v337_v2 = vld [vmem:[#allocation2 + $0x58] sm:$0xff]  ;;  %v580_v3 = vld [vmem:[#allocation2 + $0x7f0] sm:$0xff] }
  0x67   : > { %762 = vmatpush.msra.mxu1 %v575_v4  ;;  %802 = vmatpush.msra.mxu3 %v577_v5  ;;  %v578_v4 = vld [vmem:[#allocation2 + $0x7e0] sm:$0xff]  ;;  %v579_v5 = vld [vmem:[#allocation2 + $0x7e8] sm:$0xff] }
  0x68   : > { %783 = vmatpush.msra.mxu2 %v560_v6  ;;  %743 = vmatpush.msra.mxu0 %v558_v7  ;;  %v581_v6 = vld [vmem:[#allocation2 + $0x7f8] sm:$0xff]  ;;  %v564_v7 = vld [vmem:[#allocation2 + $0x770] sm:$0xff] }
  0x69   : > { %763 = vmatpush.msra.mxu1 %v559_v8  ;;  %803 = vmatpush.msra.mxu3 %v561_v9  ;;  %v562_v8 = vld [vmem:[#allocation2 + $0x760] sm:$0xff]  ;;  %v563_v9 = vld [vmem:[#allocation2 + $0x768] sm:$0xff] }
  0x6a   : > { %784 = vmatpush.msra.mxu2 %v544_v10  ;;  %744 = vmatpush.msra.mxu0 %v542_v11  ;;  %v565_v10 = vld [vmem:[#allocation2 + $0x778] sm:$0xff]  ;;  %v548_v11 = vld [vmem:[#allocation2 + $0x6f0] sm:$0xff] }
  0x6b   : > { %764 = vmatpush.msra.mxu1 %v543_v12  ;;  %804 = vmatpush.msra.mxu3 %v545_v13  ;;  %v546_v12 = vld [vmem:[#allocation2 + $0x6e0] sm:$0xff]  ;;  %v547_v13 = vld [vmem:[#allocation2 + $0x6e8] sm:$0xff] }
  0x6c   : > { %785 = vmatpush.msra.mxu2 %v528_v14  ;;  %745 = vmatpush.msra.mxu0 %v526_v15  ;;  %v549_v14 = vld [vmem:[#allocation2 + $0x6f8] sm:$0xff]  ;;  %v532_v15 = vld [vmem:[#allocation2 + $0x670] sm:$0xff] }
  0x6d   : > { %765 = vmatpush.msra.mxu1 %v527_v16  ;;  %805 = vmatpush.msra.mxu3 %v529_v17  ;;  %v530_v16 = vld [vmem:[#allocation2 + $0x660] sm:$0xff]  ;;  %v531_v17 = vld [vmem:[#allocation2 + $0x668] sm:$0xff] }
  0x6e   : > { %786 = vmatpush.msra.mxu2 %v512_v18  ;;  %746 = vmatpush.msra.mxu0 %v510_v19  ;;  %v533_v18 = vld [vmem:[#allocation2 + $0x678] sm:$0xff]  ;;  %v516_v19 = vld [vmem:[#allocation2 + $0x5f0] sm:$0xff] }
  0x6f   : > { %766 = vmatpush.msra.mxu1 %v511_v20  ;;  %806 = vmatpush.msra.mxu3 %v513_v21  ;;  %v514_v20 = vld [vmem:[#allocation2 + $0x5e0] sm:$0xff]  ;;  %v515_v21 = vld [vmem:[#allocation2 + $0x5e8] sm:$0xff] }
  0x70   : > { %787 = vmatpush.msra.mxu2 %v496_v22  ;;  %747 = vmatpush.msra.mxu0 %v494_v23  ;;  %v517_v22 = vld [vmem:[#allocation2 + $0x5f8] sm:$0xff]  ;;  %v500_v23 = vld [vmem:[#allocation2 + $0x570] sm:$0xff] }
  0x71   : > { %767 = vmatpush.msra.mxu1 %v495_v24  ;;  %807 = vmatpush.msra.mxu3 %v497_v25  ;;  %v498_v24 = vld [vmem:[#allocation2 + $0x560] sm:$0xff]  ;;  %v499_v25 = vld [vmem:[#allocation2 + $0x568] sm:$0xff] }
  0x72   : > { %788 = vmatpush.msra.mxu2 %v480_v26  ;;  %748 = vmatpush.msra.mxu0 %v478_v27  ;;  %v501_v26 = vld [vmem:[#allocation2 + $0x578] sm:$0xff]  ;;  %v484_v27 = vld [vmem:[#allocation2 + $0x4f0] sm:$0xff] }
  0x73   : > { %768 = vmatpush.msra.mxu1 %v479_v28  ;;  %808 = vmatpush.msra.mxu3 %v481_v29  ;;  %v482_v28 = vld [vmem:[#allocation2 + $0x4e0] sm:$0xff]  ;;  %v483_v29 = vld [vmem:[#allocation2 + $0x4e8] sm:$0xff] }
  0x74   : > { %789 = vmatpush.msra.mxu2 %v464_v30  ;;  %749 = vmatpush.msra.mxu0 %v462_v31  ;;  %v485_v30 = vld [vmem:[#allocation2 + $0x4f8] sm:$0xff]  ;;  %v468_v31 = vld [vmem:[#allocation2 + $0x470] sm:$0xff] }
  0x75   : > { %769 = vmatpush.msra.mxu1 %v463_v32  ;;  %809 = vmatpush.msra.mxu3 %v465_v33  ;;  %v466_v32 = vld [vmem:[#allocation2 + $0x460] sm:$0xff]  ;;  %v467_v33 = vld [vmem:[#allocation2 + $0x468] sm:$0xff] }
  0x76   : > { %790 = vmatpush.msra.mxu2 %v448_v34  ;;  %750 = vmatpush.msra.mxu0 %v446_v35  ;;  %v469_v34 = vld [vmem:[#allocation2 + $0x478] sm:$0xff]  ;;  %v452_v35 = vld [vmem:[#allocation2 + $0x3f0] sm:$0xff] }
  0x77   : > { %770 = vmatpush.msra.mxu1 %v447_v36  ;;  %810 = vmatpush.msra.mxu3 %v449_v37  ;;  %v450_v36 = vld [vmem:[#allocation2 + $0x3e0] sm:$0xff]  ;;  %v451_v37 = vld [vmem:[#allocation2 + $0x3e8] sm:$0xff] }
  0x78   : > { %791 = vmatpush.msra.mxu2 %v432_v38  ;;  %751 = vmatpush.msra.mxu0 %v430_v39  ;;  %v453_v38 = vld [vmem:[#allocation2 + $0x3f8] sm:$0xff]  ;;  %v436_v39 = vld [vmem:[#allocation2 + $0x370] sm:$0xff] }
  0x79   : > { %771 = vmatpush.msra.mxu1 %v431_v40  ;;  %811 = vmatpush.msra.mxu3 %v433_v41  ;;  %v434_v40 = vld [vmem:[#allocation2 + $0x360] sm:$0xff]  ;;  %v435_v41 = vld [vmem:[#allocation2 + $0x368] sm:$0xff] }
  0x7a   : > { %792 = vmatpush.msra.mxu2 %v416_v42  ;;  %752 = vmatpush.msra.mxu0 %v414_v43  ;;  %v437_v42 = vld [vmem:[#allocation2 + $0x378] sm:$0xff]  ;;  %v420_v43 = vld [vmem:[#allocation2 + $0x2f0] sm:$0xff] }
  0x7b   : > { %772 = vmatpush.msra.mxu1 %v415_v44  ;;  %812 = vmatpush.msra.mxu3 %v417_v45  ;;  %v418_v44 = vld [vmem:[#allocation2 + $0x2e0] sm:$0xff]  ;;  %v419_v45 = vld [vmem:[#allocation2 + $0x2e8] sm:$0xff] }
  0x7c   : > { %793 = vmatpush.msra.mxu2 %v400_v46  ;;  %753 = vmatpush.msra.mxu0 %v398_v47  ;;  %v421_v46 = vld [vmem:[#allocation2 + $0x2f8] sm:$0xff]  ;;  %v404_v47 = vld [vmem:[#allocation2 + $0x270] sm:$0xff] }
  0x7d   : > { %773 = vmatpush.msra.mxu1 %v399_v48  ;;  %813 = vmatpush.msra.mxu3 %v401_v49  ;;  %v402_v48 = vld [vmem:[#allocation2 + $0x260] sm:$0xff]  ;;  %v403_v49 = vld [vmem:[#allocation2 + $0x268] sm:$0xff] }
  0x7e   : > { %794 = vmatpush.msra.mxu2 %v384_v50  ;;  %754 = vmatpush.msra.mxu0 %v382_v51  ;;  %v405_v50 = vld [vmem:[#allocation2 + $0x278] sm:$0xff]  ;;  %v388_v51 = vld [vmem:[#allocation2 + $0x1f0] sm:$0xff] }
  0x7f   : > { %774 = vmatpush.msra.mxu1 %v383_v52  ;;  %814 = vmatpush.msra.mxu3 %v385_v53  ;;  %v386_v52 = vld [vmem:[#allocation2 + $0x1e0] sm:$0xff]  ;;  %v387_v53 = vld [vmem:[#allocation2 + $0x1e8] sm:$0xff] }
  0x80   : > { %795 = vmatpush.msra.mxu2 %v368_v54  ;;  %755 = vmatpush.msra.mxu0 %v366_v55  ;;  %v389_v54 = vld [vmem:[#allocation2 + $0x1f8] sm:$0xff]  ;;  %v372_v55 = vld [vmem:[#allocation2 + $0x170] sm:$0xff] }
  0x81   : > { %775 = vmatpush.msra.mxu1 %v367_v56  ;;  %815 = vmatpush.msra.mxu3 %v369_v57  ;;  %v370_v56 = vld [vmem:[#allocation2 + $0x160] sm:$0xff]  ;;  %v371_v57 = vld [vmem:[#allocation2 + $0x168] sm:$0xff] }
  0x82   : > { %796 = vmatpush.msra.mxu2 %v352_v58  ;;  %756 = vmatpush.msra.mxu0 %v350_v59  ;;  %v373_v58 = vld [vmem:[#allocation2 + $0x178] sm:$0xff]  ;;  %v356_v59 = vld [vmem:[#allocation2 + $0xf0] sm:$0xff] }
  0x83   : > { %776 = vmatpush.msra.mxu1 %v351_v60  ;;  %816 = vmatpush.msra.mxu3 %v353_v61  ;;  %v354_v60 = vld [vmem:[#allocation2 + $0xe0] sm:$0xff]  ;;  %v355_v61 = vld [vmem:[#allocation2 + $0xe8] sm:$0xff] }
  0x84   : > { %797 = vmatpush.msra.mxu2 %v336_v62  ;;  %757 = vmatpush.msra.mxu0 %v334_v63  ;;  %v357_v62 = vld [vmem:[#allocation2 + $0xf8] sm:$0xff]  ;;  %v340_v63 = vld [vmem:[#allocation2 + $0x70] sm:$0xff] }
  0x85   : > { %777 = vmatpush.msra.mxu1 %v335_v1  ;;  %798 = vmatmul.f32.vlgmr.msra.gmra.mxu2 %v4712_v0  ;;  %v338_v1 = vld [vmem:[#allocation2 + $0x60] sm:$0xff] }
  0x86   : > { %817 = vmatpush.msra.mxu3 %v337_v2  ;;  %758 = vmatmul.f32.vlgmr.msra.gmra.mxu0 %v4712_v0  ;;  %v339_v2 = vld [vmem:[#allocation2 + $0x68] sm:$0xff] }
  0x87   : > { %778 = vmatmul.f32.vlgmr.msra.gmra.mxu1 %v4712_v0  ;;  %818 = vmatmul.f32.vlgmr.msra.gmra.mxu3 %v4712_v0 }
  0x88   : > { %862 = vmatpush.msrb.mxu2 %v580_v3  ;;  %822 = vmatpush.msrb.mxu0 %v578_v4  ;;  %v341_v3 = vld [vmem:[#allocation2 + $0x78] sm:$0xff]  ;;  %v4733_v4 = vld [vmem:[%s5441_s3 + $0x8] sm:$0xff] }
  0x89   : > { %842 = vmatpush.msrb.mxu1 %v579_v5  ;;  %882 = vmatpush.msrb.mxu3 %v581_v6  ;;  %v4573_v5 = vmov 1   ;;  %v4739_v6 = vld [vmem:[%s5441_s3] sm:$0xff] }
  0x8a   : > { %863 = vmatpush.msrb.mxu2 %v564_v7  ;;  %823 = vmatpush.msrb.mxu0 %v562_v8 }
  0x8b   : > { %843 = vmatpush.msrb.mxu1 %v563_v9  ;;  %883 = vmatpush.msrb.mxu3 %v565_v10  ;;  %v4757_v9 = vld [vmem:[%s5441_s3 + $0x10] sm:$0xff] }
  0x8c   : > { %864 = vmatpush.msrb.mxu2 %v548_v11  ;;  %824 = vmatpush.msrb.mxu0 %v546_v12 }
  0x8d   : > { %844 = vmatpush.msrb.mxu1 %v547_v13  ;;  %884 = vmatpush.msrb.mxu3 %v549_v14 }
  0x8e   : > { %865 = vmatpush.msrb.mxu2 %v532_v15  ;;  %825 = vmatpush.msrb.mxu0 %v530_v16 }
  0x8f   : > { %845 = vmatpush.msrb.mxu1 %v531_v17  ;;  %885 = vmatpush.msrb.mxu3 %v533_v18 }
  0x90   : > { %866 = vmatpush.msrb.mxu2 %v516_v19  ;;  %826 = vmatpush.msrb.mxu0 %v514_v20 }
  0x91   : > { %846 = vmatpush.msrb.mxu1 %v515_v21  ;;  %886 = vmatpush.msrb.mxu3 %v517_v22 }
  0x92   : > { %867 = vmatpush.msrb.mxu2 %v500_v23  ;;  %827 = vmatpush.msrb.mxu0 %v498_v24 }
  0x93   : > { %847 = vmatpush.msrb.mxu1 %v499_v25  ;;  %887 = vmatpush.msrb.mxu3 %v501_v26 }
  0x94   : > { %868 = vmatpush.msrb.mxu2 %v484_v27  ;;  %828 = vmatpush.msrb.mxu0 %v482_v28 }
  0x95   : > { %848 = vmatpush.msrb.mxu1 %v483_v29  ;;  %888 = vmatpush.msrb.mxu3 %v485_v30 }
  0x96   : > { %869 = vmatpush.msrb.mxu2 %v468_v31  ;;  %829 = vmatpush.msrb.mxu0 %v466_v32 }
  0x97   : > { %849 = vmatpush.msrb.mxu1 %v467_v33  ;;  %889 = vmatpush.msrb.mxu3 %v469_v34 }
  0x98   : > { %870 = vmatpush.msrb.mxu2 %v452_v35  ;;  %830 = vmatpush.msrb.mxu0 %v450_v36 }
  0x99   : > { %850 = vmatpush.msrb.mxu1 %v451_v37  ;;  %890 = vmatpush.msrb.mxu3 %v453_v38 }
  0x9a   : > { %871 = vmatpush.msrb.mxu2 %v436_v39  ;;  %831 = vmatpush.msrb.mxu0 %v434_v40 }
  0x9b   : > { %851 = vmatpush.msrb.mxu1 %v435_v41  ;;  %891 = vmatpush.msrb.mxu3 %v437_v42 }
  0x9c   : > { %872 = vmatpush.msrb.mxu2 %v420_v43  ;;  %832 = vmatpush.msrb.mxu0 %v418_v44 }
  0x9d   : > { %852 = vmatpush.msrb.mxu1 %v419_v45  ;;  %892 = vmatpush.msrb.mxu3 %v421_v46 }
  0x9e   : > { %873 = vmatpush.msrb.mxu2 %v404_v47  ;;  %833 = vmatpush.msrb.mxu0 %v402_v48 }
  0x9f   : > { %853 = vmatpush.msrb.mxu1 %v403_v49  ;;  %893 = vmatpush.msrb.mxu3 %v405_v50 }
  0xa0   : > { %874 = vmatpush.msrb.mxu2 %v388_v51  ;;  %834 = vmatpush.msrb.mxu0 %v386_v52 }
  0xa1   : > { %854 = vmatpush.msrb.mxu1 %v387_v53  ;;  %894 = vmatpush.msrb.mxu3 %v389_v54 }
  0xa2   : > { %875 = vmatpush.msrb.mxu2 %v372_v55  ;;  %835 = vmatpush.msrb.mxu0 %v370_v56 }
  0xa3   : > { %855 = vmatpush.msrb.mxu1 %v371_v57  ;;  %895 = vmatpush.msrb.mxu3 %v373_v58 }
  0xa4   : > { %876 = vmatpush.msrb.mxu2 %v356_v59  ;;  %836 = vmatpush.msrb.mxu0 %v354_v60 }
  0xa5   : > { %856 = vmatpush.msrb.mxu1 %v355_v61  ;;  %896 = vmatpush.msrb.mxu3 %v357_v62 }
  0xa6   : > { %877 = vmatpush.msrb.mxu2 %v340_v63  ;;  %837 = vmatpush.msrb.mxu0 %v338_v1  ;;  %v4926_v63 = vld [vmem:[%s5440_s2] sm:$0xff] }
  0xa7   : > { %857 = vmatpush.msrb.mxu1 %v339_v2  ;;  %878 = vmatmul.f32.vlgmr.msrb.gmra.mxu2 %v4712_v0 }
  0xa8   : > { %897 = vmatpush.msrb.mxu3 %v341_v3  ;;  %838 = vmatmul.f32.vlgmr.msrb.gmra.mxu0 %v4712_v0 }
  0xa9   : > { %858 = vmatmul.f32.vlgmr.msrb.gmra.mxu1 %v4712_v0  ;;  %898 = vmatmul.f32.vlgmr.msrb.gmra.mxu3 %v4712_v0  ;;  %v4745_v0 = vld [vmem:[%s5441_s3 + $0x18] sm:$0xff] }
  0xaa   : > { %4068 = vset.pattern.permute.xlu1 %v4573_v5  ;;  %4067 = vset.pattern.permute.xlu0 %v4573_v5 }
  0xab   : > { %909 = vperm.xlu1 %4068, %v4733_v4   ;;  %919 = vperm.xlu0 %4067, %v4745_v0  }
  0xb3   : > { %904 = vperm.xlu1 %4068, %v4739_v6   ;;  %914 = vperm.xlu0 %4067, %v4757_v9  }
  0xbf   : > { %v599_v7 = vpop.f32.mrf.mxu0  ;;  %v619_v8 = vpop.f32.mrf.mxu1 }
  0xc0   : > { %3829 = vmatpush.msk.msra.mxu0 %vm931_vm0, %v599_v7  ;;  %3834 = vmatpush.msk.msra.mxu1 %vm931_vm0, %v619_v8 }
  0xc1   : > { %3830 = vmatmul.msk.f32.vlgmr.msra.gmra.mxu0 %vm922_vm1, %v4739_v6  ;;  %3835 = vmatmul.msk.f32.vlgmr.msra.gmra.mxu1 %vm922_vm1, %v4739_v6 }
  0xc6   : > { %v639_v10 = vpop.f32.mrf.mxu2  ;;  %v659_v11 = vpop.f32.mrf.mxu3 }
  0xc7   : > { %3839 = vmatpush.msk.msra.mxu2 %vm931_vm0, %v639_v10  ;;  %3844 = vmatpush.msk.msra.mxu3 %vm931_vm0, %v659_v11 }
  0xc8   : > { %3840 = vmatmul.msk.f32.vlgmr.msra.gmra.mxu2 %vm922_vm1, %v4739_v6  ;;  %3845 = vmatmul.msk.f32.vlgmr.msra.gmra.mxu3 %vm922_vm1, %v4739_v6 }
  0xc9   : > { %3831 = vmatmul.msk.f32.gmra.mxu0 %vm922_vm1, %v4733_v4  ;;  %3836 = vmatmul.msk.f32.gmra.mxu1 %vm922_vm1, %v4733_v4 }
  0xd0   : > { %3841 = vmatmul.msk.f32.gmra.mxu2 %vm922_vm1, %v4733_v4  ;;  %3846 = vmatmul.msk.f32.gmra.mxu3 %vm922_vm1, %v4733_v4 }
  0xd1   : > { %3832 = vmatmul.msk.f32.gmra.mxu0 %vm922_vm1, %v4757_v9  ;;  %3837 = vmatmul.msk.f32.gmra.mxu1 %vm922_vm1, %v4757_v9 }
  0xd8   : > { %3842 = vmatmul.msk.f32.gmra.mxu2 %vm922_vm1, %v4757_v9  ;;  %3847 = vmatmul.msk.f32.gmra.mxu3 %vm922_vm1, %v4757_v9 }
  0xd9   : > { %3833 = vmatmul.msk.f32.gmra.mxu0 %vm922_vm1, %v4745_v0  ;;  %3838 = vmatmul.msk.f32.gmra.mxu1 %vm922_vm1, %v4745_v0 }
  0xe0   : > { %3843 = vmatmul.msk.f32.gmra.mxu2 %vm922_vm1, %v4745_v0  ;;  %3848 = vmatmul.msk.f32.gmra.mxu3 %vm922_vm1, %v4745_v0 }
  0xe1   : > { %v679_v12 = vpop.f32.mrf.mxu0 }
  0xe2   : > { %v699_v13 = vpop.f32.mrf.mxu1  ;;  %3849 = vmatpush.msk.msrb.mxu0 %vm931_vm0, %v679_v12 }
  0xe3   : > { %3854 = vmatpush.msk.msrb.mxu1 %vm931_vm0, %v699_v13  ;;  %3850 = vmatmul.msk.f32.vlgmr.msrb.gmra.mxu0 %vm922_vm1, %v4739_v6  ;;  %v4574_v13 = vmov 2  }
  0xe4   : > { %3855 = vmatmul.msk.f32.vlgmr.msrb.gmra.mxu1 %vm922_vm1, %v4739_v6  ;;  %4071 = vset.pattern.permute.xlu1 %v4574_v13 }
  0xe5   : > { %4070 = vset.pattern.permute.xlu0 %v4574_v13  ;;  %1513 = vperm.xlu1 %4071, %v4739_v6  }
  0xe6   : > { %v719_v14 = vpop.f32.mrf.mxu2  ;;  %1517 = vperm.xlu0 %4070, %v4733_v4   ;;  %4069 = vset.pattern.permute.xlu2 %v4574_v13 }
  0xe7   : > { %3859 = vmatpush.msk.msrb.mxu2 %vm931_vm0, %v719_v14  ;;  %1525 = vperm.xlu2 %4069, %v4745_v0  }
  0xe8   : > { %v739_v15 = vpop.f32.mrf.mxu3  ;;  %3860 = vmatmul.msk.f32.vlgmr.msrb.gmra.mxu2 %vm922_vm1, %v4739_v6 }
  0xe9   : > { %3864 = vmatpush.msk.msrb.mxu3 %vm931_vm0, %v739_v15 }
  0xea   : > { %3865 = vmatmul.msk.f32.vlgmr.msrb.gmra.mxu3 %vm922_vm1, %v4739_v6 }
  0xeb   : > { %3851 = vmatmul.msk.f32.gmra.mxu0 %vm922_vm1, %v4733_v4 }
  0xec   : > { %3856 = vmatmul.msk.f32.gmra.mxu1 %vm922_vm1, %v4733_v4 }
  0xef   : > { %1521 = vperm.xlu2 %4069, %v4757_v9  }
  0xf0   : > { %3861 = vmatmul.msk.f32.gmra.mxu2 %vm922_vm1, %v4733_v4 }
  0xf2   : > { %3866 = vmatmul.msk.f32.gmra.mxu3 %vm922_vm1, %v4733_v4 }
  0xf3   : > { %3852 = vmatmul.msk.f32.gmra.mxu0 %vm922_vm1, %v4757_v9 }
  0xf4   : > { %3857 = vmatmul.msk.f32.gmra.mxu1 %vm922_vm1, %v4757_v9 }
  0xf8   : > { %3862 = vmatmul.msk.f32.gmra.mxu2 %vm922_vm1, %v4757_v9 }
  0xfa   : > { %3867 = vmatmul.msk.f32.gmra.mxu3 %vm922_vm1, %v4757_v9 }
  0xfb   : > { %3853 = vmatmul.msk.f32.gmra.mxu0 %vm922_vm1, %v4745_v0 }
  0xfc   : > { %3858 = vmatmul.msk.f32.gmra.mxu1 %vm922_vm1, %v4745_v0 }
 0x100   : > { %3863 = vmatmul.msk.f32.gmra.mxu2 %vm922_vm1, %v4745_v0 }
 0x102   : > { %3868 = vmatmul.msk.f32.gmra.mxu3 %vm922_vm1, %v4745_v0 }
 0x103   : > { %v759_v16 = vpop.f32.mrf.mxu0 }
 0x104   : > { %v779_v17 = vpop.f32.mrf.mxu1  ;;  %3869 = vmatpush.msk.msra.mxu0 %vm931_vm0, %v759_v16  ;;  %v4945_v16 = vld [vmem:[%s5440_s2 + $0x8] sm:$0xff] }
 0x105   : > { %3874 = vmatpush.msk.msra.mxu1 %vm931_vm0, %v779_v17  ;;  %3870 = vmatmul.msk.f32.vlgmr.msra.gmra.mxu0 %vm922_vm1, %v4739_v6 }
 0x106   : > { %3875 = vmatmul.msk.f32.vlgmr.msra.gmra.mxu1 %vm922_vm1, %v4739_v6 }
 0x108   : > { %v799_v18 = vpop.f32.mrf.mxu2 }
 0x109   : > { %3879 = vmatpush.msk.msra.mxu2 %vm931_vm0, %v799_v18 }
 0x10a   : > { %v819_v19 = vpop.f32.mrf.mxu3  ;;  %3880 = vmatmul.msk.f32.vlgmr.msra.gmra.mxu2 %vm922_vm1, %v4739_v6 }
 0x10b   : > { %3884 = vmatpush.msk.msra.mxu3 %vm931_vm0, %v819_v19 }
 0x10c   : > { %3885 = vmatmul.msk.f32.vlgmr.msra.gmra.mxu3 %vm922_vm1, %v4739_v6 }
 0x10d   : > { %3871 = vmatmul.msk.f32.gmra.mxu0 %vm922_vm1, %v4733_v4 }
 0x10e   : > { %3876 = vmatmul.msk.f32.gmra.mxu1 %vm922_vm1, %v4733_v4 }
 0x112   : > { %3881 = vmatmul.msk.f32.gmra.mxu2 %vm922_vm1, %v4733_v4 }
 0x114   : > { %3886 = vmatmul.msk.f32.gmra.mxu3 %vm922_vm1, %v4733_v4 }
 0x115   : > { %3872 = vmatmul.msk.f32.gmra.mxu0 %vm922_vm1, %v4757_v9 }
 0x116   : > { %3877 = vmatmul.msk.f32.gmra.mxu1 %vm922_vm1, %v4757_v9 }
 0x11a   : > { %3882 = vmatmul.msk.f32.gmra.mxu2 %vm922_vm1, %v4757_v9 }
 0x11c   : > { %3887 = vmatmul.msk.f32.gmra.mxu3 %vm922_vm1, %v4757_v9 }
 0x11d   : > { %3873 = vmatmul.msk.f32.gmra.mxu0 %vm922_vm1, %v4745_v0  ;;  %v4896_v26 = vpop.permute.xlu0 %919  ;;  %v4902_v33 = vpop.permute.xlu1 %909 }
 0x11e   : > { %3878 = vmatmul.msk.f32.gmra.mxu1 %vm922_vm1, %v4745_v0 }
 0x122   : > { %3883 = vmatmul.msk.f32.gmra.mxu2 %vm922_vm1, %v4745_v0 }
 0x124   : > { %3888 = vmatmul.msk.f32.gmra.mxu3 %vm922_vm1, %v4745_v0 }
 0x125   : > { %v839_v20 = vpop.f32.mrf.mxu0  ;;  %v4904_v34 = vpop.permute.xlu0 %914 }
 0x126   : > { %v859_v21 = vpop.f32.mrf.mxu1  ;;  %3889 = vmatpush.msk.msrb.mxu0 %vm931_vm0, %v839_v20  ;;  %v4912_v45 = vpop.permute.xlu1 %904 }
 0x127   : > { %3894 = vmatpush.msk.msrb.mxu1 %vm931_vm0, %v859_v21  ;;  %3890 = vmatmul.msk.f32.vlgmr.msrb.gmra.mxu0 %vm922_vm1, %v4739_v6 }
 0x128   : > { %3895 = vmatmul.msk.f32.vlgmr.msrb.gmra.mxu1 %vm922_vm1, %v4739_v6 }
 0x12a   : > { %v879_v22 = vpop.f32.mrf.mxu2 }
 0x12b   : > { %3899 = vmatpush.msk.msrb.mxu2 %vm931_vm0, %v879_v22 }
 0x12c   : > { %v899_v23 = vpop.f32.mrf.mxu3  ;;  %3900 = vmatmul.msk.f32.vlgmr.msrb.gmra.mxu2 %vm922_vm1, %v4739_v6 }
 0x12d   : > { %3904 = vmatpush.msk.msrb.mxu3 %vm931_vm0, %v899_v23 }
 0x12e   : > { %3905 = vmatmul.msk.f32.vlgmr.msrb.gmra.mxu3 %vm922_vm1, %v4739_v6 }
 0x12f   : > { %3891 = vmatmul.msk.f32.gmra.mxu0 %vm922_vm1, %v4733_v4 }
 0x130   : > { %3896 = vmatmul.msk.f32.gmra.mxu1 %vm922_vm1, %v4733_v4 }
 0x134   : > { %3901 = vmatmul.msk.f32.gmra.mxu2 %vm922_vm1, %v4733_v4 }
 0x136   : > { %3906 = vmatmul.msk.f32.gmra.mxu3 %vm922_vm1, %v4733_v4 }
 0x137   : > { %3892 = vmatmul.msk.f32.gmra.mxu0 %vm922_vm1, %v4757_v9 }
 0x138   : > { %3897 = vmatmul.msk.f32.gmra.mxu1 %vm922_vm1, %v4757_v9 }
 0x13c   : > { %3902 = vmatmul.msk.f32.gmra.mxu2 %vm922_vm1, %v4757_v9 }
 0x13e   : > { %3907 = vmatmul.msk.f32.gmra.mxu3 %vm922_vm1, %v4757_v9  ;;  %v997_v24 = vpop.f32.mrf.mxu0  ;;  %v1026_v25 = vpop.f32.mrf.mxu1 }
 0x13f   : > { %3893 = vmatmul.msk.f32.gmra.mxu0 %vm922_vm1, %v4745_v0  ;;  %v998_v48 = vadd.f32 %v997_v24, %v4912_v45  ;;  %v1027_v49 = vadd.f32 %v1026_v25, %v4912_v45  ;;  %v4959_v25 = vld [vmem:[%s5440_s2 + $0x10] sm:$0xff] }
 0x140   : > { %3898 = vmatmul.msk.f32.gmra.mxu1 %vm922_vm1, %v4745_v0 }
 0x144   : > { %3903 = vmatmul.msk.f32.gmra.mxu2 %vm922_vm1, %v4745_v0 }
 0x146   : > { %3908 = vmatmul.msk.f32.gmra.mxu3 %vm922_vm1, %v4745_v0  ;;  %v1000_v27 = vpop.f32.mrf.mxu0  ;;  %v1029_v28 = vpop.f32.mrf.mxu1 }
 0x147   : > { %v1001_v41 = vadd.f32 %v1000_v27, %v4902_v33  ;;  %v1030_v44 = vadd.f32 %v1029_v28, %v4902_v33 }
 0x14b   : > { %v1055_v29 = vpop.f32.mrf.mxu2  ;;  %v4900_v30 = vpop.f32.mrf.mxu3 }
 0x14c   : > { %v1056_v8 = vadd.f32 %v1055_v29, %v4912_v45  ;;  %v1085_v11 = vadd.f32 %v4900_v30, %v4912_v45 }
 0x14e   : > { %v1003_v31 = vpop.f32.mrf.mxu0  ;;  %v1032_v32 = vpop.f32.mrf.mxu1 }
 0x14f   : > { %v1004_v37 = vadd.f32 %v1003_v31, %v4904_v34  ;;  %v1033_v38 = vadd.f32 %v1032_v32, %v4904_v34 }
 0x151   : > { %4074 = vtanh.f32 %v1004_v37 }
 0x152   : > { %4076 = vtanh.f32 %v1033_v38  ;;  %v4979_v38 = vld [vmem:[%s5440_s2 + $0x18] sm:$0xff] }
 0x153   : > { %v1058_v35 = vpop.f32.mrf.mxu2  ;;  %v1087_v36 = vpop.f32.mrf.mxu3 }
 0x154   : > { %v1059_v5 = vadd.f32 %v1058_v35, %v4902_v33  ;;  %v1088_v7 = vadd.f32 %v1087_v36, %v4902_v33 }
 0x156   : > { %v1006_v39 = vpop.f32.mrf.mxu0  ;;  %v1035_v40 = vpop.f32.mrf.mxu1 }
 0x157   : > { %v1007_v42 = vadd.f32 %v1006_v39, %v4896_v26  ;;  %v1036_v43 = vadd.f32 %v1035_v40, %v4896_v26  ;;  %v4075_v50 = vpop.eup %4074 }
 0x158   : > { %v4077_v51 = vpop.eup %4076 }
 0x159   : > { %4078 = vtanh.f32 %v1007_v42 }
 0x15a   : > { %4080 = vtanh.f32 %v1036_v43 }
 0x15b   : > { %4082 = vtanh.f32 %v1001_v41  ;;  %v1061_v46 = vpop.f32.mrf.mxu2  ;;  %v1090_v47 = vpop.f32.mrf.mxu3 }
 0x15c   : > { %4084 = vtanh.f32 %v1030_v44  ;;  %v1062_v60 = vadd.f32 %v1061_v46, %v4904_v34  ;;  %v1091_v2 = vadd.f32 %v1090_v47, %v4904_v34 }
 0x15d   : > { %4086 = vtanh.f32 %v998_v48 }
 0x15e   : > { %4088 = vtanh.f32 %v1027_v49 }
 0x15f   : > { %v4079_v52 = vpop.eup %4078 }
 0x160   : > { %v4081_v53 = vpop.eup %4080  ;;  %v4916_v54 = vpop.f32.mrf.mxu0  ;;  %1553 = vmatpush.msra.mxu0 %v4079_v52 }
 0x161   : > { %v4083_v55 = vpop.eup %4082  ;;  %v4918_v56 = vpop.f32.mrf.mxu1  ;;  %1582 = vmatpush.msra.mxu1 %v4081_v53  ;;  %v1114_v39 = vadd.f32 %v4916_v54, %v4912_v45 }
 0x162   : > { %v4085_v57 = vpop.eup %4084  ;;  %1554 = vmatpush.msra.mxu0 %v4075_v50  ;;  %v1143_v41 = vadd.f32 %v4918_v56, %v4912_v45 }
 0x163   : > { %v1064_v58 = vpop.f32.mrf.mxu2  ;;  %v1093_v59 = vpop.f32.mrf.mxu3  ;;  %1583 = vmatpush.msra.mxu1 %v4077_v51 }
 0x164   : > { %v1065_v61 = vadd.f32 %v1064_v58, %v4896_v26  ;;  %v1094_v62 = vadd.f32 %v1093_v59, %v4896_v26  ;;  %1555 = vmatpush.msra.mxu0 %v4083_v55  ;;  %v4087_v1 = vpop.eup %4086 }
 0x165   : > { %1584 = vmatpush.msra.mxu1 %v4085_v57  ;;  %v4089_v3 = vpop.eup %4088 }
 0x166   : > { %4090 = vtanh.f32 %v1065_v61  ;;  %1556 = vmatpush.msra.mxu0 %v4087_v1 }
 0x167   : > { %4092 = vtanh.f32 %v1094_v62  ;;  %1585 = vmatpush.msra.mxu1 %v4089_v3  ;;  %3909 = vmatmul.msk.f32.vlgmr.msra.gmra.mxu0 %vm1528_vm2, %v4926_v63 }
 0x168   : > { %4094 = vtanh.f32 %v1062_v60  ;;  %v1116_v10 = vpop.f32.mrf.mxu0  ;;  %3913 = vmatmul.msk.f32.vlgmr.msra.gmra.mxu1 %vm1528_vm2, %v4926_v63 }
 0x169   : > { %4096 = vtanh.f32 %v1091_v2  ;;  %v1145_v12 = vpop.f32.mrf.mxu1  ;;  %v1117_v36 = vadd.f32 %v1116_v10, %v4902_v33 }
 0x16a   : > { %4098 = vtanh.f32 %v1059_v5  ;;  %v1146_v37 = vadd.f32 %v1145_v12, %v4902_v33 }
 0x16b   : > { %4100 = vtanh.f32 %v1088_v7  ;;  %v4940_v14 = vpop.f32.mrf.mxu2 }
 0x16c   : > { %v4091_v15 = vpop.eup %4090  ;;  %4102 = vtanh.f32 %v1056_v8  ;;  %v1172_v61 = vadd.f32 %v4940_v14, %v4912_v45 }
 0x16d   : > { %v4093_v17 = vpop.eup %4092  ;;  %4104 = vtanh.f32 %v1085_v11  ;;  %v4948_v18 = vpop.f32.mrf.mxu3  ;;  %1611 = vmatpush.msra.mxu2 %v4091_v15 }
 0x16e   : > { %v4095_v6 = vpop.eup %4094  ;;  %1640 = vmatpush.msra.mxu3 %v4093_v17  ;;  %v1201_v62 = vadd.f32 %v4948_v18, %v4912_v45 }
 0x16f   : > { %v4097_v4 = vpop.eup %4096  ;;  %1612 = vmatpush.msra.mxu2 %v4095_v6  ;;  %3910 = vmatmul.msk.f32.gmra.mxu0 %vm1528_vm2, %v4945_v16 }
 0x170   : > { %v4099_v19 = vpop.eup %4098  ;;  %v1119_v20 = vpop.f32.mrf.mxu0  ;;  %1641 = vmatpush.msra.mxu3 %v4097_v4  ;;  %3914 = vmatmul.msk.f32.gmra.mxu1 %vm1528_vm2, %v4945_v16 }
 0x171   : > { %v4101_v21 = vpop.eup %4100  ;;  %v1148_v0 = vpop.f32.mrf.mxu1  ;;  %1613 = vmatpush.msra.mxu2 %v4099_v19  ;;  %v1120_v29 = vadd.f32 %v1119_v20, %v4904_v34 }
 0x172   : > { %v4103_v22 = vpop.eup %4102  ;;  %1642 = vmatpush.msra.mxu3 %v4101_v21  ;;  %v1149_v32 = vadd.f32 %v1148_v0, %v4904_v34 }
 0x173   : > { %v4105_v23 = vpop.eup %4104  ;;  %v1174_v24 = vpop.f32.mrf.mxu2  ;;  %1614 = vmatpush.msra.mxu2 %v4103_v22 }
 0x174   : > { %1643 = vmatpush.msra.mxu3 %v4105_v23  ;;  %3917 = vmatmul.msk.f32.vlgmr.msra.gmra.mxu2 %vm1528_vm2, %v4926_v63  ;;  %v1175_v58 = vadd.f32 %v1174_v24, %v4902_v33 }
 0x175   : > { %v1203_v27 = vpop.f32.mrf.mxu3  ;;  %3921 = vmatmul.msk.f32.vlgmr.msra.gmra.mxu3 %vm1528_vm2, %v4926_v63 }
 0x176   : > { %v1204_v60 = vadd.f32 %v1203_v27, %v4902_v33 }
 0x177   : > { %3911 = vmatmul.msk.f32.gmra.mxu0 %vm1528_vm2, %v4959_v25 }
 0x178   : > { %v1122_v28 = vpop.f32.mrf.mxu0  ;;  %3915 = vmatmul.msk.f32.gmra.mxu1 %vm1528_vm2, %v4959_v25 }
 0x179   : > { %v1123_v30 = vadd.f32 %v1122_v28, %v4896_v26  ;;  %v1151_v31 = vpop.f32.mrf.mxu1 }
 0x17a   : > { %v1152_v35 = vadd.f32 %v1151_v31, %v4896_v26 }
 0x17b   : > { %4106 = vtanh.f32 %v1123_v30  ;;  %v1177_v9 = vpop.f32.mrf.mxu2 }
 0x17c   : > { %4108 = vtanh.f32 %v1152_v35  ;;  %3918 = vmatmul.msk.f32.gmra.mxu2 %vm1528_vm2, %v4945_v16  ;;  %v1178_v52 = vadd.f32 %v1177_v9, %v4904_v34 }
 0x17d   : > { %4110 = vtanh.f32 %v1120_v29  ;;  %v1206_v40 = vpop.f32.mrf.mxu3  ;;  %3922 = vmatmul.msk.f32.gmra.mxu3 %vm1528_vm2, %v4945_v16 }
 0x17e   : > { %4112 = vtanh.f32 %v1149_v32  ;;  %v1207_v55 = vadd.f32 %v1206_v40, %v4904_v34 }
 0x17f   : > { %4114 = vtanh.f32 %v1117_v36  ;;  %3912 = vmatmul.msk.f32.gmra.mxu0 %vm1528_vm2, %v4979_v38 }
 0x180   : > { %4116 = vtanh.f32 %v1146_v37  ;;  %3916 = vmatmul.msk.f32.gmra.mxu1 %vm1528_vm2, %v4979_v38 }
 0x181   : > { %v4107_v42 = vpop.eup %4106  ;;  %4118 = vtanh.f32 %v1114_v39 }
 0x182   : > { %v4109_v43 = vpop.eup %4108  ;;  %4120 = vtanh.f32 %v1143_v41  ;;  %v4991_v44 = vpop.f32.mrf.mxu0  ;;  %1669 = vmatpush.msrb.mxu0 %v4107_v42 }
 0x183   : > { %v4111_v46 = vpop.eup %4110  ;;  %v4993_v47 = vpop.f32.mrf.mxu1  ;;  %1698 = vmatpush.msrb.mxu1 %v4109_v43  ;;  %v1230_v29 = vadd.f32 %v4991_v44, %v4912_v45 }
 0x184   : > { %v1180_v48 = vpop.f32.mrf.mxu2  ;;  %v4113_v49 = vpop.eup %4112  ;;  %1670 = vmatpush.msrb.mxu0 %v4111_v46  ;;  %3919 = vmatmul.msk.f32.gmra.mxu2 %vm1528_vm2, %v4959_v25  ;;  %v1259_v31 = vadd.f32 %v4993_v47, %v4912_v45 }
 0x185   : > { %v1181_v50 = vadd.f32 %v1180_v48, %v4896_v26  ;;  %v4115_v51 = vpop.eup %4114  ;;  %v1209_v53 = vpop.f32.mrf.mxu3  ;;  %1699 = vmatpush.msrb.mxu1 %v4113_v49  ;;  %3923 = vmatmul.msk.f32.gmra.mxu3 %vm1528_vm2, %v4959_v25 }
 0x186   : > { %v4117_v54 = vpop.eup %4116  ;;  %v1210_v56 = vadd.f32 %v1209_v53, %v4896_v26  ;;  %1671 = vmatpush.msrb.mxu0 %v4115_v51 }
 0x187   : > { %v4119_v57 = vpop.eup %4118  ;;  %4122 = vtanh.f32 %v1181_v50  ;;  %1700 = vmatpush.msrb.mxu1 %v4117_v54 }
 0x188   : > { %v4121_v59 = vpop.eup %4120  ;;  %4124 = vtanh.f32 %v1210_v56  ;;  %1672 = vmatpush.msrb.mxu0 %v4119_v57 }
 0x189   : > { %4126 = vtanh.f32 %v1178_v52  ;;  %1701 = vmatpush.msrb.mxu1 %v4121_v59  ;;  %3925 = vmatmul.msk.f32.vlgmr.msrb.gmra.mxu0 %vm1528_vm2, %v4926_v63 }
 0x18a   : > { %4128 = vtanh.f32 %v1207_v55  ;;  %v1232_v1 = vpop.f32.mrf.mxu0  ;;  %3929 = vmatmul.msk.f32.vlgmr.msrb.gmra.mxu1 %vm1528_vm2, %v4926_v63 }
 0x18b   : > { %4130 = vtanh.f32 %v1175_v58  ;;  %v1261_v2 = vpop.f32.mrf.mxu1  ;;  %v1233_v24 = vadd.f32 %v1232_v1, %v4902_v33 }
 0x18c   : > { %4132 = vtanh.f32 %v1204_v60  ;;  %3920 = vmatmul.msk.f32.gmra.mxu2 %vm1528_vm2, %v4979_v38  ;;  %v1262_v28 = vadd.f32 %v1261_v2, %v4902_v33 }
 0x18d   : > { %v4123_v3 = vpop.eup %4122  ;;  %4134 = vtanh.f32 %v1172_v61  ;;  %v5015_v5 = vpop.f32.mrf.mxu2  ;;  %3924 = vmatmul.msk.f32.gmra.mxu3 %vm1528_vm2, %v4979_v38 }
 0x18e   : > { %v4125_v7 = vpop.eup %4124  ;;  %4136 = vtanh.f32 %v1201_v62  ;;  %1727 = vmatpush.msrb.mxu2 %v4123_v3  ;;  %v1288_v53 = vadd.f32 %v5015_v5, %v4912_v45 }
 0x18f   : > { %v4127_v8 = vpop.eup %4126  ;;  %v5019_v10 = vpop.f32.mrf.mxu3  ;;  %1756 = vmatpush.msrb.mxu3 %v4125_v7 }
 0x190   : > { %v4129_v11 = vpop.eup %4128  ;;  %1728 = vmatpush.msrb.mxu2 %v4127_v8  ;;  %v1317_v54 = vadd.f32 %v5019_v10, %v4912_v45 }
 0x191   : > { %v4131_v12 = vpop.eup %4130  ;;  %1757 = vmatpush.msrb.mxu3 %v4129_v11  ;;  %3926 = vmatmul.msk.f32.gmra.mxu0 %vm1528_vm2, %v4945_v16 }
 0x192   : > { %v4133_v13 = vpop.eup %4132  ;;  %v1235_v14 = vpop.f32.mrf.mxu0  ;;  %3930 = vmatmul.msk.f32.gmra.mxu1 %vm1528_vm2, %v4945_v16  ;;  %1729 = vmatpush.msrb.mxu2 %v4131_v12 }
 0x193   : > { %v4135_v15 = vpop.eup %4134  ;;  %v1264_v17 = vpop.f32.mrf.mxu1  ;;  %1758 = vmatpush.msrb.mxu3 %v4133_v13  ;;  %v1236_v20 = vadd.f32 %v1235_v14, %v4904_v34 }
 0x194   : > { %v4137_v18 = vpop.eup %4136  ;;  %1730 = vmatpush.msrb.mxu2 %v4135_v15  ;;  %v1265_v22 = vadd.f32 %v1264_v17, %v4904_v34 }
 0x195   : > { %v1290_v6 = vpop.f32.mrf.mxu2  ;;  %1759 = vmatpush.msrb.mxu3 %v4137_v18  ;;  %3933 = vmatmul.msk.f32.vlgmr.msrb.gmra.mxu2 %vm1528_vm2, %v4926_v63 }
 0x196   : > { %3937 = vmatmul.msk.f32.vlgmr.msrb.gmra.mxu3 %vm1528_vm2, %v4926_v63  ;;  %v1291_v50 = vadd.f32 %v1290_v6, %v4902_v33 }
 0x197   : > { %v1319_v4 = vpop.f32.mrf.mxu3 }
 0x198   : > { %v1320_v52 = vadd.f32 %v1319_v4, %v4902_v33 }
 0x199   : > { %3927 = vmatmul.msk.f32.gmra.mxu0 %vm1528_vm2, %v4959_v25 }
 0x19a   : > { %v1238_v19 = vpop.f32.mrf.mxu0  ;;  %3931 = vmatmul.msk.f32.gmra.mxu1 %vm1528_vm2, %v4959_v25 }
 0x19b   : > { %v1239_v21 = vadd.f32 %v1238_v19, %v4896_v26  ;;  %v1267_v0 = vpop.f32.mrf.mxu1 }
 0x19c   : > { %v1268_v23 = vadd.f32 %v1267_v0, %v4896_v26 }
 0x19d   : > { %4138 = vtanh.f32 %v1239_v21  ;;  %v1293_v27 = vpop.f32.mrf.mxu2  ;;  %3934 = vmatmul.msk.f32.gmra.mxu2 %vm1528_vm2, %v4945_v16 }
 0x19e   : > { %4140 = vtanh.f32 %v1268_v23  ;;  %3938 = vmatmul.msk.f32.gmra.mxu3 %vm1528_vm2, %v4945_v16  ;;  %v1294_v43 = vadd.f32 %v1293_v27, %v4904_v34 }
 0x19f   : > { %4142 = vtanh.f32 %v1236_v20  ;;  %v1322_v30 = vpop.f32.mrf.mxu3 }
 0x1a0   : > { %4144 = vtanh.f32 %v1265_v22  ;;  %v1323_v47 = vadd.f32 %v1322_v30, %v4904_v34 }
 0x1a1   : > { %4146 = vtanh.f32 %v1233_v24  ;;  %3928 = vmatmul.msk.f32.gmra.mxu0 %vm1528_vm2, %v4979_v38 }
 0x1a2   : > { %4148 = vtanh.f32 %v1262_v28  ;;  %3932 = vmatmul.msk.f32.gmra.mxu1 %vm1528_vm2, %v4979_v38 }
 0x1a3   : > { %v4139_v32 = vpop.eup %4138  ;;  %4150 = vtanh.f32 %v1230_v29 }
 0x1a4   : > { %v4141_v35 = vpop.eup %4140  ;;  %4152 = vtanh.f32 %v1259_v31  ;;  %v5051_v36 = vpop.f32.mrf.mxu0  ;;  %1785 = vmatpush.msra.mxu0 %v4139_v32 }
 0x1a5   : > { %v4143_v9 = vpop.eup %4142  ;;  %v5053_v37 = vpop.f32.mrf.mxu1  ;;  %1814 = vmatpush.msra.mxu1 %v4141_v35  ;;  %3935 = vmatmul.msk.f32.gmra.mxu2 %vm1528_vm2, %v4959_v25  ;;  %v1346_v20 = vadd.f32 %v5051_v36, %v4912_v45 }
 0x1a6   : > { %v1296_v39 = vpop.f32.mrf.mxu2  ;;  %v4145_v40 = vpop.eup %4144  ;;  %1786 = vmatpush.msra.mxu0 %v4143_v9  ;;  %3939 = vmatmul.msk.f32.gmra.mxu3 %vm1528_vm2, %v4959_v25  ;;  %v1375_v0 = vadd.f32 %v5053_v37, %v4912_v45 }
 0x1a7   : > { %v1297_v41 = vadd.f32 %v1296_v39, %v4896_v26  ;;  %v4147_v42 = vpop.eup %4146  ;;  %v1325_v44 = vpop.f32.mrf.mxu3  ;;  %1815 = vmatpush.msra.mxu1 %v4145_v40 }
 0x1a8   : > { %v4149_v46 = vpop.eup %4148  ;;  %v1326_v48 = vadd.f32 %v1325_v44, %v4896_v26  ;;  %1787 = vmatpush.msra.mxu0 %v4147_v42 }
 0x1a9   : > { %v4151_v49 = vpop.eup %4150  ;;  %4154 = vtanh.f32 %v1297_v41  ;;  %1816 = vmatpush.msra.mxu1 %v4149_v46 }
 0x1aa   : > { %v4153_v51 = vpop.eup %4152  ;;  %4156 = vtanh.f32 %v1326_v48  ;;  %1788 = vmatpush.msra.mxu0 %v4151_v49 }
 0x1ab   : > { %4158 = vtanh.f32 %v1294_v43  ;;  %1817 = vmatpush.msra.mxu1 %v4153_v51  ;;  %3941 = vmatmul.msk.f32.vlgmr.msra.gmra.mxu0 %vm1528_vm2, %v4926_v63  ;;  %v5157_v51 = vpop.permute.xlu2 %1525 }
 0x1ac   : > { %4160 = vtanh.f32 %v1323_v47  ;;  %v1348_v55 = vpop.f32.mrf.mxu0  ;;  %3945 = vmatmul.msk.f32.vlgmr.msra.gmra.mxu1 %vm1528_vm2, %v4926_v63 }
 0x1ad   : > { %4162 = vtanh.f32 %v1291_v50  ;;  %v1377_v56 = vpop.f32.mrf.mxu1  ;;  %3936 = vmatmul.msk.f32.gmra.mxu2 %vm1528_vm2, %v4979_v38  ;;  %v1349_v6 = vadd.f32 %v1348_v55, %v4902_v33 }
 0x1ae   : > { %4164 = vtanh.f32 %v1320_v52  ;;  %3940 = vmatmul.msk.f32.gmra.mxu3 %vm1528_vm2, %v4979_v38  ;;  %v1378_v19 = vadd.f32 %v1377_v56, %v4902_v33 }
 0x1af   : > { %v4155_v57 = vpop.eup %4154  ;;  %4166 = vtanh.f32 %v1288_v53  ;;  %v5077_v58 = vpop.f32.mrf.mxu2 }
 0x1b0   : > { %v4157_v59 = vpop.eup %4156  ;;  %4168 = vtanh.f32 %v1317_v54  ;;  %1843 = vmatpush.msra.mxu2 %v4155_v57  ;;  %v1404_v42 = vadd.f32 %v5077_v58, %v4912_v45 }
 0x1b1   : > { %v4159_v60 = vpop.eup %4158  ;;  %v5079_v61 = vpop.f32.mrf.mxu3  ;;  %1872 = vmatpush.msra.mxu3 %v4157_v59 }
 0x1b2   : > { %v4161_v62 = vpop.eup %4160  ;;  %1844 = vmatpush.msra.mxu2 %v4159_v60  ;;  %v5167_v59 = vpop.permute.xlu0 %1517 }
 0x1b3   : > { %v4163_v1 = vpop.eup %4162  ;;  %1873 = vmatpush.msra.mxu3 %v4161_v62  ;;  %3942 = vmatmul.msk.f32.gmra.mxu0 %vm1528_vm2, %v4945_v16  ;;  %v5163_v54 = vpop.permute.xlu2 %1521 }
 0x1b4   : > { %v4165_v2 = vpop.eup %4164  ;;  %v1351_v3 = vpop.f32.mrf.mxu0  ;;  %3946 = vmatmul.msk.f32.gmra.mxu1 %vm1528_vm2, %v4945_v16  ;;  %1845 = vmatpush.msra.mxu2 %v4163_v1 }
 0x1b5   : > { %v4167_v5 = vpop.eup %4166  ;;  %v1380_v7 = vpop.f32.mrf.mxu1  ;;  %1874 = vmatpush.msra.mxu3 %v4165_v2  ;;  %v1352_v13 = vadd.f32 %v1351_v3, %v4904_v34 }
 0x1b6   : > { %v4169_v8 = vpop.eup %4168  ;;  %1846 = vmatpush.msra.mxu2 %v4167_v5  ;;  %v1381_v17 = vadd.f32 %v1380_v7, %v4904_v34  ;;  %v5173_v3 = vpop.permute.xlu1 %1513 }
 0x1b7   : > { %v1406_v10 = vpop.f32.mrf.mxu2  ;;  %1875 = vmatpush.msra.mxu3 %v4169_v8  ;;  %3949 = vmatmul.msk.f32.vlgmr.msra.gmra.mxu2 %vm1528_vm2, %v4926_v63 }
 0x1b8   : > { %3953 = vmatmul.msk.f32.vlgmr.msra.gmra.mxu3 %vm1528_vm2, %v4926_v63  ;;  %v1407_v39 = vadd.f32 %v1406_v10, %v4902_v33 }
 0x1b9   : > { %v1435_v11 = vpop.f32.mrf.mxu3 }
 0x1ba   : > { %v1436_v41 = vadd.f32 %v1435_v11, %v4902_v33 }
 0x1bb   : > { %3943 = vmatmul.msk.f32.gmra.mxu0 %vm1528_vm2, %v4959_v25 }
 0x1bc   : > { %v1354_v12 = vpop.f32.mrf.mxu0  ;;  %3947 = vmatmul.msk.f32.gmra.mxu1 %vm1528_vm2, %v4959_v25 }
 0x1bd   : > { %v1355_v14 = vadd.f32 %v1354_v12, %v4896_v26  ;;  %v1383_v15 = vpop.f32.mrf.mxu1 }
 0x1be   : > { %v1384_v18 = vadd.f32 %v1383_v15, %v4896_v26 }
 0x1bf   : > { %4170 = vtanh.f32 %v1355_v14  ;;  %v1409_v4 = vpop.f32.mrf.mxu2  ;;  %3950 = vmatmul.msk.f32.gmra.mxu2 %vm1528_vm2, %v4945_v16 }
 0x1c0   : > { %4172 = vtanh.f32 %v1384_v18  ;;  %3954 = vmatmul.msk.f32.gmra.mxu3 %vm1528_vm2, %v4945_v16  ;;  %v1410_v27 = vadd.f32 %v1409_v4, %v4904_v34 }
 0x1c1   : > { %4174 = vtanh.f32 %v1352_v13  ;;  %v1438_v21 = vpop.f32.mrf.mxu3 }
 0x1c2   : > { %4176 = vtanh.f32 %v1381_v17  ;;  %v1439_v36 = vadd.f32 %v1438_v21, %v4904_v34 }
 0x1c3   : > { %4178 = vtanh.f32 %v1349_v6  ;;  %3944 = vmatmul.msk.f32.gmra.mxu0 %vm1528_vm2, %v4979_v38 }
 0x1c4   : > { %4180 = vtanh.f32 %v1378_v19  ;;  %3948 = vmatmul.msk.f32.gmra.mxu1 %vm1528_vm2, %v4979_v38  ;;  %v5184_v19 = vld [vmem:[%s5442_s4] sm:$0x3] }
 0x1c5   : > { %v4171_v22 = vpop.eup %4170  ;;  %4182 = vtanh.f32 %v1346_v20 }
 0x1c6   : > { %v4173_v23 = vpop.eup %4172  ;;  %4184 = vtanh.f32 %v1375_v0  ;;  %1901 = vmatpush.msrb.mxu0 %v4171_v22 }
 0x1c7   : > { %v4175_v24 = vpop.eup %4174  ;;  %1930 = vmatpush.msrb.mxu1 %v4173_v23  ;;  %v1412_v28 = vpop.f32.mrf.mxu2  ;;  %3951 = vmatmul.msk.f32.gmra.mxu2 %vm1528_vm2, %v4959_v25 }
 0x1c8   : > { %v4177_v29 = vpop.eup %4176  ;;  %v1413_v30 = vadd.f32 %v1412_v28, %v4896_v26  ;;  %1902 = vmatpush.msrb.mxu0 %v4175_v24  ;;  %3955 = vmatmul.msk.f32.gmra.mxu3 %vm1528_vm2, %v4959_v25 }
 0x1c9   : > { %v4179_v31 = vpop.eup %4178  ;;  %v1441_v32 = vpop.f32.mrf.mxu3  ;;  %1931 = vmatpush.msrb.mxu1 %v4177_v29 }
 0x1ca   : > { %v4181_v35 = vpop.eup %4180  ;;  %4186 = vtanh.f32 %v1413_v30  ;;  %v1442_v9 = vadd.f32 %v1441_v32, %v4896_v26  ;;  %1903 = vmatpush.msrb.mxu0 %v4179_v31  ;;  %v1433_v26 = vadd.f32 %v5079_v61, %v4912_v45 }
 0x1cb   : > { %v4183_v37 = vpop.eup %4182  ;;  %4188 = vtanh.f32 %v1410_v27  ;;  %1932 = vmatpush.msrb.mxu1 %v4181_v35 }
 0x1cc   : > { %v4185_v40 = vpop.eup %4184  ;;  %4190 = vtanh.f32 %v1442_v9  ;;  %1904 = vmatpush.msrb.mxu0 %v4183_v37 }
 0x1cd   : > { %1933 = vmatpush.msrb.mxu1 %v4185_v40  ;;  %3957 = vmatmul.msk.f32.vlgmr.msrb.gmra.mxu0 %vm1528_vm2, %v4926_v63  ;;  %4192 = vtanh.f32 %v1439_v36 }
 0x1ce   : > { %3961 = vmatmul.msk.f32.vlgmr.msrb.gmra.mxu1 %vm1528_vm2, %v4926_v63  ;;  %4194 = vtanh.f32 %v1407_v39  ;;  %v4575_v39 = vmov 0  }
 0x1cf   : > { %3952 = vmatmul.msk.f32.gmra.mxu2 %vm1528_vm2, %v4979_v38  ;;  %4196 = vtanh.f32 %v1436_v41  ;;  %4072 = vset.pattern.permute.xlu2 %v4575_v39 }
 0x1d0   : > { %v4187_v33 = vpop.eup %4186  ;;  %3956 = vmatmul.msk.f32.gmra.mxu3 %vm1528_vm2, %v4979_v38  ;;  %4198 = vtanh.f32 %v1404_v42  ;;  %4073 = vset.pattern.permute.xlu0 %v4575_v39 }
 0x1d1   : > { %v4189_v34 = vpop.eup %4188  ;;  %1959 = vmatpush.msrb.mxu2 %v4187_v33  ;;  %4200 = vtanh.f32 %v1433_v26  ;;  %2071 = vperm.xlu2 %4072, %v5184_v19  }
 0x1d2   : > { %v4191_v43 = vpop.eup %4190 }
 0x1d3   : > { %1988 = vmatpush.msrb.mxu3 %v4191_v43  ;;  %1960 = vmatpush.msrb.mxu2 %v4189_v34  ;;  %v4193_v45 = vpop.eup %4192 }
 0x1d4   : > { %v4195_v44 = vpop.eup %4194 }
 0x1d5   : > { %1989 = vmatpush.msrb.mxu3 %v4193_v45  ;;  %3958 = vmatmul.msk.f32.gmra.mxu0 %vm1528_vm2, %v4945_v16  ;;  %v4197_v46 = vpop.eup %4196 }
 0x1d6   : > { %3962 = vmatmul.msk.f32.gmra.mxu1 %vm1528_vm2, %v4945_v16  ;;  %1961 = vmatpush.msrb.mxu2 %v4195_v44  ;;  %v4199_v47 = vpop.eup %4198 }
 0x1d7   : > { %1990 = vmatpush.msrb.mxu3 %v4197_v46  ;;  %v4201_v48 = vpop.eup %4200 }
 0x1d8   : > { %1962 = vmatpush.msrb.mxu2 %v4199_v47 }
 0x1d9   : > { %1991 = vmatpush.msrb.mxu3 %v4201_v48  ;;  %3965 = vmatmul.msk.f32.vlgmr.msrb.gmra.mxu2 %vm1528_vm2, %v4926_v63 }
 0x1da   : > { %3969 = vmatmul.msk.f32.vlgmr.msrb.gmra.mxu3 %vm1528_vm2, %v4926_v63 }
 0x1dd   : > { %3959 = vmatmul.msk.f32.gmra.mxu0 %vm1528_vm2, %v4959_v25 }
 0x1de   : > { %3963 = vmatmul.msk.f32.gmra.mxu1 %vm1528_vm2, %v4959_v25 }
 0x1e1   : > { %3966 = vmatmul.msk.f32.gmra.mxu2 %vm1528_vm2, %v4945_v16 }
 0x1e2   : > { %3970 = vmatmul.msk.f32.gmra.mxu3 %vm1528_vm2, %v4945_v16 }
 0x1e4   : > { %v1558_v49 = vpop.f32.mrf.mxu0 }
 0x1e5   : > { %3960 = vmatmul.msk.f32.gmra.mxu0 %vm1528_vm2, %v4979_v38  ;;  %v1587_v50 = vpop.f32.mrf.mxu1  ;;  %v1559_v7 = vadd.f32 %v1558_v49, %v5173_v3 }
 0x1e6   : > { %3964 = vmatmul.msk.f32.gmra.mxu1 %vm1528_vm2, %v4979_v38  ;;  %v1588_v8 = vadd.f32 %v1587_v50, %v5173_v3 }
 0x1e9   : > { %3967 = vmatmul.msk.f32.gmra.mxu2 %vm1528_vm2, %v4959_v25 }
 0x1ea   : > { %3971 = vmatmul.msk.f32.gmra.mxu3 %vm1528_vm2, %v4959_v25 }
 0x1ec   : > { %v1561_v63 = vpop.f32.mrf.mxu0 }
 0x1ed   : > { %v1590_v52 = vpop.f32.mrf.mxu1  ;;  %v1562_v62 = vadd.f32 %v1561_v63, %v5167_v59 }
 0x1ee   : > { %v1591_v1 = vadd.f32 %v1590_v52, %v5167_v59 }
 0x1f1   : > { %3968 = vmatmul.msk.f32.gmra.mxu2 %vm1528_vm2, %v4979_v38 }
 0x1f2   : > { %3972 = vmatmul.msk.f32.gmra.mxu3 %vm1528_vm2, %v4979_v38 }
 0x1f4   : > { %v1564_v16 = vpop.f32.mrf.mxu0 }
 0x1f5   : > { %v1593_v53 = vpop.f32.mrf.mxu1  ;;  %v1565_v57 = vadd.f32 %v1564_v16, %v5163_v54 }
 0x1f6   : > { %v1594_v25 = vadd.f32 %v1593_v53, %v5163_v54 }
 0x1f7   : > { %v1616_v55 = vpop.f32.mrf.mxu2  ;;  %4202 = vtanh.f32 %v1565_v57 }
 0x1f8   : > { %v1645_v56 = vpop.f32.mrf.mxu3  ;;  %4204 = vtanh.f32 %v1594_v25  ;;  %v1617_v35 = vadd.f32 %v1616_v55, %v5173_v3 }
 0x1f9   : > { %v1646_v36 = vadd.f32 %v1645_v56, %v5173_v3 }
 0x1fc   : > { %v1567_v58 = vpop.f32.mrf.mxu0 }
 0x1fd   : > { %v1568_v60 = vadd.f32 %v1567_v58, %v5157_v51  ;;  %v1596_v61 = vpop.f32.mrf.mxu1  ;;  %v4203_v10 = vpop.eup %4202 }
 0x1fe   : > { %v1597_v38 = vadd.f32 %v1596_v61, %v5157_v51  ;;  %v4205_v11 = vpop.eup %4204 }
 0x1ff   : > { %4206 = vtanh.f32 %v1568_v60  ;;  %v1619_v2 = vpop.f32.mrf.mxu2 }
 0x200   : > { %4208 = vtanh.f32 %v1597_v38  ;;  %v1648_v5 = vpop.f32.mrf.mxu3  ;;  %v1620_v31 = vadd.f32 %v1619_v2, %v5167_v59 }
 0x201   : > { %4210 = vtanh.f32 %v1562_v62  ;;  %v1649_v32 = vadd.f32 %v1648_v5, %v5167_v59 }
 0x202   : > { %4212 = vtanh.f32 %v1591_v1 }
 0x203   : > { %4214 = vtanh.f32 %v1559_v7 }
 0x204   : > { %4216 = vtanh.f32 %v1588_v8 }
 0x205   : > { %v4207_v12 = vpop.eup %4206 }
 0x206   : > { %v4209_v13 = vpop.eup %4208  ;;  %v5177_v14 = vpop.f32.mrf.mxu0  ;;  %2089 = vmatpush.msra.mxu0 %v4207_v12 }
 0x207   : > { %v4211_v15 = vpop.eup %4210  ;;  %v5179_v17 = vpop.f32.mrf.mxu1  ;;  %2109 = vmatpush.msra.mxu1 %v4209_v13  ;;  %v1675_v57 = vadd.f32 %v5177_v14, %v5173_v3 }
 0x208   : > { %v1622_v18 = vpop.f32.mrf.mxu2  ;;  %v4213_v6 = vpop.eup %4212  ;;  %2090 = vmatpush.msra.mxu0 %v4203_v10  ;;  %v1704_v25 = vadd.f32 %v5179_v17, %v5173_v3 }
 0x209   : > { %v1651_v4 = vpop.f32.mrf.mxu3  ;;  %2110 = vmatpush.msra.mxu1 %v4205_v11  ;;  %v4215_v20 = vpop.eup %4214  ;;  %v1623_v28 = vadd.f32 %v1622_v18, %v5163_v54 }
 0x20a   : > { %2091 = vmatpush.msra.mxu0 %v4211_v15  ;;  %v4217_v21 = vpop.eup %4216  ;;  %v1652_v30 = vadd.f32 %v1651_v4, %v5163_v54 }
 0x20b   : > { %2111 = vmatpush.msra.mxu1 %v4213_v6 }
 0x20c   : > { %2092 = vmatpush.msra.mxu0 %v4215_v20 }
 0x20d   : > { %2112 = vmatpush.msra.mxu1 %v4217_v21  ;;  %3973 = vmatmul.msk.f32.vlgmr.msra.gmra.mxu0 %vm1528_vm2, %v5184_v19 }
 0x20e   : > { %v1677_v0 = vpop.f32.mrf.mxu0  ;;  %3974 = vmatmul.msk.f32.vlgmr.msra.gmra.mxu1 %vm1528_vm2, %v5184_v19 }
 0x20f   : > { %v1706_v22 = vpop.f32.mrf.mxu1  ;;  %v1678_v53 = vadd.f32 %v1677_v0, %v5167_v59 }
 0x210   : > { %v1625_v23 = vpop.f32.mrf.mxu2  ;;  %v1707_v56 = vadd.f32 %v1706_v22, %v5167_v59 }
 0x211   : > { %v1626_v24 = vadd.f32 %v1625_v23, %v5157_v51  ;;  %v1654_v27 = vpop.f32.mrf.mxu3 }
 0x212   : > { %v1655_v29 = vadd.f32 %v1654_v27, %v5157_v51 }
 0x213   : > { %4218 = vtanh.f32 %v1626_v24 }
 0x214   : > { %4220 = vtanh.f32 %v1655_v29 }
 0x215   : > { %4222 = vtanh.f32 %v1623_v28 }
 0x216   : > { %4224 = vtanh.f32 %v1652_v30  ;;  %v1680_v9 = vpop.f32.mrf.mxu0 }
 0x217   : > { %4226 = vtanh.f32 %v1620_v31  ;;  %v1709_v37 = vpop.f32.mrf.mxu1  ;;  %v1681_v47 = vadd.f32 %v1680_v9, %v5163_v54 }
 0x218   : > { %4228 = vtanh.f32 %v1649_v32  ;;  %v5198_v40 = vpop.f32.mrf.mxu2  ;;  %v1710_v63 = vadd.f32 %v1709_v37, %v5163_v54 }
 0x219   : > { %v4219_v41 = vpop.eup %4218  ;;  %4230 = vtanh.f32 %v1617_v35  ;;  %v5201_v42 = vpop.f32.mrf.mxu3  ;;  %v1733_v0 = vadd.f32 %v5198_v40, %v5173_v3 }
 0x21a   : > { %v4221_v26 = vpop.eup %4220  ;;  %4232 = vtanh.f32 %v1646_v36  ;;  %2129 = vmatpush.msra.mxu2 %v4219_v41  ;;  %v1762_v22 = vadd.f32 %v5201_v42, %v5173_v3 }
 0x21b   : > { %v4223_v33 = vpop.eup %4222  ;;  %2149 = vmatpush.msra.mxu3 %v4221_v26 }
 0x21c   : > { %v4225_v34 = vpop.eup %4224  ;;  %2130 = vmatpush.msra.mxu2 %v4223_v33 }
 0x21d   : > { %v4227_v43 = vpop.eup %4226  ;;  %2150 = vmatpush.msra.mxu3 %v4225_v34 }
 0x21e   : > { %v4229_v45 = vpop.eup %4228  ;;  %v1683_v44 = vpop.f32.mrf.mxu0  ;;  %2131 = vmatpush.msra.mxu2 %v4227_v43 }
 0x21f   : > { %v4231_v46 = vpop.eup %4230  ;;  %v1684_v48 = vadd.f32 %v1683_v44, %v5157_v51  ;;  %v1712_v49 = vpop.f32.mrf.mxu1  ;;  %2151 = vmatpush.msra.mxu3 %v4229_v45 }
 0x220   : > { %v4233_v50 = vpop.eup %4232  ;;  %v1713_v52 = vadd.f32 %v1712_v49, %v5157_v51  ;;  %v1735_v16 = vpop.f32.mrf.mxu2  ;;  %2132 = vmatpush.msra.mxu2 %v4231_v46 }
 0x221   : > { %4234 = vtanh.f32 %v1684_v48  ;;  %v1764_v55 = vpop.f32.mrf.mxu3  ;;  %2152 = vmatpush.msra.mxu3 %v4233_v50  ;;  %3975 = vmatmul.msk.f32.vlgmr.msra.gmra.mxu2 %vm1528_vm2, %v5184_v19  ;;  %v1736_v20 = vadd.f32 %v1735_v16, %v5167_v59 }
 0x222   : > { %4236 = vtanh.f32 %v1713_v52  ;;  %3976 = vmatmul.msk.f32.vlgmr.msra.gmra.mxu3 %vm1528_vm2, %v5184_v19  ;;  %v1765_v21 = vadd.f32 %v1764_v55, %v5167_v59 }
 0x223   : > { %4238 = vtanh.f32 %v1681_v47 }
 0x224   : > { %4240 = vtanh.f32 %v1710_v63 }
 0x225   : > { %4242 = vtanh.f32 %v1678_v53 }
 0x226   : > { %4244 = vtanh.f32 %v1707_v56 }
 0x227   : > { %v4235_v58 = vpop.eup %4234  ;;  %4246 = vtanh.f32 %v1675_v57 }
 0x228   : > { %v4237_v60 = vpop.eup %4236  ;;  %4248 = vtanh.f32 %v1704_v25  ;;  %v5217_v61 = vpop.f32.mrf.mxu0  ;;  %2169 = vmatpush.msrb.mxu0 %v4235_v58 }
 0x229   : > { %v1738_v62 = vpop.f32.mrf.mxu2  ;;  %v4239_v38 = vpop.eup %4238  ;;  %2189 = vmatpush.msrb.mxu1 %v4237_v60  ;;  %v1791_v46 = vadd.f32 %v5217_v61, %v5173_v3 }
 0x22a   : > { %v5219_v1 = vpop.f32.mrf.mxu1  ;;  %v1767_v2 = vpop.f32.mrf.mxu3  ;;  %2170 = vmatpush.msrb.mxu0 %v4239_v38  ;;  %v1739_v6 = vadd.f32 %v1738_v62, %v5163_v54 }
 0x22b   : > { %v4241_v5 = vpop.eup %4240  ;;  %v1768_v4 = vadd.f32 %v1767_v2, %v5163_v54  ;;  %v1820_v47 = vadd.f32 %v5219_v1, %v5173_v3 }
 0x22c   : > { %v4243_v7 = vpop.eup %4242  ;;  %2190 = vmatpush.msrb.mxu1 %v4241_v5 }
 0x22d   : > { %v4245_v8 = vpop.eup %4244  ;;  %2171 = vmatpush.msrb.mxu0 %v4243_v7 }
 0x22e   : > { %v4247_v10 = vpop.eup %4246  ;;  %2191 = vmatpush.msrb.mxu1 %v4245_v8 }
 0x22f   : > { %v4249_v11 = vpop.eup %4248  ;;  %2172 = vmatpush.msrb.mxu0 %v4247_v10 }
 0x230   : > { %2192 = vmatpush.msrb.mxu1 %v4249_v11  ;;  %3977 = vmatmul.msk.f32.vlgmr.msrb.gmra.mxu0 %vm1528_vm2, %v5184_v19  ;;  %v1793_v12 = vpop.f32.mrf.mxu0 }
 0x231   : > { %3978 = vmatmul.msk.f32.vlgmr.msrb.gmra.mxu1 %vm1528_vm2, %v5184_v19  ;;  %v1741_v13 = vpop.f32.mrf.mxu2  ;;  %v1794_v43 = vadd.f32 %v1793_v12, %v5167_v59 }
 0x232   : > { %v1822_v14 = vpop.f32.mrf.mxu1  ;;  %v1742_v15 = vadd.f32 %v1741_v13, %v5157_v51  ;;  %v1770_v17 = vpop.f32.mrf.mxu3 }
 0x233   : > { %v1771_v18 = vadd.f32 %v1770_v17, %v5157_v51  ;;  %v1823_v44 = vadd.f32 %v1822_v14, %v5167_v59 }
 0x234   : > { %4250 = vtanh.f32 %v1742_v15 }
 0x235   : > { %4252 = vtanh.f32 %v1771_v18 }
 0x236   : > { %4254 = vtanh.f32 %v1739_v6 }
 0x237   : > { %4256 = vtanh.f32 %v1768_v4 }
 0x238   : > { %v1796_v23 = vpop.f32.mrf.mxu0  ;;  %4258 = vtanh.f32 %v1736_v20 }
 0x239   : > { %4260 = vtanh.f32 %v1765_v21  ;;  %v1797_v39 = vadd.f32 %v1796_v23, %v5163_v54 }
 0x23a   : > { %v1825_v24 = vpop.f32.mrf.mxu1  ;;  %v5235_v27 = vpop.f32.mrf.mxu2  ;;  %4262 = vtanh.f32 %v1733_v0 }
 0x23b   : > { %v4251_v28 = vpop.eup %4250  ;;  %v5237_v29 = vpop.f32.mrf.mxu3  ;;  %4264 = vtanh.f32 %v1762_v22  ;;  %v1826_v26 = vadd.f32 %v1825_v24, %v5163_v54  ;;  %v1849_v11 = vadd.f32 %v5235_v27, %v5173_v3 }
 0x23c   : > { %v4253_v30 = vpop.eup %4252  ;;  %2209 = vmatpush.msrb.mxu2 %v4251_v28  ;;  %v1878_v12 = vadd.f32 %v5237_v29, %v5173_v3 }
 0x23d   : > { %v4255_v31 = vpop.eup %4254  ;;  %2229 = vmatpush.msrb.mxu3 %v4253_v30 }
 0x23e   : > { %v4257_v32 = vpop.eup %4256  ;;  %2210 = vmatpush.msrb.mxu2 %v4255_v31 }
 0x23f   : > { %v4259_v35 = vpop.eup %4258  ;;  %2230 = vmatpush.msrb.mxu3 %v4257_v32 }
 0x240   : > { %v4261_v36 = vpop.eup %4260  ;;  %v1799_v9 = vpop.f32.mrf.mxu0  ;;  %2211 = vmatpush.msrb.mxu2 %v4259_v35 }
 0x241   : > { %v4263_v37 = vpop.eup %4262  ;;  %v1800_v40 = vadd.f32 %v1799_v9, %v5157_v51  ;;  %2231 = vmatpush.msrb.mxu3 %v4261_v36 }
 0x242   : > { %v1828_v41 = vpop.f32.mrf.mxu1  ;;  %v4265_v42 = vpop.eup %4264  ;;  %2212 = vmatpush.msrb.mxu2 %v4263_v37 }
 0x243   : > { %v1829_v33 = vadd.f32 %v1828_v41, %v5157_v51  ;;  %v1851_v34 = vpop.f32.mrf.mxu2  ;;  %4266 = vtanh.f32 %v1800_v40  ;;  %v1880_v45 = vpop.f32.mrf.mxu3  ;;  %2232 = vmatpush.msrb.mxu3 %v4265_v42  ;;  %3979 = vmatmul.msk.f32.vlgmr.msrb.gmra.mxu2 %vm1528_vm2, %v5184_v19 }
 0x244   : > { %3980 = vmatmul.msk.f32.vlgmr.msrb.gmra.mxu3 %vm1528_vm2, %v5184_v19  ;;  %v1852_v8 = vadd.f32 %v1851_v34, %v5167_v59  ;;  %v1881_v10 = vadd.f32 %v1880_v45, %v5167_v59 }
 0x245   : > { %4268 = vtanh.f32 %v1829_v33 }
 0x246   : > { %4270 = vtanh.f32 %v1797_v39 }
 0x247   : > { %4272 = vtanh.f32 %v1826_v26 }
 0x248   : > { %4274 = vtanh.f32 %v1794_v43 }
 0x249   : > { %4276 = vtanh.f32 %v1823_v44  ;;  %v4267_v48 = vpop.eup %4266 }
 0x24a   : > { %4278 = vtanh.f32 %v1791_v46  ;;  %v5253_v50 = vpop.f32.mrf.mxu0  ;;  %2249 = vmatpush.msra.mxu0 %v4267_v48  ;;  %v2556_v46 = vld [vmem:[#allocation5 + $0x78] sm:$0xff] }
 0x24b   : > { %v4269_v49 = vpop.eup %4268  ;;  %4280 = vtanh.f32 %v1820_v47  ;;  %v1854_v63 = vpop.f32.mrf.mxu2  ;;  %v1907_v37 = vadd.f32 %v5253_v50, %v5173_v3  ;;  %v2572_v48 = vld [vmem:[#allocation5 + $0xf8] sm:$0xff] }
 0x24c   : > { %v4271_v52 = vpop.eup %4270  ;;  %v5255_v16 = vpop.f32.mrf.mxu1  ;;  %2269 = vmatpush.msra.mxu1 %v4269_v49  ;;  %v1855_v5 = vadd.f32 %v1854_v63, %v5163_v54  ;;  %v2555_v49 = vld [vmem:[#allocation5 + $0x70] sm:$0xff] }
 0x24d   : > { %v1883_v53 = vpop.f32.mrf.mxu3  ;;  %v4273_v55 = vpop.eup %4272  ;;  %2250 = vmatpush.msra.mxu0 %v4271_v52  ;;  %v1936_v39 = vadd.f32 %v5255_v16, %v5173_v3  ;;  %v2571_v63 = vld [vmem:[#allocation5 + $0xf0] sm:$0xff] }
 0x24e   : > { %v4275_v56 = vpop.eup %4274  ;;  %2270 = vmatpush.msra.mxu1 %v4273_v55  ;;  %v1884_v7 = vadd.f32 %v1883_v53, %v5163_v54  ;;  %v2554_v55 = vld [vmem:[#allocation5 + $0x68] sm:$0xff] }
 0x24f   : > { %v4277_v57 = vpop.eup %4276  ;;  %2251 = vmatpush.msra.mxu0 %v4275_v56 }
 0x250   : > { %v4279_v25 = vpop.eup %4278  ;;  %2271 = vmatpush.msra.mxu1 %v4277_v57 }
 0x251   : > { %v4281_v58 = vpop.eup %4280  ;;  %2252 = vmatpush.msra.mxu0 %v4279_v25  ;;  %v2570_v25 = vld [vmem:[#allocation5 + $0xe8] sm:$0xff] }
 0x252   : > { %2272 = vmatpush.msra.mxu1 %v4281_v58  ;;  %3981 = vmatmul.msk.f32.vlgmr.msra.gmra.mxu0 %vm1528_vm2, %v5184_v19  ;;  %v1909_v60 = vpop.f32.mrf.mxu0 }
 0x253   : > { %3982 = vmatmul.msk.f32.vlgmr.msra.gmra.mxu1 %vm1528_vm2, %v5184_v19  ;;  %v1857_v61 = vpop.f32.mrf.mxu2  ;;  %v1910_v35 = vadd.f32 %v1909_v60, %v5167_v59  ;;  %v2553_v60 = vld [vmem:[#allocation5 + $0x60] sm:$0xff] }
 0x254   : > { %v1938_v62 = vpop.f32.mrf.mxu1  ;;  %v1858_v38 = vadd.f32 %v1857_v61, %v5157_v51 }
 0x255   : > { %v1886_v1 = vpop.f32.mrf.mxu3  ;;  %v1939_v9 = vadd.f32 %v1938_v62, %v5167_v59  ;;  %v2569_v62 = vld [vmem:[#allocation5 + $0xe0] sm:$0xff] }
 0x256   : > { %v1887_v2 = vadd.f32 %v1886_v1, %v5157_v51  ;;  %4282 = vtanh.f32 %v1858_v38  ;;  %v2568_v1 = vld [vmem:[#allocation5 + $0xd8] sm:$0xff] }
 0x258   : > { %4284 = vtanh.f32 %v1887_v2  ;;  %v2551_v2 = vld [vmem:[#allocation5 + $0x50] sm:$0xff] }
 0x259   : > { %4286 = vtanh.f32 %v1855_v5 }
 0x25a   : > { %4288 = vtanh.f32 %v1884_v7  ;;  %v1912_v13 = vpop.f32.mrf.mxu0  ;;  %v2550_v7 = vld [vmem:[#allocation5 + $0x48] sm:$0xff] }
 0x25b   : > { %4290 = vtanh.f32 %v1852_v8  ;;  %v1913_v24 = vadd.f32 %v1912_v13, %v5163_v54  ;;  %v2565_v13 = vld [vmem:[#allocation5 + $0xc0] sm:$0xff] }
 0x25c   : > { %v1941_v14 = vpop.f32.mrf.mxu1  ;;  %4292 = vtanh.f32 %v1881_v10  ;;  %v5271_v15 = vpop.f32.mrf.mxu2  ;;  %v2566_v10 = vld [vmem:[#allocation5 + $0xc8] sm:$0xff] }
 0x25d   : > { %v4283_v17 = vpop.eup %4282  ;;  %4294 = vtanh.f32 %v1849_v11  ;;  %v5273_v18 = vpop.f32.mrf.mxu3  ;;  %v1942_v30 = vadd.f32 %v1941_v14, %v5163_v54  ;;  %v1965_v38 = vadd.f32 %v5271_v15, %v5173_v3  ;;  %v2548_v15 = vld [vmem:[#allocation5 + $0x38] sm:$0xff] }
 0x25e   : > { %v4285_v6 = vpop.eup %4284  ;;  %4296 = vtanh.f32 %v1878_v12  ;;  %2289 = vmatpush.msra.mxu2 %v4283_v17 }
 0x25f   : > { %v4287_v4 = vpop.eup %4286  ;;  %2309 = vmatpush.msra.mxu3 %v4285_v6 }
 0x260   : > { %v4289_v20 = vpop.eup %4288  ;;  %2290 = vmatpush.msra.mxu2 %v4287_v4 }
 0x261   : > { %v4291_v21 = vpop.eup %4290  ;;  %2310 = vmatpush.msra.mxu3 %v4289_v20  ;;  %v2547_v20 = vld [vmem:[#allocation5 + $0x30] sm:$0xff] }
 0x262   : > { %v4293_v0 = vpop.eup %4292  ;;  %v1915_v22 = vpop.f32.mrf.mxu0  ;;  %2291 = vmatpush.msra.mxu2 %v4291_v21  ;;  %v2563_v21 = vld [vmem:[#allocation5 + $0xb0] sm:$0xff] }
 0x263   : > { %v4295_v23 = vpop.eup %4294  ;;  %v1916_v27 = vadd.f32 %v1915_v22, %v5157_v51  ;;  %2311 = vmatpush.msra.mxu3 %v4293_v0  ;;  %v2072_v0 = vpop.permute.xlu2 %2071  ;;  %v2588_v22 = vld [vmem:[#allocation5 + $0x178] sm:$0xff] }
 0x264   : > { %v1944_v28 = vpop.f32.mrf.mxu1  ;;  %v4297_v29 = vpop.eup %4296  ;;  %2292 = vmatpush.msra.mxu2 %v4295_v23  ;;  %v2604_v23 = vld [vmem:[#allocation5 + $0x1f8] sm:$0xff] }
 0x265   : > { %v1945_v31 = vadd.f32 %v1944_v28, %v5157_v51  ;;  %v1967_v32 = vpop.f32.mrf.mxu2  ;;  %4298 = vtanh.f32 %v1916_v27  ;;  %v1996_v36 = vpop.f32.mrf.mxu3  ;;  %2312 = vmatpush.msra.mxu3 %v4297_v29  ;;  %3983 = vmatmul.msk.f32.vlgmr.msra.gmra.mxu2 %vm1528_vm2, %v5184_v19  ;;  %v2562_v27 = vld [vmem:[#allocation5 + $0xa8] sm:$0xff]  ;;  %v2587_v28 = vld [vmem:[#allocation5 + $0x170] sm:$0xff] }
 0x266   : > { %3984 = vmatmul.msk.f32.vlgmr.msra.gmra.mxu3 %vm1528_vm2, %v5184_v19  ;;  %v1968_v58 = vadd.f32 %v1967_v32, %v5167_v59  ;;  %v1997_v61 = vadd.f32 %v1996_v36, %v5167_v59  ;;  %v2567_v59 = vld [vmem:[#allocation5 + $0xd0] sm:$0xff]  ;;  %v2561_v32 = vld [vmem:[#allocation5 + $0xa0] sm:$0xff]  ;;  %v2602_v36 = vld [vmem:[#allocation5 + $0x1e8] sm:$0xff] }
 0x267   : > { %4300 = vtanh.f32 %v1945_v31  ;;  %v2603_v29 = vld [vmem:[#allocation5 + $0x1f0] sm:$0xff]  ;;  %v2545_v31 = vld [vmem:[#allocation5 + $0x20] sm:$0xff] }
 0x268   : > { %4302 = vtanh.f32 %v1913_v24  ;;  %v2546_v24 = vld [vmem:[#allocation5 + $0x28] sm:$0xff] }
 0x269   : > { %4304 = vtanh.f32 %v1942_v30  ;;  %v5307_v30 = vrot.slane %v2072_v0, 1  ;;  %v2614_v0 = vld [vmem:[#allocation5 + $0x248] sm:$0xff] }
 0x26a   : > { %4306 = vtanh.f32 %v1910_v35  ;;  %v2586_v35 = vld [vmem:[#allocation5 + $0x168] sm:$0xff] }
 0x26b   : > { %4308 = vtanh.f32 %v1939_v9  ;;  %v4299_v40 = vpop.eup %4298  ;;  %v2544_v9 = vld [vmem:[#allocation5 + $0x18] sm:$0xff] }
 0x26c   : > { %4310 = vtanh.f32 %v1907_v37  ;;  %2329 = vmatpush.msrb.mxu0 %v4299_v40  ;;  %v2560_v37 = vld [vmem:[#allocation5 + $0x98] sm:$0xff]  ;;  %v2601_v40 = vld [vmem:[#allocation5 + $0x1e0] sm:$0xff] }
 0x26d   : > { %v4301_v41 = vpop.eup %4300  ;;  %4312 = vtanh.f32 %v1936_v39  ;;  %v1970_v42 = vpop.f32.mrf.mxu2  ;;  %v2585_v39 = vld [vmem:[#allocation5 + $0x160] sm:$0xff] }
 0x26e   : > { %v4303_v26 = vpop.eup %4302  ;;  %v1999_v33 = vpop.f32.mrf.mxu3  ;;  %2349 = vmatpush.msrb.mxu1 %v4301_v41  ;;  %v1971_v52 = vadd.f32 %v1970_v42, %v5163_v54 }
 0x26f   : > { %v4305_v34 = vpop.eup %4304  ;;  %2330 = vmatpush.msrb.mxu0 %v4303_v26  ;;  %v2000_v56 = vadd.f32 %v1999_v33, %v5163_v54  ;;  %v2552_v54 = vld [vmem:[#allocation5 + $0x58] sm:$0xff]  ;;  %v2543_v26 = vld [vmem:[#allocation5 + $0x10] sm:$0xff] }
 0x270   : > { %v4307_v43 = vpop.eup %4306  ;;  %2350 = vmatpush.msrb.mxu1 %v4305_v34  ;;  %v2559_v33 = vld [vmem:[#allocation5 + $0x90] sm:$0xff] }
 0x271   : > { %v4309_v45 = vpop.eup %4308  ;;  %2331 = vmatpush.msrb.mxu0 %v4307_v43  ;;  %v2584_v43 = vld [vmem:[#allocation5 + $0x158] sm:$0xff] }
 0x272   : > { %v4311_v44 = vpop.eup %4310  ;;  %2351 = vmatpush.msrb.mxu1 %v4309_v45  ;;  %v2600_v45 = vld [vmem:[#allocation5 + $0x1d8] sm:$0xff] }
 0x273   : > { %v4313_v47 = vpop.eup %4312  ;;  %2332 = vmatpush.msrb.mxu0 %v4311_v44 }
 0x274   : > { %2352 = vmatpush.msrb.mxu1 %v4313_v47  ;;  %3985 = vmatmul.msk.f32.vlgmr.msrb.gmra.mxu0 %vm1528_vm2, %v5184_v19  ;;  %v2558_v47 = vld [vmem:[#allocation5 + $0x88] sm:$0xff] }
 0x275   : > { %3986 = vmatmul.msk.f32.vlgmr.msrb.gmra.mxu1 %vm1528_vm2, %v5184_v19  ;;  %2797 = vmatpush.msra.mxu0 %v2556_v46  ;;  %v1973_v50 = vpop.f32.mrf.mxu2  ;;  %v2542_v46 = vld [vmem:[#allocation5 + $0x8] sm:$0xff] }
 0x276   : > { %2817 = vmatpush.msra.mxu1 %v2572_v48  ;;  %v1974_v16 = vadd.f32 %v1973_v50, %v5157_v51  ;;  %v2002_v53 = vpop.f32.mrf.mxu3  ;;  %v2583_v50 = vld [vmem:[#allocation5 + $0x150] sm:$0xff] }
 0x277   : > { %v2003_v57 = vadd.f32 %v2002_v53, %v5157_v51  ;;  %2798 = vmatpush.msra.mxu0 %v2555_v49  ;;  %v1994_v51 = vadd.f32 %v5273_v18, %v5173_v3  ;;  %v2549_v3 = vld [vmem:[#allocation5 + $0x40] sm:$0xff]  ;;  %v2564_v18 = vld [vmem:[#allocation5 + $0xb8] sm:$0xff] }
 0x278   : > { %4314 = vtanh.f32 %v1974_v16  ;;  %2818 = vmatpush.msra.mxu1 %v2571_v63  ;;  %v2599_v63 = vld [vmem:[#allocation5 + $0x1d0] sm:$0xff]  ;;  %v2557_v16 = vld [vmem:[#allocation5 + $0x80] sm:$0xff] }
 0x279   : > { %4316 = vtanh.f32 %v2003_v57  ;;  %2799 = vmatpush.msra.mxu0 %v2554_v55  ;;  %v2620_v55 = vld [vmem:[#allocation5 + $0x278] sm:$0xff] }
 0x27a   : > { %4318 = vtanh.f32 %v1971_v52  ;;  %2819 = vmatpush.msra.mxu1 %v2570_v25  ;;  %v2541_v52 = vld [vmem:[#allocation5] sm:$0xff] }
 0x27b   : > { %4320 = vtanh.f32 %v2000_v56  ;;  %2800 = vmatpush.msra.mxu0 %v2553_v60  ;;  %v2636_v56 = vld [vmem:[#allocation5 + $0x2f8] sm:$0xff]  ;;  %v2598_v60 = vld [vmem:[#allocation5 + $0x1c8] sm:$0xff] }
 0x27c   : > { %4322 = vtanh.f32 %v1968_v58  ;;  %2820 = vmatpush.msra.mxu1 %v2569_v62  ;;  %v2582_v58 = vld [vmem:[#allocation5 + $0x148] sm:$0xff]  ;;  %v2635_v62 = vld [vmem:[#allocation5 + $0x2f0] sm:$0xff] }
 0x27d   : > { %4324 = vtanh.f32 %v1997_v61  ;;  %2801 = vmatpush.msra.mxu0 %v2552_v54  ;;  %v2619_v61 = vld [vmem:[#allocation5 + $0x270] sm:$0xff]  ;;  %v2597_v54 = vld [vmem:[#allocation5 + $0x1c0] sm:$0xff] }
 0x27e   : > { %v4315_v5 = vpop.eup %4314  ;;  %4326 = vtanh.f32 %v1965_v38  ;;  %2821 = vmatpush.msra.mxu1 %v2568_v1  ;;  %v2581_v38 = vld [vmem:[#allocation5 + $0x140] sm:$0xff]  ;;  %v2634_v1 = vld [vmem:[#allocation5 + $0x2e8] sm:$0xff] }
 0x27f   : > { %v4317_v8 = vpop.eup %4316  ;;  %4328 = vtanh.f32 %v1994_v51  ;;  %2802 = vmatpush.msra.mxu0 %v2551_v2  ;;  %2369 = vmatpush.msrb.mxu2 %v4315_v5  ;;  %v2618_v51 = vld [vmem:[#allocation5 + $0x268] sm:$0xff]  ;;  %v2580_v2 = vld [vmem:[#allocation5 + $0x138] sm:$0xff]  ;;  %v2617_v5 = vld [vmem:[#allocation5 + $0x260] sm:$0xff] }
 0x280   : > { %v4319_v11 = vpop.eup %4318  ;;  %2822 = vmatpush.msra.mxu1 %v2567_v59  ;;  %2389 = vmatpush.msrb.mxu3 %v4317_v8  ;;  %v2596_v59 = vld [vmem:[#allocation5 + $0x1b8] sm:$0xff]  ;;  %v2579_v8 = vld [vmem:[#allocation5 + $0x130] sm:$0xff] }
 0x281   : > { %v4321_v12 = vpop.eup %4320  ;;  %2803 = vmatpush.msra.mxu0 %v2550_v7  ;;  %2370 = vmatpush.msrb.mxu2 %v4319_v11  ;;  %v2633_v7 = vld [vmem:[#allocation5 + $0x2e0] sm:$0xff] }
 0x282   : > { %v4323_v14 = vpop.eup %4322  ;;  %2823 = vmatpush.msra.mxu1 %v2566_v10  ;;  %2390 = vmatpush.msrb.mxu3 %v4321_v12  ;;  %v2595_v10 = vld [vmem:[#allocation5 + $0x1b0] sm:$0xff]  ;;  %v2632_v12 = vld [vmem:[#allocation5 + $0x2d8] sm:$0xff] }
 0x283   : > { %v4325_v17 = vpop.eup %4324  ;;  %2804 = vmatpush.msra.mxu0 %v2549_v3  ;;  %2371 = vmatpush.msrb.mxu2 %v4323_v14  ;;  %v2616_v3 = vld [vmem:[#allocation5 + $0x258] sm:$0xff]  ;;  %v2578_v14 = vld [vmem:[#allocation5 + $0x128] sm:$0xff] }
 0x284   : > { %v4327_v6 = vpop.eup %4326  ;;  %2824 = vmatpush.msra.mxu1 %v2565_v13  ;;  %2391 = vmatpush.msrb.mxu3 %v4325_v17 }
 0x285   : > { %v4329_v4 = vpop.eup %4328  ;;  %2805 = vmatpush.msra.mxu0 %v2548_v15  ;;  %2372 = vmatpush.msrb.mxu2 %v4327_v6  ;;  %v2594_v15 = vld [vmem:[#allocation5 + $0x1a8] sm:$0xff]  ;;  %v2631_v6 = vld [vmem:[#allocation5 + $0x2d0] sm:$0xff] }
 0x286   : > { %2825 = vmatpush.msra.mxu1 %v2564_v18  ;;  %2392 = vmatpush.msrb.mxu3 %v4329_v4  ;;  %v2615_v18 = vld [vmem:[#allocation5 + $0x250] sm:$0xff] }
 0x287   : > { %3987 = vmatmul.msk.f32.vlgmr.msrb.gmra.mxu2 %vm1528_vm2, %v5184_v19  ;;  %3988 = vmatmul.msk.f32.vlgmr.msrb.gmra.mxu3 %vm1528_vm2, %v5184_v19 }
 0x288   : > { %2806 = vmatpush.msra.mxu0 %v2547_v20  ;;  %2826 = vmatpush.msra.mxu1 %v2563_v21  ;;  %v2577_v20 = vld [vmem:[#allocation5 + $0x120] sm:$0xff] }
 0x289   : > { %2837 = vmatpush.msra.mxu2 %v2588_v22  ;;  %2857 = vmatpush.msra.mxu3 %v2604_v23  ;;  %v2593_v21 = vld [vmem:[#allocation5 + $0x1a0] sm:$0xff]  ;;  %v2630_v22 = vld [vmem:[#allocation5 + $0x2c8] sm:$0xff]  ;;  %v2576_v23 = vld [vmem:[#allocation5 + $0x118] sm:$0xff] }
 0x28a   : > { %2807 = vmatpush.msra.mxu0 %v2546_v24  ;;  %2827 = vmatpush.msra.mxu1 %v2562_v27  ;;  %v2094_v19 = vpop.f32.mrf.mxu0  ;;  %v2592_v24 = vld [vmem:[#allocation5 + $0x198] sm:$0xff]  ;;  %v2613_v27 = vld [vmem:[#allocation5 + $0x240] sm:$0xff] }
 0x28b   : > { %2838 = vmatpush.msra.mxu2 %v2587_v28  ;;  %2858 = vmatpush.msra.mxu3 %v2603_v29  ;;  %v5310_v41 = vadd.f32 %v2094_v19, %v5307_v30  ;;  %v2114_v42 = vpop.f32.mrf.mxu1  ;;  %v2629_v28 = vld [vmem:[#allocation5 + $0x2c0] sm:$0xff]  ;;  %v2575_v29 = vld [vmem:[#allocation5 + $0x110] sm:$0xff] }
 0x28c   : > { %2808 = vmatpush.msra.mxu0 %v2545_v31  ;;  %2828 = vmatpush.msra.mxu1 %v2561_v32  ;;  %v5313_v34 = vadd.f32 %v2114_v42, %v5307_v30  ;;  %v2591_v31 = vld [vmem:[#allocation5 + $0x190] sm:$0xff]  ;;  %v2612_v32 = vld [vmem:[#allocation5 + $0x238] sm:$0xff]  ;;  %v2589_v42 = vld [vmem:[#allocation5 + $0x180] sm:$0xff] }
 0x28d   : > { %2839 = vmatpush.msra.mxu2 %v2586_v35  ;;  %2859 = vmatpush.msra.mxu3 %v2602_v36  ;;  %v2413_v44 = vand.u32 2147483647, %v5310_v41  ;;  %v2628_v35 = vld [vmem:[#allocation5 + $0x2b8] sm:$0xff]  ;;  %v2574_v36 = vld [vmem:[#allocation5 + $0x108] sm:$0xff]  ;;  %v2627_v19 = vld [vmem:[#allocation5 + $0x2b0] sm:$0xff] }
 0x28e   : > { %2809 = vmatpush.msra.mxu0 %v2544_v9  ;;  %2829 = vmatpush.msra.mxu1 %v2560_v37  ;;  %v2414_v48 = vand.u32 2147483647, %v5313_v34  ;;  %v2590_v9 = vld [vmem:[#allocation5 + $0x188] sm:$0xff]  ;;  %v2611_v37 = vld [vmem:[#allocation5 + $0x230] sm:$0xff] }
 0x28f   : > { %2840 = vmatpush.msra.mxu2 %v2585_v39  ;;  %2860 = vmatpush.msra.mxu3 %v2601_v40  ;;  %v2429_v49 = vsub.f32 0.0, %v2413_v44  ;;  %v2573_v40 = vld [vmem:[#allocation5 + $0x100] sm:$0xff] }
 0x290   : > { %2810 = vmatpush.msra.mxu0 %v2543_v26  ;;  %2830 = vmatpush.msra.mxu1 %v2559_v33  ;;  %v2430_v53 = vsub.f32 0.0, %v2414_v48  ;;  %v2610_v33 = vld [vmem:[#allocation5 + $0x228] sm:$0xff]  ;;  %v2652_v48 = vld [vmem:[#allocation5 + $0x378] sm:$0xff] }
 0x291   : > { %2841 = vmatpush.msra.mxu2 %v2584_v43  ;;  %2861 = vmatpush.msra.mxu3 %v2600_v45  ;;  %v2445_v57 = vmul.f32 1.442695, %v2429_v49  ;;  %v2626_v43 = vld [vmem:[#allocation5 + $0x2a8] sm:$0xff]  ;;  %v2668_v49 = vld [vmem:[#allocation5 + $0x3f8] sm:$0xff] }
 0x292   : > { %2811 = vmatpush.msra.mxu0 %v2542_v46  ;;  %2831 = vmatpush.msra.mxu1 %v2558_v47  ;;  %v2447_v25 = vmul.f32 1.442695, %v2430_v53  ;;  %v2397_v53 = vmax.f32 %v5310_v41, 0.0 }
 0x293   : > { %2842 = vmatpush.msra.mxu2 %v2583_v50  ;;  %2862 = vmatpush.msra.mxu3 %v2599_v63  ;;  %4330 = vpow2.f32 %v2445_v57  ;;  %v2609_v63 = vld [vmem:[#allocation5 + $0x220] sm:$0xff]  ;;  %v2651_v57 = vld [vmem:[#allocation5 + $0x370] sm:$0xff] }
 0x294   : > { %2812 = vmatpush.msra.mxu0 %v2541_v52  ;;  %2832 = vmatpush.msra.mxu1 %v2557_v16  ;;  %4332 = vpow2.f32 %v2447_v25  ;;  %v2625_v52 = vld [vmem:[#allocation5 + $0x2a0] sm:$0xff]  ;;  %v2608_v16 = vld [vmem:[#allocation5 + $0x218] sm:$0xff]  ;;  %v2667_v25 = vld [vmem:[#allocation5 + $0x3f0] sm:$0xff] }
 0x295   : > { %2843 = vmatpush.msra.mxu2 %v2582_v58  ;;  %2863 = vmatpush.msra.mxu3 %v2598_v60  ;;  %v2398_v60 = vmax.f32 %v5313_v34, 0.0 }
 0x296   : > { %2877 = vmatpush.msrb.mxu0 %v2620_v55  ;;  %2897 = vmatpush.msrb.mxu1 %v2636_v56  ;;  %v2624_v56 = vld [vmem:[#allocation5 + $0x298] sm:$0xff] }
 0x297   : > { %2844 = vmatpush.msra.mxu2 %v2581_v38  ;;  %2864 = vmatpush.msra.mxu3 %v2597_v54  ;;  %v2650_v54 = vld [vmem:[#allocation5 + $0x368] sm:$0xff] }
 0x298   : > { %2878 = vmatpush.msrb.mxu0 %v2619_v61  ;;  %2898 = vmatpush.msrb.mxu1 %v2635_v62 }
 0x299   : > { %v4331_v11 = vpop.eup %4330  ;;  %2845 = vmatpush.msra.mxu2 %v2580_v2  ;;  %2865 = vmatpush.msra.mxu3 %v2596_v59  ;;  %v2607_v2 = vld [vmem:[#allocation5 + $0x210] sm:$0xff] }
 0x29a   : > { %2879 = vmatpush.msrb.mxu0 %v2618_v51  ;;  %2899 = vmatpush.msrb.mxu1 %v2634_v1  ;;  %v4333_v13 = vpop.eup %4332  ;;  %v2477_v17 = vadd.f32 1.0, %v4331_v11  ;;  %v2666_v51 = vld [vmem:[#allocation5 + $0x3e8] sm:$0xff]  ;;  %v2623_v59 = vld [vmem:[#allocation5 + $0x290] sm:$0xff] }
 0x29b   : > { %2846 = vmatpush.msra.mxu2 %v2579_v8  ;;  %2866 = vmatpush.msra.mxu3 %v2595_v10  ;;  %v2478_v4 = vadd.f32 1.0, %v4333_v13  ;;  %v2665_v8 = vld [vmem:[#allocation5 + $0x3e0] sm:$0xff]  ;;  %v2622_v13 = vld [vmem:[#allocation5 + $0x288] sm:$0xff] }
 0x29c   : > { %2880 = vmatpush.msrb.mxu0 %v2617_v5  ;;  %2900 = vmatpush.msrb.mxu1 %v2633_v7  ;;  %4334 = vlog2.f32 %v2477_v17  ;;  %v2649_v7 = vld [vmem:[#allocation5 + $0x360] sm:$0xff] }
 0x29d   : > { %2847 = vmatpush.msra.mxu2 %v2578_v14  ;;  %2867 = vmatpush.msra.mxu3 %v2594_v15  ;;  %4336 = vlog2.f32 %v2478_v4  ;;  %v2621_v4 = vld [vmem:[#allocation5 + $0x280] sm:$0xff] }
 0x29e   : > { %2881 = vmatpush.msrb.mxu0 %v2616_v3  ;;  %2901 = vmatpush.msrb.mxu1 %v2632_v12  ;;  %v2606_v12 = vld [vmem:[#allocation5 + $0x208] sm:$0xff] }
 0x29f   : > { %2848 = vmatpush.msra.mxu2 %v2577_v20  ;;  %2868 = vmatpush.msra.mxu3 %v2593_v21  ;;  %v2648_v21 = vld [vmem:[#allocation5 + $0x358] sm:$0xff] }
 0x2a0   : > { %2882 = vmatpush.msrb.mxu0 %v2615_v18  ;;  %2902 = vmatpush.msrb.mxu1 %v2631_v6  ;;  %v2605_v6 = vld [vmem:[#allocation5 + $0x200] sm:$0xff] }
 0x2a1   : > { %2849 = vmatpush.msra.mxu2 %v2576_v23  ;;  %2869 = vmatpush.msra.mxu3 %v2592_v24  ;;  %v2684_v23 = vld [vmem:[#allocation5 + $0x478] sm:$0xff] }
 0x2a2   : > { %2883 = vmatpush.msrb.mxu0 %v2614_v0  ;;  %2903 = vmatpush.msrb.mxu1 %v2630_v22  ;;  %v4335_v26 = vpop.eup %4334  ;;  %v2664_v0 = vld [vmem:[#allocation5 + $0x3d8] sm:$0xff] }
 0x2a3   : > { %2850 = vmatpush.msra.mxu2 %v2575_v29  ;;  %2870 = vmatpush.msra.mxu3 %v2591_v31  ;;  %v4337_v46 = vpop.eup %4336  ;;  %v2494_v58 = vmul.f32 0.6931472, %v4335_v26  ;;  %v2700_v24 = vld [vmem:[#allocation5 + $0x4f8] sm:$0xff]  ;;  %v2663_v29 = vld [vmem:[#allocation5 + $0x3d0] sm:$0xff]  ;;  %v2682_v26 = vld [vmem:[#allocation5 + $0x468] sm:$0xff] }
 0x2a4   : > { %2884 = vmatpush.msrb.mxu0 %v2613_v27  ;;  %2904 = vmatpush.msrb.mxu1 %v2629_v28  ;;  %v2134_v39 = vpop.f32.mrf.mxu2  ;;  %v2496_v61 = vmul.f32 0.6931472, %v4337_v46  ;;  %v2647_v28 = vld [vmem:[#allocation5 + $0x350] sm:$0xff]  ;;  %v2681_v46 = vld [vmem:[#allocation5 + $0x460] sm:$0xff] }
 0x2a5   : > { %2851 = vmatpush.msra.mxu2 %v2574_v36  ;;  %2871 = vmatpush.msra.mxu3 %v2590_v9  ;;  %v5318_v45 = vadd.f32 %v2134_v39, %v5307_v30  ;;  %v2154_v44 = vpop.f32.mrf.mxu3  ;;  %v2525_v11 = vadd.f32 %v2494_v58, %v2397_v53  ;;  %v2699_v36 = vld [vmem:[#allocation5 + $0x4f0] sm:$0xff]  ;;  %v2646_v39 = vld [vmem:[#allocation5 + $0x348] sm:$0xff] }
 0x2a6   : > { %2885 = vmatpush.msrb.mxu0 %v2612_v32  ;;  %2905 = vmatpush.msrb.mxu1 %v2628_v35  ;;  %v5321_v47 = vadd.f32 %v2154_v44, %v5307_v30  ;;  %v2526_v3 = vadd.f32 %v2496_v61, %v2398_v60  ;;  %v2683_v35 = vld [vmem:[#allocation5 + $0x470] sm:$0xff]  ;;  %v2661_v44 = vld [vmem:[#allocation5 + $0x3c0] sm:$0xff]  ;;  %v2642_v60 = vld [vmem:[#allocation5 + $0x328] sm:$0xff] }
 0x2a7   : > { %v2415_v50 = vand.u32 2147483647, %v5318_v45  ;;  %2852 = vmatpush.msra.mxu2 %v2573_v40  ;;  %2872 = vmatpush.msra.mxu3 %v2589_v42  ;;  %v2662_v40 = vld [vmem:[#allocation5 + $0x3c8] sm:$0xff]  ;;  %v2659_v53 = vld [vmem:[#allocation5 + $0x3b0] sm:$0xff] }
 0x2a8   : > { %2886 = vmatpush.msrb.mxu0 %v2611_v37  ;;  %2906 = vmatpush.msrb.mxu1 %v2627_v19  ;;  %v2416_v55 = vand.u32 2147483647, %v5321_v47  ;;  %v2658_v61 = vld [vmem:[#allocation5 + $0x3a8] sm:$0xff] }
 0x2a9   : > { %v2431_v62 = vsub.f32 0.0, %v2415_v50  ;;  %2917 = vmatpush.msrb.mxu2 %v2652_v48  ;;  %2937 = vmatpush.msrb.mxu3 %v2668_v49  ;;  %v2697_v48 = vld [vmem:[#allocation5 + $0x4e0] sm:$0xff]  ;;  %v2644_v49 = vld [vmem:[#allocation5 + $0x338] sm:$0xff] }
 0x2aa   : > { %2887 = vmatpush.msrb.mxu0 %v2610_v33  ;;  %2907 = vmatpush.msrb.mxu1 %v2626_v43  ;;  %v2432_v38 = vsub.f32 0.0, %v2416_v55  ;;  %v2698_v33 = vld [vmem:[#allocation5 + $0x4e8] sm:$0xff]  ;;  %v2645_v43 = vld [vmem:[#allocation5 + $0x340] sm:$0xff]  ;;  %v2660_v50 = vld [vmem:[#allocation5 + $0x3b8] sm:$0xff] }
 0x2ab   : > { %v2449_v1 = vmul.f32 1.442695, %v2431_v62  ;;  %2918 = vmatpush.msrb.mxu2 %v2651_v57  ;;  %2938 = vmatpush.msrb.mxu3 %v2667_v25  ;;  %v2695_v57 = vld [vmem:[#allocation5 + $0x4d0] sm:$0xff] }
 0x2ac   : > { %2888 = vmatpush.msrb.mxu0 %v2609_v63  ;;  %2908 = vmatpush.msrb.mxu1 %v2625_v52  ;;  %v2451_v5 = vmul.f32 1.442695, %v2432_v38  ;;  %v2680_v63 = vld [vmem:[#allocation5 + $0x458] sm:$0xff]  ;;  %v2678_v38 = vld [vmem:[#allocation5 + $0x448] sm:$0xff] }
 0x2ad   : > { %v2174_v10 = vpop.f32.mrf.mxu0  ;;  %4338 = vpow2.f32 %v2449_v1  ;;  %2919 = vmatpush.msrb.mxu2 %v2650_v54  ;;  %2939 = vmatpush.msrb.mxu3 %v2666_v51  ;;  %v2696_v52 = vld [vmem:[#allocation5 + $0x4d8] sm:$0xff]  ;;  %v2694_v54 = vld [vmem:[#allocation5 + $0x4c8] sm:$0xff]  ;;  %v2641_v1 = vld [vmem:[#allocation5 + $0x320] sm:$0xff] }
 0x2ae   : > { %2889 = vmatpush.msrb.mxu0 %v2608_v16  ;;  %2909 = vmatpush.msrb.mxu1 %v2624_v56  ;;  %v5328_v14 = vadd.f32 %v2174_v10, %v5307_v30  ;;  %v2194_v15 = vpop.f32.mrf.mxu1  ;;  %4340 = vpow2.f32 %v2451_v5  ;;  %v2643_v16 = vld [vmem:[#allocation5 + $0x330] sm:$0xff]  ;;  %v2693_v10 = vld [vmem:[#allocation5 + $0x4c0] sm:$0xff] }
 0x2af   : > { %v5331_v17 = vadd.f32 %v2194_v15, %v5307_v30  ;;  %2920 = vmatpush.msrb.mxu2 %v2649_v7  ;;  %2940 = vmatpush.msrb.mxu3 %v2665_v8  ;;  %v2679_v56 = vld [vmem:[#allocation5 + $0x450] sm:$0xff]  ;;  %v2676_v15 = vld [vmem:[#allocation5 + $0x438] sm:$0xff] }
 0x2b0   : > { %2890 = vmatpush.msrb.mxu0 %v2607_v2  ;;  %2910 = vmatpush.msrb.mxu1 %v2623_v59  ;;  %v2417_v18 = vand.u32 2147483647, %v5328_v14  ;;  %v2657_v2 = vld [vmem:[#allocation5 + $0x3a0] sm:$0xff] }
 0x2b1   : > { %v2418_v20 = vand.u32 2147483647, %v5331_v17  ;;  %2813 = vmatmul.f32.vlgmr.msra.gmra.mxu0 %v2525_v11  ;;  %2833 = vmatmul.f32.vlgmr.msra.gmra.mxu1 %v2526_v3  ;;  %v2677_v59 = vld [vmem:[#allocation5 + $0x440] sm:$0xff]  ;;  %v2640_v11 = vld [vmem:[#allocation5 + $0x318] sm:$0xff] }
 0x2b2   : > { %2891 = vmatpush.msrb.mxu0 %v2606_v12  ;;  %2911 = vmatpush.msrb.mxu1 %v2622_v13  ;;  %v2433_v22 = vsub.f32 0.0, %v2417_v18  ;;  %v2656_v3 = vld [vmem:[#allocation5 + $0x398] sm:$0xff]  ;;  %v2399_v12 = vmax.f32 %v5318_v45, 0.0  ;;  %v2400_v13 = vmax.f32 %v5321_v47, 0.0 }
 0x2b3   : > { %v2434_v27 = vsub.f32 0.0, %v2418_v20  ;;  %v4339_v31 = vpop.eup %4338  ;;  %2921 = vmatpush.msrb.mxu2 %v2648_v21  ;;  %2941 = vmatpush.msrb.mxu3 %v2664_v0  ;;  %v2692_v18 = vld [vmem:[#allocation5 + $0x4b8] sm:$0xff]  ;;  %v2675_v0 = vld [vmem:[#allocation5 + $0x430] sm:$0xff] }
 0x2b4   : > { %2892 = vmatpush.msrb.mxu0 %v2605_v6  ;;  %2912 = vmatpush.msrb.mxu1 %v2621_v4  ;;  %v2453_v32 = vmul.f32 1.442695, %v2433_v22  ;;  %v4341_v9 = vpop.eup %4340  ;;  %v2479_v37 = vadd.f32 1.0, %v4339_v31  ;;  %v2639_v6 = vld [vmem:[#allocation5 + $0x310] sm:$0xff] }
 0x2b5   : > { %v2455_v19 = vmul.f32 1.442695, %v2434_v27  ;;  %v2480_v42 = vadd.f32 1.0, %v4341_v9  ;;  %2922 = vmatpush.msrb.mxu2 %v2647_v28  ;;  %2942 = vmatpush.msrb.mxu3 %v2663_v29  ;;  %v2655_v4 = vld [vmem:[#allocation5 + $0x390] sm:$0xff]  ;;  %v2674_v28 = vld [vmem:[#allocation5 + $0x428] sm:$0xff]  ;;  %v2673_v9 = vld [vmem:[#allocation5 + $0x420] sm:$0xff] }
 0x2b6   : > { %2957 = vmatpush.msra.mxu0 %v2684_v23  ;;  %2977 = vmatpush.msra.mxu1 %v2700_v24  ;;  %4342 = vpow2.f32 %v2453_v32  ;;  %v2691_v22 = vld [vmem:[#allocation5 + $0x4b0] sm:$0xff]  ;;  %v2638_v23 = vld [vmem:[#allocation5 + $0x308] sm:$0xff] }
 0x2b7   : > { %4344 = vlog2.f32 %v2479_v37  ;;  %2923 = vmatpush.msrb.mxu2 %v2646_v39  ;;  %2943 = vmatpush.msrb.mxu3 %v2662_v40  ;;  %v2654_v24 = vld [vmem:[#allocation5 + $0x388] sm:$0xff]  ;;  %v2689_v39 = vld [vmem:[#allocation5 + $0x4a0] sm:$0xff] }
 0x2b8   : > { %2958 = vmatpush.msra.mxu0 %v2683_v35  ;;  %2978 = vmatpush.msra.mxu1 %v2699_v36  ;;  %4346 = vlog2.f32 %v2480_v42  ;;  %v2690_v29 = vld [vmem:[#allocation5 + $0x4a8] sm:$0xff]  ;;  %v2637_v35 = vld [vmem:[#allocation5 + $0x300] sm:$0xff]  ;;  %v2716_v42 = vld [vmem:[#allocation5 + $0x578] sm:$0xff] }
 0x2b9   : > { %4348 = vpow2.f32 %v2455_v19  ;;  %2924 = vmatpush.msrb.mxu2 %v2645_v43  ;;  %2944 = vmatpush.msrb.mxu3 %v2661_v44  ;;  %v2653_v36 = vld [vmem:[#allocation5 + $0x380] sm:$0xff] }
 0x2ba   : > { %2959 = vmatpush.msra.mxu0 %v2682_v26  ;;  %2979 = vmatpush.msra.mxu1 %v2698_v33  ;;  %v2732_v26 = vld [vmem:[#allocation5 + $0x5f8] sm:$0xff] }
 0x2bb   : > { %2925 = vmatpush.msrb.mxu2 %v2644_v49  ;;  %2945 = vmatpush.msrb.mxu3 %v2660_v50  ;;  %v2688_v49 = vld [vmem:[#allocation5 + $0x498] sm:$0xff]  ;;  %v2401_v50 = vmax.f32 %v5328_v14, 0.0 }
 0x2bc   : > { %2960 = vmatpush.msra.mxu0 %v2681_v46  ;;  %2980 = vmatpush.msra.mxu1 %v2697_v48  ;;  %v4343_v55 = vpop.eup %4342  ;;  %v2672_v48 = vld [vmem:[#allocation5 + $0x418] sm:$0xff] }
 0x2bd   : > { %v4345_v25 = vpop.eup %4344  ;;  %v2481_v58 = vadd.f32 1.0, %v4343_v55  ;;  %2926 = vmatpush.msrb.mxu2 %v2643_v16  ;;  %2946 = vmatpush.msrb.mxu3 %v2659_v53  ;;  %v2715_v16 = vld [vmem:[#allocation5 + $0x570] sm:$0xff] }
 0x2be   : > { %2961 = vmatpush.msra.mxu0 %v2680_v63  ;;  %2981 = vmatpush.msra.mxu1 %v2696_v52  ;;  %v4347_v62 = vpop.eup %4346  ;;  %v2498_v5 = vmul.f32 0.6931472, %v4345_v25  ;;  %v2402_v63 = vmax.f32 %v5331_v17, 0.0  ;;  %v2731_v53 = vld [vmem:[#allocation5 + $0x5f0] sm:$0xff] }
 0x2bf   : > { %v4349_v51 = vpop.eup %4348  ;;  %v2500_v7 = vmul.f32 0.6931472, %v4347_v62  ;;  %2927 = vmatpush.msrb.mxu2 %v2642_v60  ;;  %2947 = vmatpush.msrb.mxu3 %v2658_v61  ;;  %4350 = vlog2.f32 %v2481_v58  ;;  %v2714_v61 = vld [vmem:[#allocation5 + $0x568] sm:$0xff] }
 0x2c0   : > { %2962 = vmatpush.msra.mxu0 %v2679_v56  ;;  %2982 = vmatpush.msra.mxu1 %v2695_v57  ;;  %v2482_v8 = vadd.f32 1.0, %v4349_v51  ;;  %v2527_v20 = vadd.f32 %v2498_v5, %v2399_v12  ;;  %v2671_v56 = vld [vmem:[#allocation5 + $0x410] sm:$0xff]  ;;  %v2730_v62 = vld [vmem:[#allocation5 + $0x5e8] sm:$0xff]  ;;  %v2713_v5 = vld [vmem:[#allocation5 + $0x560] sm:$0xff] }
 0x2c1   : > { %2928 = vmatpush.msrb.mxu2 %v2641_v1  ;;  %2948 = vmatpush.msrb.mxu3 %v2657_v2  ;;  %v2528_v21 = vadd.f32 %v2500_v7, %v2400_v13  ;;  %v2687_v57 = vld [vmem:[#allocation5 + $0x490] sm:$0xff]  ;;  %v2670_v51 = vld [vmem:[#allocation5 + $0x408] sm:$0xff]  ;;  %v2729_v7 = vld [vmem:[#allocation5 + $0x5e0] sm:$0xff] }
 0x2c2   : > { %2963 = vmatpush.msra.mxu0 %v2678_v38  ;;  %2983 = vmatpush.msra.mxu1 %v2694_v54  ;;  %4352 = vlog2.f32 %v2482_v8  ;;  %v2686_v1 = vld [vmem:[#allocation5 + $0x488] sm:$0xff]  ;;  %v2712_v13 = vld [vmem:[#allocation5 + $0x558] sm:$0xff] }
 0x2c3   : > { %2929 = vmatpush.msrb.mxu2 %v2640_v11  ;;  %2949 = vmatpush.msrb.mxu3 %v2656_v3  ;;  %v2685_v11 = vld [vmem:[#allocation5 + $0x480] sm:$0xff] }
 0x2c4   : > { %2964 = vmatpush.msra.mxu0 %v2677_v59  ;;  %2984 = vmatpush.msra.mxu1 %v2693_v10  ;;  %v2669_v10 = vld [vmem:[#allocation5 + $0x400] sm:$0xff] }
 0x2c5   : > { %2930 = vmatpush.msrb.mxu2 %v2639_v6  ;;  %2950 = vmatpush.msrb.mxu3 %v2655_v4  ;;  %v4351_v27 = vpop.eup %4350  ;;  %v2748_v6 = vld [vmem:[#allocation5 + $0x678] sm:$0xff] }
 0x2c6   : > { %2965 = vmatpush.msra.mxu0 %v2676_v15  ;;  %2985 = vmatpush.msra.mxu1 %v2692_v18  ;;  %v2214_v31 = vpop.f32.mrf.mxu2  ;;  %v2502_v33 = vmul.f32 0.6931472, %v4351_v27  ;;  %v2728_v15 = vld [vmem:[#allocation5 + $0x5d8] sm:$0xff]  ;;  %v2763_v27 = vld [vmem:[#allocation5 + $0x6f0] sm:$0xff] }
 0x2c7   : > { %2853 = vmatmul.f32.vlgmr.msra.gmra.mxu2 %v2527_v20  ;;  %2873 = vmatmul.f32.vlgmr.msra.gmra.mxu3 %v2528_v21  ;;  %v5338_v37 = vadd.f32 %v2214_v31, %v5307_v30  ;;  %v2234_v19 = vpop.f32.mrf.mxu3  ;;  %v2764_v4 = vld [vmem:[#allocation5 + $0x6f8] sm:$0xff]  ;;  %v2711_v21 = vld [vmem:[#allocation5 + $0x550] sm:$0xff] }
 0x2c8   : > { %2966 = vmatpush.msra.mxu0 %v2675_v0  ;;  %2986 = vmatpush.msra.mxu1 %v2691_v22  ;;  %v4353_v32 = vpop.eup %4352  ;;  %v5341_v40 = vadd.f32 %v2234_v19, %v5307_v30  ;;  %v2529_v25 = vadd.f32 %v2502_v33, %v2401_v50  ;;  %v2727_v0 = vld [vmem:[#allocation5 + $0x5d0] sm:$0xff]  ;;  %v2762_v19 = vld [vmem:[#allocation5 + $0x6e8] sm:$0xff]  ;;  %v2761_v33 = vld [vmem:[#allocation5 + $0x6e0] sm:$0xff] }
 0x2c9   : > { %2931 = vmatpush.msrb.mxu2 %v2638_v23  ;;  %2951 = vmatpush.msrb.mxu3 %v2654_v24  ;;  %v2504_v43 = vmul.f32 0.6931472, %v4353_v32  ;;  %v2419_v44 = vand.u32 2147483647, %v5338_v37  ;;  %v2747_v24 = vld [vmem:[#allocation5 + $0x670] sm:$0xff]  ;;  %v2710_v32 = vld [vmem:[#allocation5 + $0x548] sm:$0xff] }
 0x2ca   : > { %2967 = vmatpush.msra.mxu0 %v2674_v28  ;;  %2987 = vmatpush.msra.mxu1 %v2690_v29  ;;  %v2420_v46 = vand.u32 2147483647, %v5341_v40  ;;  %v2723_v50 = vld [vmem:[#allocation5 + $0x5b0] sm:$0xff] }
 0x2cb   : > { %2932 = vmatpush.msrb.mxu2 %v2637_v35  ;;  %2952 = vmatpush.msrb.mxu3 %v2653_v36  ;;  %v2435_v52 = vsub.f32 0.0, %v2419_v44  ;;  %v2530_v58 = vadd.f32 %v2504_v43, %v2402_v63  ;;  %v2726_v35 = vld [vmem:[#allocation5 + $0x5c8] sm:$0xff]  ;;  %v2708_v43 = vld [vmem:[#allocation5 + $0x538] sm:$0xff] }
 0x2cc   : > { %2968 = vmatpush.msra.mxu0 %v2673_v9  ;;  %2988 = vmatpush.msra.mxu1 %v2689_v39  ;;  %v2436_v55 = vsub.f32 0.0, %v2420_v46  ;;  %v2746_v9 = vld [vmem:[#allocation5 + $0x668] sm:$0xff]  ;;  %v2709_v39 = vld [vmem:[#allocation5 + $0x540] sm:$0xff]  ;;  %v2724_v44 = vld [vmem:[#allocation5 + $0x5b8] sm:$0xff] }
 0x2cd   : > { %2997 = vmatpush.msra.mxu2 %v2716_v42  ;;  %3017 = vmatpush.msra.mxu3 %v2732_v26  ;;  %v2457_v60 = vmul.f32 1.442695, %v2435_v52  ;;  %v2725_v42 = vld [vmem:[#allocation5 + $0x5c0] sm:$0xff]  ;;  %v2744_v46 = vld [vmem:[#allocation5 + $0x658] sm:$0xff]  ;;  %v2743_v52 = vld [vmem:[#allocation5 + $0x650] sm:$0xff] }
 0x2ce   : > { %2969 = vmatpush.msra.mxu0 %v2672_v48  ;;  %2989 = vmatpush.msra.mxu1 %v2688_v49  ;;  %v2459_v38 = vmul.f32 1.442695, %v2436_v55  ;;  %v2745_v26 = vld [vmem:[#allocation5 + $0x660] sm:$0xff]  ;;  %v2760_v48 = vld [vmem:[#allocation5 + $0x6d8] sm:$0xff]  ;;  %v2707_v49 = vld [vmem:[#allocation5 + $0x530] sm:$0xff] }
 0x2cf   : > { %2998 = vmatpush.msra.mxu2 %v2715_v16  ;;  %3018 = vmatpush.msra.mxu3 %v2731_v53  ;;  %v2254_v54 = vpop.f32.mrf.mxu0  ;;  %4354 = vpow2.f32 %v2457_v60  ;;  %v2759_v16 = vld [vmem:[#allocation5 + $0x6d0] sm:$0xff]  ;;  %v2758_v60 = vld [vmem:[#allocation5 + $0x6c8] sm:$0xff] }
 0x2d0   : > { %2970 = vmatpush.msra.mxu0 %v2671_v56  ;;  %2990 = vmatpush.msra.mxu1 %v2687_v57  ;;  %v5348_v2 = vadd.f32 %v2254_v54, %v5307_v30  ;;  %v2274_v59 = vpop.f32.mrf.mxu1  ;;  %4356 = vpow2.f32 %v2459_v38  ;;  %v2706_v56 = vld [vmem:[#allocation5 + $0x528] sm:$0xff]  ;;  %v2721_v38 = vld [vmem:[#allocation5 + $0x5a0] sm:$0xff] }
 0x2d1   : > { %2999 = vmatpush.msra.mxu2 %v2714_v61  ;;  %3019 = vmatpush.msra.mxu3 %v2730_v62  ;;  %v5351_v8 = vadd.f32 %v2274_v59, %v5307_v30  ;;  %v2722_v57 = vld [vmem:[#allocation5 + $0x5a8] sm:$0xff]  ;;  %v2705_v62 = vld [vmem:[#allocation5 + $0x520] sm:$0xff]  ;;  %v2704_v59 = vld [vmem:[#allocation5 + $0x518] sm:$0xff] }
 0x2d2   : > { %2893 = vmatmul.f32.vlgmr.msrb.gmra.mxu0 %v2529_v25  ;;  %2913 = vmatmul.f32.vlgmr.msrb.gmra.mxu1 %v2530_v58  ;;  %v2421_v3 = vand.u32 2147483647, %v5348_v2  ;;  %v2742_v58 = vld [vmem:[#allocation5 + $0x648] sm:$0xff] }
 0x2d3   : > { %2971 = vmatpush.msra.mxu0 %v2670_v51  ;;  %2991 = vmatpush.msra.mxu1 %v2686_v1  ;;  %v2422_v12 = vand.u32 2147483647, %v5351_v8  ;;  %v2741_v51 = vld [vmem:[#allocation5 + $0x640] sm:$0xff] }
 0x2d4   : > { %3000 = vmatpush.msra.mxu2 %v2713_v5  ;;  %3020 = vmatpush.msra.mxu3 %v2729_v7  ;;  %v2437_v18 = vsub.f32 0.0, %v2421_v3  ;;  %v2757_v1 = vld [vmem:[#allocation5 + $0x6c0] sm:$0xff]  ;;  %v2720_v5 = vld [vmem:[#allocation5 + $0x598] sm:$0xff] }
 0x2d5   : > { %2972 = vmatpush.msra.mxu0 %v2669_v10  ;;  %2992 = vmatpush.msra.mxu1 %v2685_v11  ;;  %v2438_v20 = vsub.f32 0.0, %v2422_v12  ;;  %v4355_v22 = vpop.eup %4354  ;;  %v2740_v11 = vld [vmem:[#allocation5 + $0x638] sm:$0xff]  ;;  %v2703_v12 = vld [vmem:[#allocation5 + $0x510] sm:$0xff] }
 0x2d6   : > { %v2461_v23 = vmul.f32 1.442695, %v2437_v18  ;;  %3001 = vmatpush.msra.mxu2 %v2712_v13  ;;  %3021 = vmatpush.msra.mxu3 %v2728_v15  ;;  %v4357_v28 = vpop.eup %4356  ;;  %v2483_v29 = vadd.f32 1.0, %v4355_v22  ;;  %v2756_v3 = vld [vmem:[#allocation5 + $0x6b8] sm:$0xff]  ;;  %v2719_v13 = vld [vmem:[#allocation5 + $0x590] sm:$0xff]  ;;  %v2403_v15 = vmax.f32 %v5338_v37, 0.0 }
 0x2d7   : > { %v2463_v31 = vmul.f32 1.442695, %v2438_v20  ;;  %3037 = vmatpush.msrb.mxu0 %v2748_v6  ;;  %3057 = vmatpush.msrb.mxu1 %v2764_v4  ;;  %v2484_v36 = vadd.f32 1.0, %v4357_v28  ;;  %v2404_v18 = vmax.f32 %v5341_v40, 0.0  ;;  %v2739_v6 = vld [vmem:[#allocation5 + $0x630] sm:$0xff]  ;;  %v2702_v20 = vld [vmem:[#allocation5 + $0x508] sm:$0xff] }
 0x2d8   : > { %4358 = vpow2.f32 %v2461_v23  ;;  %3002 = vmatpush.msra.mxu2 %v2711_v21  ;;  %3022 = vmatpush.msra.mxu3 %v2727_v0  ;;  %v2755_v4 = vld [vmem:[#allocation5 + $0x6b0] sm:$0xff]  ;;  %v2718_v21 = vld [vmem:[#allocation5 + $0x588] sm:$0xff] }
 0x2d9   : > { %4360 = vlog2.f32 %v2483_v29  ;;  %3038 = vmatpush.msrb.mxu0 %v2747_v24  ;;  %3058 = vmatpush.msrb.mxu1 %v2763_v27  ;;  %v2738_v23 = vld [vmem:[#allocation5 + $0x628] sm:$0xff] }
 0x2da   : > { %4362 = vlog2.f32 %v2484_v36  ;;  %3003 = vmatpush.msra.mxu2 %v2710_v32  ;;  %3023 = vmatpush.msra.mxu3 %v2726_v35  ;;  %v2754_v24 = vld [vmem:[#allocation5 + $0x6a8] sm:$0xff]  ;;  %v2717_v32 = vld [vmem:[#allocation5 + $0x580] sm:$0xff] }
 0x2db   : > { %4364 = vpow2.f32 %v2463_v31  ;;  %3039 = vmatpush.msrb.mxu0 %v2746_v9  ;;  %3059 = vmatpush.msrb.mxu1 %v2762_v19  ;;  %v2701_v31 = vld [vmem:[#allocation5 + $0x500] sm:$0xff] }
 0x2dc   : > { %3004 = vmatpush.msra.mxu2 %v2709_v39  ;;  %3024 = vmatpush.msra.mxu3 %v2725_v42  ;;  %v2737_v9 = vld [vmem:[#allocation5 + $0x620] sm:$0xff]  ;;  %v2780_v39 = vld [vmem:[#allocation5 + $0x778] sm:$0xff] }
 0x2dd   : > { %3040 = vmatpush.msrb.mxu0 %v2745_v26  ;;  %3060 = vmatpush.msrb.mxu1 %v2761_v33  ;;  %v2753_v19 = vld [vmem:[#allocation5 + $0x6a0] sm:$0xff]  ;;  %v2796_v26 = vld [vmem:[#allocation5 + $0x7f8] sm:$0xff] }
 0x2de   : > { %v4359_v63 = vpop.eup %4358  ;;  %3005 = vmatpush.msra.mxu2 %v2708_v43  ;;  %3025 = vmatpush.msra.mxu3 %v2724_v44  ;;  %v2736_v43 = vld [vmem:[#allocation5 + $0x618] sm:$0xff] }
 0x2df   : > { %v4361_v53 = vpop.eup %4360  ;;  %v2485_v55 = vadd.f32 1.0, %v4359_v63  ;;  %3041 = vmatpush.msrb.mxu0 %v2744_v46  ;;  %3061 = vmatpush.msrb.mxu1 %v2760_v48  ;;  %v2752_v44 = vld [vmem:[#allocation5 + $0x698] sm:$0xff]  ;;  %v2779_v63 = vld [vmem:[#allocation5 + $0x770] sm:$0xff] }
 0x2e0   : > { %v4363_v25 = vpop.eup %4362  ;;  %3006 = vmatpush.msra.mxu2 %v2707_v49  ;;  %3026 = vmatpush.msra.mxu3 %v2723_v50  ;;  %v2506_v7 = vmul.f32 0.6931472, %v4361_v53  ;;  %v2406_v53 = vmax.f32 %v5351_v8, 0.0 }
 0x2e1   : > { %v4365_v61 = vpop.eup %4364  ;;  %3042 = vmatpush.msrb.mxu0 %v2743_v52  ;;  %3062 = vmatpush.msrb.mxu1 %v2759_v16  ;;  %4366 = vlog2.f32 %v2485_v55  ;;  %v2508_v10 = vmul.f32 0.6931472, %v4363_v25  ;;  %v2795_v52 = vld [vmem:[#allocation5 + $0x7f0] sm:$0xff]  ;;  %v2405_v16 = vmax.f32 %v5348_v2, 0.0 }
 0x2e2   : > { %v2486_v54 = vadd.f32 1.0, %v4365_v61  ;;  %3007 = vmatpush.msra.mxu2 %v2706_v56  ;;  %3027 = vmatpush.msra.mxu3 %v2722_v57  ;;  %v2531_v0 = vadd.f32 %v2506_v7, %v2403_v15  ;;  %v2735_v56 = vld [vmem:[#allocation5 + $0x610] sm:$0xff]  ;;  %v2777_v7 = vld [vmem:[#allocation5 + $0x760] sm:$0xff]  ;;  %v2776_v15 = vld [vmem:[#allocation5 + $0x758] sm:$0xff] }
 0x2e3   : > { %3043 = vmatpush.msrb.mxu0 %v2742_v58  ;;  %3063 = vmatpush.msrb.mxu1 %v2758_v60  ;;  %v2532_v22 = vadd.f32 %v2508_v10, %v2404_v18  ;;  %v2751_v57 = vld [vmem:[#allocation5 + $0x690] sm:$0xff]  ;;  %v2778_v58 = vld [vmem:[#allocation5 + $0x768] sm:$0xff]  ;;  %v2793_v10 = vld [vmem:[#allocation5 + $0x7e0] sm:$0xff] }
 0x2e4   : > { %4368 = vlog2.f32 %v2486_v54  ;;  %3008 = vmatpush.msra.mxu2 %v2705_v62  ;;  %3028 = vmatpush.msra.mxu3 %v2721_v38  ;;  %v2794_v60 = vld [vmem:[#allocation5 + $0x7e8] sm:$0xff]  ;;  %v2792_v18 = vld [vmem:[#allocation5 + $0x7d8] sm:$0xff] }
 0x2e5   : > { %3044 = vmatpush.msrb.mxu0 %v2741_v51  ;;  %3064 = vmatpush.msrb.mxu1 %v2757_v1  ;;  %v2734_v54 = vld [vmem:[#allocation5 + $0x608] sm:$0xff] }
 0x2e6   : > { %3009 = vmatpush.msra.mxu2 %v2704_v59  ;;  %3029 = vmatpush.msra.mxu3 %v2720_v5  ;;  %v2750_v51 = vld [vmem:[#allocation5 + $0x688] sm:$0xff] }
 0x2e7   : > { %3045 = vmatpush.msrb.mxu0 %v2740_v11  ;;  %3065 = vmatpush.msrb.mxu1 %v2756_v3  ;;  %v4367_v27 = vpop.eup %4366  ;;  %v2733_v3 = vld [vmem:[#allocation5 + $0x600] sm:$0xff] }
 0x2e8   : > { %3010 = vmatpush.msra.mxu2 %v2703_v12  ;;  %3030 = vmatpush.msra.mxu3 %v2719_v13  ;;  %v2294_v28 = vpop.f32.mrf.mxu2  ;;  %v2510_v46 = vmul.f32 0.6931472, %v4367_v27  ;;  %v2749_v12 = vld [vmem:[#allocation5 + $0x680] sm:$0xff] }
 0x2e9   : > { %3046 = vmatpush.msrb.mxu0 %v2739_v6  ;;  %3066 = vmatpush.msrb.mxu1 %v2755_v4  ;;  %v5358_v35 = vadd.f32 %v2294_v28, %v5307_v30  ;;  %v2314_v36 = vpop.f32.mrf.mxu3  ;;  %v3132_v4 = vld [vmem:[#allocation7 + $0x78] sm:$0xff]  ;;  %v3131_v28 = vld [vmem:[#allocation7 + $0x70] sm:$0xff] }
 0x2ea   : > { %v4369_v29 = vpop.eup %4368  ;;  %3011 = vmatpush.msra.mxu2 %v2702_v20  ;;  %3031 = vmatpush.msra.mxu3 %v2718_v21  ;;  %v5361_v42 = vadd.f32 %v2314_v36, %v5307_v30  ;;  %v2533_v61 = vadd.f32 %v2510_v46, %v2405_v16  ;;  %v3148_v20 = vld [vmem:[#allocation7 + $0xf8] sm:$0xff]  ;;  %v3129_v46 = vld [vmem:[#allocation7 + $0x60] sm:$0xff]  ;;  %v2771_v16 = vld [vmem:[#allocation5 + $0x730] sm:$0xff] }
 0x2eb   : > { %3047 = vmatpush.msrb.mxu0 %v2738_v23  ;;  %3067 = vmatpush.msrb.mxu1 %v2754_v24  ;;  %v2423_v33 = vand.u32 2147483647, %v5358_v35  ;;  %v2512_v48 = vmul.f32 0.6931472, %v4369_v29  ;;  %v2791_v23 = vld [vmem:[#allocation5 + $0x7d0] sm:$0xff] }
 0x2ec   : > { %2933 = vmatmul.f32.vlgmr.msrb.gmra.mxu2 %v2531_v0  ;;  %2953 = vmatmul.f32.vlgmr.msrb.gmra.mxu3 %v2532_v22  ;;  %v2424_v49 = vand.u32 2147483647, %v5361_v42  ;;  %v2775_v22 = vld [vmem:[#allocation5 + $0x750] sm:$0xff] }
 0x2ed   : > { %3012 = vmatpush.msra.mxu2 %v2701_v31  ;;  %3032 = vmatpush.msra.mxu3 %v2717_v32  ;;  %v2439_v50 = vsub.f32 0.0, %v2423_v33  ;;  %v2534_v62 = vadd.f32 %v2512_v48, %v2406_v53  ;;  %v3147_v29 = vld [vmem:[#allocation7 + $0xf0] sm:$0xff]  ;;  %v3146_v33 = vld [vmem:[#allocation7 + $0xe8] sm:$0xff]  ;;  %v3145_v48 = vld [vmem:[#allocation7 + $0xe0] sm:$0xff] }
 0x2ee   : > { %3048 = vmatpush.msrb.mxu0 %v2737_v9  ;;  %3068 = vmatpush.msrb.mxu1 %v2753_v19  ;;  %v2440_v55 = vsub.f32 0.0, %v2424_v49  ;;  %v2774_v9 = vld [vmem:[#allocation5 + $0x748] sm:$0xff]  ;;  %v2772_v49 = vld [vmem:[#allocation5 + $0x738] sm:$0xff]  ;;  %v2787_v53 = vld [vmem:[#allocation5 + $0x7b0] sm:$0xff] }
 0x2ef   : > { %3077 = vmatpush.msrb.mxu2 %v2780_v39  ;;  %3097 = vmatpush.msrb.mxu3 %v2796_v26  ;;  %v2465_v25 = vmul.f32 1.442695, %v2439_v50  ;;  %v2790_v19 = vld [vmem:[#allocation5 + $0x7c8] sm:$0xff]  ;;  %v2788_v50 = vld [vmem:[#allocation5 + $0x7b8] sm:$0xff] }
 0x2f0   : > { %3049 = vmatpush.msrb.mxu0 %v2736_v43  ;;  %3069 = vmatpush.msrb.mxu1 %v2752_v44  ;;  %v2467_v38 = vmul.f32 1.442695, %v2440_v55  ;;  %v3130_v26 = vld [vmem:[#allocation7 + $0x68] sm:$0xff]  ;;  %v2773_v43 = vld [vmem:[#allocation5 + $0x740] sm:$0xff] }
 0x2f1   : > { %3078 = vmatpush.msrb.mxu2 %v2779_v63  ;;  %3098 = vmatpush.msrb.mxu3 %v2795_v52  ;;  %v2334_v1 = vpop.f32.mrf.mxu0  ;;  %4370 = vpow2.f32 %v2465_v25  ;;  %v2789_v44 = vld [vmem:[#allocation5 + $0x7c0] sm:$0xff]  ;;  %v3128_v63 = vld [vmem:[#allocation7 + $0x58] sm:$0xff] }
 0x2f2   : > { %3050 = vmatpush.msrb.mxu0 %v2735_v56  ;;  %3070 = vmatpush.msrb.mxu1 %v2751_v57  ;;  %v5368_v59 = vadd.f32 %v2334_v1, %v5307_v30  ;;  %v2354_v5 = vpop.f32.mrf.mxu1  ;;  %4372 = vpow2.f32 %v2467_v38  ;;  %v3144_v52 = vld [vmem:[#allocation7 + $0xd8] sm:$0xff]  ;;  %v3127_v56 = vld [vmem:[#allocation7 + $0x50] sm:$0xff]  ;;  %v3126_v38 = vld [vmem:[#allocation7 + $0x48] sm:$0xff] }
 0x2f3   : > { %3079 = vmatpush.msrb.mxu2 %v2778_v58  ;;  %3099 = vmatpush.msrb.mxu3 %v2794_v60  ;;  %v5371_v11 = vadd.f32 %v2354_v5, %v5307_v30  ;;  %v3143_v57 = vld [vmem:[#allocation7 + $0xd0] sm:$0xff]  ;;  %v2770_v58 = vld [vmem:[#allocation5 + $0x728] sm:$0xff]  ;;  %v2769_v1 = vld [vmem:[#allocation5 + $0x720] sm:$0xff] }
 0x2f4   : > { %3051 = vmatpush.msrb.mxu0 %v2734_v54  ;;  %3071 = vmatpush.msrb.mxu1 %v2750_v51  ;;  %v2425_v13 = vand.u32 2147483647, %v5368_v59  ;;  %v2786_v60 = vld [vmem:[#allocation5 + $0x7a8] sm:$0xff]  ;;  %v2785_v5 = vld [vmem:[#allocation5 + $0x7a0] sm:$0xff] }
 0x2f5   : > { %2973 = vmatmul.f32.vlgmr.msra.gmra.mxu0 %v2533_v61  ;;  %2993 = vmatmul.f32.vlgmr.msra.gmra.mxu1 %v2534_v62  ;;  %v2426_v6 = vand.u32 2147483647, %v5371_v11  ;;  %v3142_v54 = vld [vmem:[#allocation7 + $0xc8] sm:$0xff] }
 0x2f6   : > { %3080 = vmatpush.msrb.mxu2 %v2777_v7  ;;  %3100 = vmatpush.msrb.mxu3 %v2793_v10  ;;  %v2441_v21 = vsub.f32 0.0, %v2425_v13  ;;  %v3125_v10 = vld [vmem:[#allocation7 + $0x40] sm:$0xff]  ;;  %v2784_v13 = vld [vmem:[#allocation5 + $0x798] sm:$0xff] }
 0x2f7   : > { %3052 = vmatpush.msrb.mxu0 %v2733_v3  ;;  %3072 = vmatpush.msrb.mxu1 %v2749_v12  ;;  %v2442_v0 = vsub.f32 0.0, %v2426_v6  ;;  %v4371_v24 = vpop.eup %4370  ;;  %v3141_v3 = vld [vmem:[#allocation7 + $0xc0] sm:$0xff]  ;;  %v2768_v12 = vld [vmem:[#allocation5 + $0x718] sm:$0xff] }
 0x2f8   : > { %3081 = vmatpush.msrb.mxu2 %v2776_v15  ;;  %3101 = vmatpush.msrb.mxu3 %v2792_v18  ;;  %v2469_v27 = vmul.f32 1.442695, %v2441_v21  ;;  %v4373_v31 = vpop.eup %4372  ;;  %v2487_v32 = vadd.f32 1.0, %v4371_v24  ;;  %v3124_v6 = vld [vmem:[#allocation7 + $0x38] sm:$0xff]  ;;  %v2783_v21 = vld [vmem:[#allocation5 + $0x790] sm:$0xff] }
 0x2f9   : > { %3373 = vmatpush.msra.mxu0 %v3132_v4  ;;  %3393 = vmatpush.msra.mxu1 %v3148_v20  ;;  %v2471_v36 = vmul.f32 1.442695, %v2442_v0  ;;  %v2488_v39 = vadd.f32 1.0, %v4373_v31  ;;  %v3140_v4 = vld [vmem:[#allocation7 + $0xb8] sm:$0xff]  ;;  %v2767_v20 = vld [vmem:[#allocation5 + $0x710] sm:$0xff]  ;;  %v2407_v0 = vmax.f32 %v5358_v35, 0.0 }
 0x2fa   : > { %4374 = vpow2.f32 %v2469_v27  ;;  %3082 = vmatpush.msrb.mxu2 %v2775_v22  ;;  %3102 = vmatpush.msrb.mxu3 %v2791_v23  ;;  %v2408_v22 = vmax.f32 %v5361_v42, 0.0  ;;  %v3123_v23 = vld [vmem:[#allocation7 + $0x30] sm:$0xff]  ;;  %v2766_v27 = vld [vmem:[#allocation5 + $0x708] sm:$0xff] }
 0x2fb   : > { %4376 = vlog2.f32 %v2487_v32  ;;  %3374 = vmatpush.msra.mxu0 %v3131_v28  ;;  %3394 = vmatpush.msra.mxu1 %v3147_v29  ;;  %v3139_v24 = vld [vmem:[#allocation7 + $0xb0] sm:$0xff]  ;;  %v2782_v28 = vld [vmem:[#allocation5 + $0x788] sm:$0xff] }
 0x2fc   : > { %4378 = vlog2.f32 %v2488_v39  ;;  %3083 = vmatpush.msrb.mxu2 %v2774_v9  ;;  %3103 = vmatpush.msrb.mxu3 %v2790_v19  ;;  %v3122_v32 = vld [vmem:[#allocation7 + $0x28] sm:$0xff] }
 0x2fd   : > { %4380 = vpow2.f32 %v2471_v36  ;;  %3375 = vmatpush.msra.mxu0 %v3130_v26  ;;  %3395 = vmatpush.msra.mxu1 %v3146_v33  ;;  %v3138_v36 = vld [vmem:[#allocation7 + $0xa8] sm:$0xff] }
 0x2fe   : > { %3084 = vmatpush.msrb.mxu2 %v2773_v43  ;;  %3104 = vmatpush.msrb.mxu3 %v2789_v44  ;;  %v2765_v43 = vld [vmem:[#allocation5 + $0x700] sm:$0xff] }
 0x2ff   : > { %3376 = vmatpush.msra.mxu0 %v3129_v46  ;;  %3396 = vmatpush.msra.mxu1 %v3145_v48  ;;  %v2781_v44 = vld [vmem:[#allocation5 + $0x780] sm:$0xff] }
 0x300   : > { %v4375_v55 = vpop.eup %4374  ;;  %3085 = vmatpush.msrb.mxu2 %v2772_v49  ;;  %3105 = vmatpush.msrb.mxu3 %v2788_v50  ;;  %v3121_v48 = vld [vmem:[#allocation7 + $0x20] sm:$0xff] }
 0x301   : > { %v4377_v25 = vpop.eup %4376  ;;  %3377 = vmatpush.msra.mxu0 %v3128_v63  ;;  %3397 = vmatpush.msra.mxu1 %v3144_v52  ;;  %v2489_v62 = vadd.f32 1.0, %v4375_v55  ;;  %v3137_v49 = vld [vmem:[#allocation7 + $0xa0] sm:$0xff]  ;;  %v3164_v63 = vld [vmem:[#allocation7 + $0x178] sm:$0xff] }
 0x302   : > { %v4379_v61 = vpop.eup %4378  ;;  %3086 = vmatpush.msrb.mxu2 %v2771_v16  ;;  %3106 = vmatpush.msrb.mxu3 %v2787_v53  ;;  %v2514_v15 = vmul.f32 0.6931472, %v4377_v25  ;;  %v3180_v52 = vld [vmem:[#allocation7 + $0x1f8] sm:$0xff] }
 0x303   : > { %v4381_v51 = vpop.eup %4380  ;;  %3378 = vmatpush.msra.mxu0 %v3127_v56  ;;  %3398 = vmatpush.msra.mxu1 %v3143_v57  ;;  %v2516_v18 = vmul.f32 0.6931472, %v4379_v61  ;;  %4382 = vlog2.f32 %v2489_v62  ;;  %v3136_v53 = vld [vmem:[#allocation7 + $0x98] sm:$0xff]  ;;  %v3163_v56 = vld [vmem:[#allocation7 + $0x170] sm:$0xff] }
 0x304   : > { %v2490_v7 = vadd.f32 1.0, %v4381_v51  ;;  %3087 = vmatpush.msrb.mxu2 %v2770_v58  ;;  %3107 = vmatpush.msrb.mxu3 %v2786_v60  ;;  %v2535_v29 = vadd.f32 %v2514_v15, %v2407_v0  ;;  %v3179_v60 = vld [vmem:[#allocation7 + $0x1f0] sm:$0xff]  ;;  %v2410_v51 = vmax.f32 %v5371_v11, 0.0  ;;  %v3161_v15 = vld [vmem:[#allocation7 + $0x160] sm:$0xff]  ;;  %v3196_v0 = vld [vmem:[#allocation7 + $0x278] sm:$0xff] }
 0x305   : > { %3379 = vmatpush.msra.mxu0 %v3126_v38  ;;  %3399 = vmatpush.msra.mxu1 %v3142_v54  ;;  %v2536_v31 = vadd.f32 %v2516_v18, %v2408_v22  ;;  %v3119_v62 = vld [vmem:[#allocation7 + $0x10] sm:$0xff]  ;;  %v2409_v54 = vmax.f32 %v5368_v59, 0.0  ;;  %v3177_v18 = vld [vmem:[#allocation7 + $0x1e0] sm:$0xff]  ;;  %v3212_v22 = vld [vmem:[#allocation7 + $0x2f8] sm:$0xff] }
 0x306   : > { %3088 = vmatpush.msrb.mxu2 %v2769_v1  ;;  %3108 = vmatpush.msrb.mxu3 %v2785_v5  ;;  %4384 = vlog2.f32 %v2490_v7  ;;  %v3135_v38 = vld [vmem:[#allocation7 + $0x90] sm:$0xff]  ;;  %v3162_v5 = vld [vmem:[#allocation7 + $0x168] sm:$0xff] }
 0x307   : > { %3380 = vmatpush.msra.mxu0 %v3125_v10  ;;  %3400 = vmatpush.msra.mxu1 %v3141_v3  ;;  %v3178_v7 = vld [vmem:[#allocation7 + $0x1e8] sm:$0xff] }
 0x308   : > { %3089 = vmatpush.msrb.mxu2 %v2768_v12  ;;  %3109 = vmatpush.msrb.mxu3 %v2784_v13  ;;  %v3118_v10 = vld [vmem:[#allocation7 + $0x8] sm:$0xff] }
 0x309   : > { %3381 = vmatpush.msra.mxu0 %v3124_v6  ;;  %3401 = vmatpush.msra.mxu1 %v3140_v4  ;;  %v4383_v33 = vpop.eup %4382  ;;  %v3134_v3 = vld [vmem:[#allocation7 + $0x88] sm:$0xff]  ;;  %v3117_v6 = vld [vmem:[#allocation7] sm:$0xff] }
 0x30a   : > { %3090 = vmatpush.msrb.mxu2 %v2767_v20  ;;  %3110 = vmatpush.msrb.mxu3 %v2783_v21  ;;  %v2374_v9 = vpop.f32.mrf.mxu2  ;;  %v2394_v19 = vpop.f32.mrf.mxu3  ;;  %v2518_v57 = vmul.f32 0.6931472, %v4383_v33  ;;  %v3133_v4 = vld [vmem:[#allocation7 + $0x80] sm:$0xff]  ;;  %v3160_v20 = vld [vmem:[#allocation7 + $0x158] sm:$0xff] }
 0x30b   : > { %3382 = vmatpush.msra.mxu0 %v3123_v23  ;;  %3402 = vmatpush.msra.mxu1 %v3139_v24  ;;  %v5378_v39 = vadd.f32 %v2374_v9, %v5307_v30  ;;  %v5381_v26 = vadd.f32 %v2394_v19, %v5307_v30  ;;  %v3120_v30 = vld [vmem:[#allocation7 + $0x18] sm:$0xff]  ;;  %v3159_v23 = vld [vmem:[#allocation7 + $0x150] sm:$0xff]  ;;  %v3194_v9 = vld [vmem:[#allocation7 + $0x268] sm:$0xff] }
 0x30c   : > { %3091 = vmatpush.msrb.mxu2 %v2766_v27  ;;  %3111 = vmatpush.msrb.mxu3 %v2782_v28  ;;  %v4385_v46 = vpop.eup %4384  ;;  %v2537_v12 = vadd.f32 %v2518_v57, %v2409_v54  ;;  %v3176_v21 = vld [vmem:[#allocation7 + $0x1d8] sm:$0xff]  ;;  %v3175_v24 = vld [vmem:[#allocation7 + $0x1d0] sm:$0xff]  ;;  %v3210_v19 = vld [vmem:[#allocation7 + $0x2e8] sm:$0xff] }
 0x30d   : > { %3383 = vmatpush.msra.mxu0 %v3122_v32  ;;  %3403 = vmatpush.msra.mxu1 %v3138_v36  ;;  %v2427_v50 = vand.u32 2147483647, %v5378_v39  ;;  %v2428_v16 = vand.u32 2147483647, %v5381_v26  ;;  %v2520_v25 = vmul.f32 0.6931472, %v4385_v46 }
 0x30e   : > { %3013 = vmatmul.f32.vlgmr.msra.gmra.mxu2 %v2535_v29  ;;  %3033 = vmatmul.f32.vlgmr.msra.gmra.mxu3 %v2536_v31  ;;  %v3195_v28 = vld [vmem:[#allocation7 + $0x270] sm:$0xff]  ;;  %v3158_v32 = vld [vmem:[#allocation7 + $0x148] sm:$0xff] }
 0x30f   : > { %3092 = vmatpush.msrb.mxu2 %v2765_v43  ;;  %3112 = vmatpush.msrb.mxu3 %v2781_v44  ;;  %v2443_v55 = vsub.f32 0.0, %v2427_v50  ;;  %v2444_v58 = vsub.f32 0.0, %v2428_v16  ;;  %v2538_v13 = vadd.f32 %v2520_v25, %v2410_v51  ;;  %v3211_v29 = vld [vmem:[#allocation7 + $0x2f0] sm:$0xff]  ;;  %v3174_v36 = vld [vmem:[#allocation7 + $0x1c8] sm:$0xff]  ;;  %v3157_v43 = vld [vmem:[#allocation7 + $0x140] sm:$0xff] }
 0x310   : > { %3384 = vmatpush.msra.mxu0 %v3121_v48  ;;  %3404 = vmatpush.msra.mxu1 %v3137_v49  ;;  %v3173_v44 = vld [vmem:[#allocation7 + $0x1c0] sm:$0xff]  ;;  %v3156_v50 = vld [vmem:[#allocation7 + $0x138] sm:$0xff]  ;;  %v3154_v57 = vld [vmem:[#allocation7 + $0x128] sm:$0xff] }
 0x311   : > { %3413 = vmatpush.msra.mxu2 %v3164_v63  ;;  %3433 = vmatpush.msra.mxu3 %v3180_v52  ;;  %v2473_v61 = vmul.f32 1.442695, %v2443_v55  ;;  %v2475_v1 = vmul.f32 1.442695, %v2444_v58  ;;  %v3193_v48 = vld [vmem:[#allocation7 + $0x260] sm:$0xff]  ;;  %v3172_v63 = vld [vmem:[#allocation7 + $0x1b8] sm:$0xff] }
 0x312   : > { %3385 = vmatpush.msra.mxu0 %v3120_v30  ;;  %3405 = vmatpush.msra.mxu1 %v3136_v53  ;;  %v3209_v49 = vld [vmem:[#allocation7 + $0x2e0] sm:$0xff]  ;;  %v3192_v52 = vld [vmem:[#allocation7 + $0x258] sm:$0xff]  ;;  %v3155_v30 = vld [vmem:[#allocation7 + $0x130] sm:$0xff] }
 0x313   : > { %3414 = vmatpush.msra.mxu2 %v3163_v56  ;;  %3434 = vmatpush.msra.mxu3 %v3179_v60  ;;  %4386 = vpow2.f32 %v2473_v61  ;;  %v3208_v16 = vld [vmem:[#allocation7 + $0x2d8] sm:$0xff]  ;;  %v3171_v53 = vld [vmem:[#allocation7 + $0x1b0] sm:$0xff]  ;;  %v3170_v25 = vld [vmem:[#allocation7 + $0x1a8] sm:$0xff] }
 0x314   : > { %3386 = vmatpush.msra.mxu0 %v3119_v62  ;;  %3406 = vmatpush.msra.mxu1 %v3135_v38  ;;  %4388 = vpow2.f32 %v2475_v1  ;;  %v3191_v55 = vld [vmem:[#allocation7 + $0x250] sm:$0xff]  ;;  %v3190_v58 = vld [vmem:[#allocation7 + $0x248] sm:$0xff]  ;;  %v3153_v61 = vld [vmem:[#allocation7 + $0x120] sm:$0xff] }
 0x315   : > { %3415 = vmatpush.msra.mxu2 %v3162_v5  ;;  %3435 = vmatpush.msra.mxu3 %v3178_v7  ;;  %v3207_v56 = vld [vmem:[#allocation7 + $0x2d0] sm:$0xff]  ;;  %v3206_v60 = vld [vmem:[#allocation7 + $0x2c8] sm:$0xff]  ;;  %v3205_v38 = vld [vmem:[#allocation7 + $0x2c0] sm:$0xff] }
 0x316   : > { %3387 = vmatpush.msra.mxu0 %v3118_v10  ;;  %3407 = vmatpush.msra.mxu1 %v3134_v3  ;;  %v3152_v51 = vld [vmem:[#allocation7 + $0x118] sm:$0xff]  ;;  %v3151_v10 = vld [vmem:[#allocation7 + $0x110] sm:$0xff] }
 0x317   : > { %3416 = vmatpush.msra.mxu2 %v3161_v15  ;;  %3436 = vmatpush.msra.mxu3 %v3177_v18  ;;  %v3168_v1 = vld [vmem:[#allocation7 + $0x198] sm:$0xff]  ;;  %v3167_v3 = vld [vmem:[#allocation7 + $0x190] sm:$0xff] }
 0x318   : > { %3053 = vmatmul.f32.vlgmr.msrb.gmra.mxu0 %v2537_v12  ;;  %3073 = vmatmul.f32.vlgmr.msrb.gmra.mxu1 %v2538_v13  ;;  %v3188_v5 = vld [vmem:[#allocation7 + $0x238] sm:$0xff]  ;;  %v3187_v15 = vld [vmem:[#allocation7 + $0x230] sm:$0xff] }
 0x319   : > { %3388 = vmatpush.msra.mxu0 %v3117_v6  ;;  %3408 = vmatpush.msra.mxu1 %v3133_v4  ;;  %v4387_v27 = vpop.eup %4386  ;;  %v3204_v7 = vld [vmem:[#allocation7 + $0x2b8] sm:$0xff]  ;;  %v3203_v18 = vld [vmem:[#allocation7 + $0x2b0] sm:$0xff]  ;;  %v3150_v6 = vld [vmem:[#allocation7 + $0x108] sm:$0xff] }
 0x31a   : > { %3417 = vmatpush.msra.mxu2 %v3160_v20  ;;  %3437 = vmatpush.msra.mxu3 %v3176_v21  ;;  %v4389_v31 = vpop.eup %4388  ;;  %v2491_v33 = vadd.f32 1.0, %v4387_v27  ;;  %v3166_v4 = vld [vmem:[#allocation7 + $0x188] sm:$0xff]  ;;  %v2411_v20 = vmax.f32 %v5378_v39, 0.0  ;;  %v2412_v21 = vmax.f32 %v5381_v26, 0.0 }
 0x31b   : > { %3453 = vmatpush.msrb.mxu0 %v3196_v0  ;;  %3473 = vmatpush.msrb.mxu1 %v3212_v22  ;;  %v2492_v46 = vadd.f32 1.0, %v4389_v31  ;;  %v3186_v0 = vld [vmem:[#allocation7 + $0x228] sm:$0xff]  ;;  %v3201_v31 = vld [vmem:[#allocation7 + $0x2a0] sm:$0xff] }
 0x31c   : > { %3418 = vmatpush.msra.mxu2 %v3159_v23  ;;  %3438 = vmatpush.msra.mxu3 %v3175_v24  ;;  %4390 = vlog2.f32 %v2491_v33  ;;  %v3202_v22 = vld [vmem:[#allocation7 + $0x2a8] sm:$0xff]  ;;  %v3149_v23 = vld [vmem:[#allocation7 + $0x100] sm:$0xff]  ;;  %v3227_v33 = vld [vmem:[#allocation7 + $0x370] sm:$0xff] }
 0x31d   : > { %3454 = vmatpush.msrb.mxu0 %v3195_v28  ;;  %3474 = vmatpush.msrb.mxu1 %v3211_v29  ;;  %4392 = vlog2.f32 %v2492_v46  ;;  %v3165_v24 = vld [vmem:[#allocation7 + $0x180] sm:$0xff]  ;;  %v3199_v46 = vld [vmem:[#allocation7 + $0x290] sm:$0xff] }
 0x31e   : > { %3419 = vmatpush.msra.mxu2 %v3158_v32  ;;  %3439 = vmatpush.msra.mxu3 %v3174_v36  ;;  %v3185_v29 = vld [vmem:[#allocation7 + $0x220] sm:$0xff]  ;;  %v3228_v32 = vld [vmem:[#allocation7 + $0x378] sm:$0xff] }
 0x31f   : > { %3455 = vmatpush.msrb.mxu0 %v3194_v9  ;;  %3475 = vmatpush.msrb.mxu1 %v3210_v19  ;;  %v3244_v36 = vld [vmem:[#allocation7 + $0x3f8] sm:$0xff] }
 0x320   : > { %3420 = vmatpush.msra.mxu2 %v3157_v43  ;;  %3440 = vmatpush.msra.mxu3 %v3173_v44  ;;  %v3184_v9 = vld [vmem:[#allocation7 + $0x218] sm:$0xff]  ;;  %v3243_v43 = vld [vmem:[#allocation7 + $0x3f0] sm:$0xff] }
 0x321   : > { %3456 = vmatpush.msrb.mxu0 %v3193_v48  ;;  %3476 = vmatpush.msrb.mxu1 %v3209_v49  ;;  %v3200_v19 = vld [vmem:[#allocation7 + $0x298] sm:$0xff]  ;;  %v3183_v44 = vld [vmem:[#allocation7 + $0x210] sm:$0xff]  ;;  %v3226_v48 = vld [vmem:[#allocation7 + $0x368] sm:$0xff] }
 0x322   : > { %3389 = vmatmul.f32.vlgmr.msra.gmra.mxu0 %v5310_v41  ;;  %3409 = vmatmul.f32.vlgmr.msra.gmra.mxu1 %v5313_v34  ;;  %v3169_v41 = vld [vmem:[#allocation7 + $0x1a0] sm:$0xff]  ;;  %v4391_v62 = vpop.eup %4390  ;;  %v3242_v49 = vld [vmem:[#allocation7 + $0x3e8] sm:$0xff] }
 0x323   : > { %3421 = vmatpush.msra.mxu2 %v3156_v50  ;;  %3441 = vmatpush.msra.mxu3 %v3172_v63  ;;  %v3189_v34 = vld [vmem:[#allocation7 + $0x240] sm:$0xff]  ;;  %v4393_v54 = vpop.eup %4392  ;;  %v2522_v12 = vmul.f32 0.6931472, %v4391_v62  ;;  %v3182_v50 = vld [vmem:[#allocation7 + $0x208] sm:$0xff] }
 0x324   : > { %3457 = vmatpush.msrb.mxu0 %v3192_v52  ;;  %3477 = vmatpush.msrb.mxu1 %v3208_v16  ;;  %v2524_v13 = vmul.f32 0.6931472, %v4393_v54  ;;  %v3198_v63 = vld [vmem:[#allocation7 + $0x288] sm:$0xff]  ;;  %v3225_v52 = vld [vmem:[#allocation7 + $0x360] sm:$0xff] }
 0x325   : > { %3422 = vmatpush.msra.mxu2 %v3155_v30  ;;  %3442 = vmatpush.msra.mxu3 %v3171_v53  ;;  %v2539_v27 = vadd.f32 %v2522_v12, %v2411_v20  ;;  %v3241_v16 = vld [vmem:[#allocation7 + $0x3e0] sm:$0xff]  ;;  %v3222_v62 = vld [vmem:[#allocation7 + $0x348] sm:$0xff]  ;;  %v3255_v12 = vld [vmem:[#allocation7 + $0x450] sm:$0xff] }
 0x326   : > { %3458 = vmatpush.msrb.mxu0 %v3191_v55  ;;  %3478 = vmatpush.msrb.mxu1 %v3207_v56  ;;  %v2540_v28 = vadd.f32 %v2524_v13, %v2412_v21  ;;  %v3181_v30 = vld [vmem:[#allocation7 + $0x200] sm:$0xff]  ;;  %v3224_v55 = vld [vmem:[#allocation7 + $0x358] sm:$0xff]  ;;  %v3271_v13 = vld [vmem:[#allocation7 + $0x4d0] sm:$0xff] }
 0x327   : > { %3423 = vmatpush.msra.mxu2 %v3154_v57  ;;  %3443 = vmatpush.msra.mxu3 %v3170_v25  ;;  %v3197_v53 = vld [vmem:[#allocation7 + $0x280] sm:$0xff]  ;;  %v3240_v56 = vld [vmem:[#allocation7 + $0x3d8] sm:$0xff] }
 0x328   : > { %3459 = vmatpush.msrb.mxu0 %v3190_v58  ;;  %3479 = vmatpush.msrb.mxu1 %v3206_v60  ;;  %v3260_v57 = vld [vmem:[#allocation7 + $0x478] sm:$0xff]  ;;  %v3223_v58 = vld [vmem:[#allocation7 + $0x350] sm:$0xff]  ;;  %v3273_v54 = vld [vmem:[#allocation7 + $0x4e0] sm:$0xff] }
 0x329   : > { %3424 = vmatpush.msra.mxu2 %v3153_v61  ;;  %3444 = vmatpush.msra.mxu3 %v3169_v41  ;;  %v3276_v25 = vld [vmem:[#allocation7 + $0x4f8] sm:$0xff]  ;;  %v3239_v60 = vld [vmem:[#allocation7 + $0x3d0] sm:$0xff]  ;;  %v3217_v20 = vld [vmem:[#allocation7 + $0x320] sm:$0xff] }
 0x32a   : > { %3460 = vmatpush.msrb.mxu0 %v3189_v34  ;;  %3480 = vmatpush.msrb.mxu1 %v3205_v38  ;;  %v3259_v61 = vld [vmem:[#allocation7 + $0x470] sm:$0xff]  ;;  %v3238_v34 = vld [vmem:[#allocation7 + $0x3c8] sm:$0xff]  ;;  %v3221_v38 = vld [vmem:[#allocation7 + $0x340] sm:$0xff] }
 0x32b   : > { %3425 = vmatpush.msra.mxu2 %v3152_v51  ;;  %3445 = vmatpush.msra.mxu3 %v3168_v1  ;;  %v3275_v41 = vld [vmem:[#allocation7 + $0x4f0] sm:$0xff]  ;;  %v3220_v51 = vld [vmem:[#allocation7 + $0x338] sm:$0xff]  ;;  %v3233_v21 = vld [vmem:[#allocation7 + $0x3a0] sm:$0xff] }
 0x32c   : > { %3461 = vmatpush.msrb.mxu0 %v3188_v5  ;;  %3481 = vmatpush.msrb.mxu1 %v3204_v7  ;;  %v3236_v1 = vld [vmem:[#allocation7 + $0x3b8] sm:$0xff] }
 0x32d   : > { %3426 = vmatpush.msra.mxu2 %v3151_v10  ;;  %3446 = vmatpush.msra.mxu3 %v3167_v3  ;;  %v3256_v5 = vld [vmem:[#allocation7 + $0x458] sm:$0xff]  ;;  %v3219_v10 = vld [vmem:[#allocation7 + $0x330] sm:$0xff] }
 0x32e   : > { %3462 = vmatpush.msrb.mxu0 %v3187_v15  ;;  %3482 = vmatpush.msrb.mxu1 %v3203_v18  ;;  %v3272_v7 = vld [vmem:[#allocation7 + $0x4d8] sm:$0xff]  ;;  %v3235_v3 = vld [vmem:[#allocation7 + $0x3b0] sm:$0xff]  ;;  %v3218_v15 = vld [vmem:[#allocation7 + $0x328] sm:$0xff] }
 0x32f   : > { %3427 = vmatpush.msra.mxu2 %v3150_v6  ;;  %3447 = vmatpush.msra.mxu3 %v3166_v4  ;;  %v3234_v18 = vld [vmem:[#allocation7 + $0x3a8] sm:$0xff] }
 0x330   : > { %3463 = vmatpush.msrb.mxu0 %v3186_v0  ;;  %3483 = vmatpush.msrb.mxu1 %v3202_v22  ;;  %v3254_v6 = vld [vmem:[#allocation7 + $0x448] sm:$0xff]  ;;  %v3253_v0 = vld [vmem:[#allocation7 + $0x440] sm:$0xff] }
 0x331   : > { %3428 = vmatpush.msra.mxu2 %v3149_v23  ;;  %3448 = vmatpush.msra.mxu3 %v3165_v24  ;;  %v3270_v4 = vld [vmem:[#allocation7 + $0x4c8] sm:$0xff]  ;;  %v3269_v22 = vld [vmem:[#allocation7 + $0x4c0] sm:$0xff]  ;;  %v3216_v23 = vld [vmem:[#allocation7 + $0x318] sm:$0xff] }
 0x332   : > { %3464 = vmatpush.msrb.mxu0 %v3185_v29  ;;  %3484 = vmatpush.msrb.mxu1 %v3201_v31  ;;  %v3232_v24 = vld [vmem:[#allocation7 + $0x398] sm:$0xff]  ;;  %v3215_v29 = vld [vmem:[#allocation7 + $0x310] sm:$0xff] }
 0x333   : > { %3093 = vmatmul.f32.vlgmr.msrb.gmra.mxu2 %v2539_v27  ;;  %3113 = vmatmul.f32.vlgmr.msrb.gmra.mxu3 %v2540_v28  ;;  %v3252_v27 = vld [vmem:[#allocation7 + $0x438] sm:$0xff]  ;;  %v3231_v31 = vld [vmem:[#allocation7 + $0x390] sm:$0xff] }
 0x334   : > { %3493 = vmatpush.msrb.mxu2 %v3228_v32  ;;  %3513 = vmatpush.msrb.mxu3 %v3244_v36  ;;  %v3268_v28 = vld [vmem:[#allocation7 + $0x4b8] sm:$0xff]  ;;  %v3251_v32 = vld [vmem:[#allocation7 + $0x430] sm:$0xff] }
 0x335   : > { %3465 = vmatpush.msrb.mxu0 %v3184_v9  ;;  %3485 = vmatpush.msrb.mxu1 %v3200_v19  ;;  %v3267_v36 = vld [vmem:[#allocation7 + $0x4b0] sm:$0xff]  ;;  %v3214_v9 = vld [vmem:[#allocation7 + $0x308] sm:$0xff] }
 0x336   : > { %3494 = vmatpush.msrb.mxu2 %v3227_v33  ;;  %3514 = vmatpush.msrb.mxu3 %v3243_v43  ;;  %v3230_v19 = vld [vmem:[#allocation7 + $0x388] sm:$0xff] }
 0x337   : > { %3466 = vmatpush.msrb.mxu0 %v3183_v44  ;;  %3486 = vmatpush.msrb.mxu1 %v3199_v46  ;;  %v3250_v33 = vld [vmem:[#allocation7 + $0x428] sm:$0xff]  ;;  %v3213_v44 = vld [vmem:[#allocation7 + $0x300] sm:$0xff] }
 0x338   : > { %3495 = vmatpush.msrb.mxu2 %v3226_v48  ;;  %3515 = vmatpush.msrb.mxu3 %v3242_v49  ;;  %v3266_v43 = vld [vmem:[#allocation7 + $0x4a8] sm:$0xff]  ;;  %v3229_v46 = vld [vmem:[#allocation7 + $0x380] sm:$0xff] }
 0x339   : > { %3467 = vmatpush.msrb.mxu0 %v3182_v50  ;;  %3487 = vmatpush.msrb.mxu1 %v3198_v63  ;;  %v3249_v48 = vld [vmem:[#allocation7 + $0x420] sm:$0xff]  ;;  %v3292_v50 = vld [vmem:[#allocation7 + $0x578] sm:$0xff] }
 0x33a   : > { %3496 = vmatpush.msrb.mxu2 %v3225_v52  ;;  %3516 = vmatpush.msrb.mxu3 %v3241_v16  ;;  %v3265_v49 = vld [vmem:[#allocation7 + $0x4a0] sm:$0xff]  ;;  %v3308_v63 = vld [vmem:[#allocation7 + $0x5f8] sm:$0xff] }
 0x33b   : > { %3468 = vmatpush.msrb.mxu0 %v3181_v30  ;;  %3488 = vmatpush.msrb.mxu1 %v3197_v53  ;;  %v3248_v52 = vld [vmem:[#allocation7 + $0x418] sm:$0xff]  ;;  %v3291_v30 = vld [vmem:[#allocation7 + $0x570] sm:$0xff] }
 0x33c   : > { %3429 = vmatmul.f32.vlgmr.msra.gmra.mxu2 %v5318_v45  ;;  %3449 = vmatmul.f32.vlgmr.msra.gmra.mxu3 %v5321_v47  ;;  %v3258_v45 = vld [vmem:[#allocation7 + $0x468] sm:$0xff]  ;;  %v3264_v16 = vld [vmem:[#allocation7 + $0x498] sm:$0xff]  ;;  %v3307_v53 = vld [vmem:[#allocation7 + $0x5f0] sm:$0xff] }
 0x33d   : > { %3469 = vmatmul.f32.vlgmr.msrb.gmra.mxu0 %v5328_v14  ;;  %3489 = vmatmul.f32.vlgmr.msrb.gmra.mxu1 %v5331_v17  ;;  %v3274_v47 = vld [vmem:[#allocation7 + $0x4e8] sm:$0xff]  ;;  %v3237_v14 = vld [vmem:[#allocation7 + $0x3c0] sm:$0xff] }
 0x33e   : > { %3497 = vmatpush.msrb.mxu2 %v3224_v55  ;;  %3517 = vmatpush.msrb.mxu3 %v3240_v56  ;;  %v3257_v17 = vld [vmem:[#allocation7 + $0x460] sm:$0xff]  ;;  %v3247_v55 = vld [vmem:[#allocation7 + $0x410] sm:$0xff] }
 0x33f   : > { %3533 = vmatpush.msra.mxu0 %v3260_v57  ;;  %3553 = vmatpush.msra.mxu1 %v3276_v25  ;;  %v3263_v56 = vld [vmem:[#allocation7 + $0x490] sm:$0xff]  ;;  %v3290_v57 = vld [vmem:[#allocation7 + $0x568] sm:$0xff] }
 0x340   : > { %3498 = vmatpush.msrb.mxu2 %v3223_v58  ;;  %3518 = vmatpush.msrb.mxu3 %v3239_v60  ;;  %v3306_v25 = vld [vmem:[#allocation7 + $0x5e8] sm:$0xff] }
 0x341   : > { %3534 = vmatpush.msra.mxu0 %v3259_v61  ;;  %3554 = vmatpush.msra.mxu1 %v3275_v41  ;;  %v3246_v58 = vld [vmem:[#allocation7 + $0x408] sm:$0xff]  ;;  %v3289_v61 = vld [vmem:[#allocation7 + $0x560] sm:$0xff] }
 0x342   : > { %3499 = vmatpush.msrb.mxu2 %v3222_v62  ;;  %3519 = vmatpush.msrb.mxu3 %v3238_v34  ;;  %v3262_v60 = vld [vmem:[#allocation7 + $0x488] sm:$0xff]  ;;  %v3261_v41 = vld [vmem:[#allocation7 + $0x480] sm:$0xff]  ;;  %v3288_v62 = vld [vmem:[#allocation7 + $0x558] sm:$0xff] }
 0x343   : > { %3535 = vmatpush.msra.mxu0 %v3258_v45  ;;  %3555 = vmatpush.msra.mxu1 %v3274_v47  ;;  %v3304_v34 = vld [vmem:[#allocation7 + $0x5d8] sm:$0xff] }
 0x344   : > { %3500 = vmatpush.msrb.mxu2 %v3221_v38  ;;  %3520 = vmatpush.msrb.mxu3 %v3237_v14  ;;  %v3324_v45 = vld [vmem:[#allocation7 + $0x678] sm:$0xff]  ;;  %v3287_v38 = vld [vmem:[#allocation7 + $0x550] sm:$0xff] }
 0x345   : > { %3536 = vmatpush.msra.mxu0 %v3257_v17  ;;  %3556 = vmatpush.msra.mxu1 %v3273_v54  ;;  %v3340_v47 = vld [vmem:[#allocation7 + $0x6f8] sm:$0xff]  ;;  %v3303_v14 = vld [vmem:[#allocation7 + $0x5d0] sm:$0xff] }
 0x346   : > { %3501 = vmatpush.msrb.mxu2 %v3220_v51  ;;  %3521 = vmatpush.msrb.mxu3 %v3236_v1  ;;  %v3323_v17 = vld [vmem:[#allocation7 + $0x670] sm:$0xff]  ;;  %v3286_v51 = vld [vmem:[#allocation7 + $0x548] sm:$0xff] }
 0x347   : > { %3537 = vmatpush.msra.mxu0 %v3256_v5  ;;  %3557 = vmatpush.msra.mxu1 %v3272_v7  ;;  %v3339_v54 = vld [vmem:[#allocation7 + $0x6f0] sm:$0xff]  ;;  %v3302_v1 = vld [vmem:[#allocation7 + $0x5c8] sm:$0xff] }
 0x348   : > { %3502 = vmatpush.msrb.mxu2 %v3219_v10  ;;  %3522 = vmatpush.msrb.mxu3 %v3235_v3  ;;  %v3322_v5 = vld [vmem:[#allocation7 + $0x668] sm:$0xff]  ;;  %v3285_v10 = vld [vmem:[#allocation7 + $0x540] sm:$0xff] }
 0x349   : > { %3538 = vmatpush.msra.mxu0 %v3255_v12  ;;  %3558 = vmatpush.msra.mxu1 %v3271_v13  ;;  %v3338_v7 = vld [vmem:[#allocation7 + $0x6e8] sm:$0xff]  ;;  %v3337_v3 = vld [vmem:[#allocation7 + $0x6e0] sm:$0xff]  ;;  %v3284_v12 = vld [vmem:[#allocation7 + $0x538] sm:$0xff] }
 0x34a   : > { %3503 = vmatpush.msrb.mxu2 %v3218_v15  ;;  %3523 = vmatpush.msrb.mxu3 %v3234_v18  ;;  %v3300_v13 = vld [vmem:[#allocation7 + $0x5b8] sm:$0xff] }
 0x34b   : > { %3539 = vmatpush.msra.mxu0 %v3254_v6  ;;  %3559 = vmatpush.msra.mxu1 %v3270_v4  ;;  %v3320_v15 = vld [vmem:[#allocation7 + $0x658] sm:$0xff]  ;;  %v3283_v6 = vld [vmem:[#allocation7 + $0x530] sm:$0xff] }
 0x34c   : > { %3504 = vmatpush.msrb.mxu2 %v3217_v20  ;;  %3524 = vmatpush.msrb.mxu3 %v3233_v21  ;;  %v3336_v18 = vld [vmem:[#allocation7 + $0x6d8] sm:$0xff]  ;;  %v3299_v4 = vld [vmem:[#allocation7 + $0x5b0] sm:$0xff] }
 0x34d   : > { %3540 = vmatpush.msra.mxu0 %v3253_v0  ;;  %3560 = vmatpush.msra.mxu1 %v3269_v22  ;;  %v3319_v20 = vld [vmem:[#allocation7 + $0x650] sm:$0xff]  ;;  %v3282_v0 = vld [vmem:[#allocation7 + $0x528] sm:$0xff] }
 0x34e   : > { %3505 = vmatpush.msrb.mxu2 %v3216_v23  ;;  %3525 = vmatpush.msrb.mxu3 %v3232_v24  ;;  %v3335_v21 = vld [vmem:[#allocation7 + $0x6d0] sm:$0xff]  ;;  %v3298_v22 = vld [vmem:[#allocation7 + $0x5a8] sm:$0xff] }
 0x34f   : > { %3541 = vmatpush.msra.mxu0 %v3252_v27  ;;  %3561 = vmatpush.msra.mxu1 %v3268_v28  ;;  %v3318_v23 = vld [vmem:[#allocation7 + $0x648] sm:$0xff]  ;;  %v3281_v27 = vld [vmem:[#allocation7 + $0x520] sm:$0xff] }
 0x350   : > { %3506 = vmatpush.msrb.mxu2 %v3215_v29  ;;  %3526 = vmatpush.msrb.mxu3 %v3231_v31  ;;  %v3334_v24 = vld [vmem:[#allocation7 + $0x6c8] sm:$0xff]  ;;  %v3297_v28 = vld [vmem:[#allocation7 + $0x5a0] sm:$0xff] }
 0x351   : > { %3542 = vmatpush.msra.mxu0 %v3251_v32  ;;  %3562 = vmatpush.msra.mxu1 %v3267_v36  ;;  %v3317_v29 = vld [vmem:[#allocation7 + $0x640] sm:$0xff]  ;;  %v3280_v32 = vld [vmem:[#allocation7 + $0x518] sm:$0xff] }
 0x352   : > { %3507 = vmatpush.msrb.mxu2 %v3214_v9  ;;  %3527 = vmatpush.msrb.mxu3 %v3230_v19  ;;  %v3333_v31 = vld [vmem:[#allocation7 + $0x6c0] sm:$0xff]  ;;  %v3296_v36 = vld [vmem:[#allocation7 + $0x598] sm:$0xff] }
 0x353   : > { %3543 = vmatpush.msra.mxu0 %v3250_v33  ;;  %3563 = vmatpush.msra.mxu1 %v3266_v43  ;;  %v3316_v9 = vld [vmem:[#allocation7 + $0x638] sm:$0xff]  ;;  %v3279_v33 = vld [vmem:[#allocation7 + $0x510] sm:$0xff] }
 0x354   : > { %3508 = vmatpush.msrb.mxu2 %v3213_v44  ;;  %3528 = vmatpush.msrb.mxu3 %v3229_v46  ;;  %v3332_v19 = vld [vmem:[#allocation7 + $0x6b8] sm:$0xff]  ;;  %v3295_v43 = vld [vmem:[#allocation7 + $0x590] sm:$0xff] }
 0x355   : > { %3544 = vmatpush.msra.mxu0 %v3249_v48  ;;  %3564 = vmatpush.msra.mxu1 %v3265_v49  ;;  %v3315_v44 = vld [vmem:[#allocation7 + $0x630] sm:$0xff]  ;;  %v3278_v48 = vld [vmem:[#allocation7 + $0x508] sm:$0xff] }
 0x356   : > { %3509 = vmatmul.f32.vlgmr.msrb.gmra.mxu2 %v5338_v37  ;;  %3529 = vmatmul.f32.vlgmr.msrb.gmra.mxu3 %v5341_v40  ;;  %v3305_v37 = vld [vmem:[#allocation7 + $0x5e0] sm:$0xff]  ;;  %v3331_v46 = vld [vmem:[#allocation7 + $0x6b0] sm:$0xff]  ;;  %v3294_v49 = vld [vmem:[#allocation7 + $0x588] sm:$0xff] }
 0x357   : > { %3573 = vmatpush.msra.mxu2 %v3292_v50  ;;  %3593 = vmatpush.msra.mxu3 %v3308_v63  ;;  %v3245_v40 = vld [vmem:[#allocation7 + $0x400] sm:$0xff]  ;;  %v3314_v50 = vld [vmem:[#allocation7 + $0x628] sm:$0xff] }
 0x358   : > { %3545 = vmatpush.msra.mxu0 %v3248_v52  ;;  %3565 = vmatpush.msra.mxu1 %v3264_v16  ;;  %v3330_v63 = vld [vmem:[#allocation7 + $0x6a8] sm:$0xff]  ;;  %v3277_v52 = vld [vmem:[#allocation7 + $0x500] sm:$0xff] }
 0x359   : > { %3574 = vmatpush.msra.mxu2 %v3291_v30  ;;  %3594 = vmatpush.msra.mxu3 %v3307_v53  ;;  %v3293_v16 = vld [vmem:[#allocation7 + $0x580] sm:$0xff] }
 0x35a   : > { %3546 = vmatpush.msra.mxu0 %v3247_v55  ;;  %3566 = vmatpush.msra.mxu1 %v3263_v56  ;;  %v3313_v30 = vld [vmem:[#allocation7 + $0x620] sm:$0xff]  ;;  %v3356_v55 = vld [vmem:[#allocation7 + $0x778] sm:$0xff] }
 0x35b   : > { %3575 = vmatpush.msra.mxu2 %v3290_v57  ;;  %3595 = vmatpush.msra.mxu3 %v3306_v25  ;;  %v3329_v53 = vld [vmem:[#allocation7 + $0x6a0] sm:$0xff]  ;;  %v3372_v56 = vld [vmem:[#allocation7 + $0x7f8] sm:$0xff] }
 0x35c   : > { %3547 = vmatpush.msra.mxu0 %v3246_v58  ;;  %3567 = vmatpush.msra.mxu1 %v3262_v60  ;;  %v3312_v57 = vld [vmem:[#allocation7 + $0x618] sm:$0xff]  ;;  %v3355_v58 = vld [vmem:[#allocation7 + $0x770] sm:$0xff] }
 0x35d   : > { %3576 = vmatpush.msra.mxu2 %v3289_v61  ;;  %3596 = vmatpush.msra.mxu3 %v3305_v37  ;;  %v3328_v25 = vld [vmem:[#allocation7 + $0x698] sm:$0xff]  ;;  %v3371_v60 = vld [vmem:[#allocation7 + $0x7f0] sm:$0xff] }
 0x35e   : > { %3548 = vmatpush.msra.mxu0 %v3245_v40  ;;  %3568 = vmatpush.msra.mxu1 %v3261_v41  ;;  %v3311_v61 = vld [vmem:[#allocation7 + $0x610] sm:$0xff]  ;;  %v3354_v40 = vld [vmem:[#allocation7 + $0x768] sm:$0xff] }
 0x35f   : > { %3549 = vmatmul.f32.vlgmr.msra.gmra.mxu0 %v5348_v2  ;;  %3569 = vmatmul.f32.vlgmr.msra.gmra.mxu1 %v5351_v8  ;;  %v3301_v2 = vld [vmem:[#allocation7 + $0x5c0] sm:$0xff]  ;;  %v3327_v37 = vld [vmem:[#allocation7 + $0x690] sm:$0xff]  ;;  %v3370_v41 = vld [vmem:[#allocation7 + $0x7e8] sm:$0xff] }
 0x360   : > { %3577 = vmatpush.msra.mxu2 %v3288_v62  ;;  %3597 = vmatpush.msra.mxu3 %v3304_v34  ;;  %v3321_v8 = vld [vmem:[#allocation7 + $0x660] sm:$0xff]  ;;  %v3310_v62 = vld [vmem:[#allocation7 + $0x608] sm:$0xff] }
 0x361   : > { %3613 = vmatpush.msrb.mxu0 %v3324_v45  ;;  %3633 = vmatpush.msrb.mxu1 %v3340_v47  ;;  %v3326_v34 = vld [vmem:[#allocation7 + $0x688] sm:$0xff]  ;;  %v3353_v45 = vld [vmem:[#allocation7 + $0x760] sm:$0xff] }
 0x362   : > { %3578 = vmatpush.msra.mxu2 %v3287_v38  ;;  %3598 = vmatpush.msra.mxu3 %v3303_v14  ;;  %v3325_v47 = vld [vmem:[#allocation7 + $0x680] sm:$0xff]  ;;  %v3352_v38 = vld [vmem:[#allocation7 + $0x758] sm:$0xff] }
 0x363   : > { %3614 = vmatpush.msrb.mxu0 %v3323_v17  ;;  %3634 = vmatpush.msrb.mxu1 %v3339_v54  ;;  %v3368_v14 = vld [vmem:[#allocation7 + $0x7d8] sm:$0xff]  ;;  %v3351_v17 = vld [vmem:[#allocation7 + $0x750] sm:$0xff] }
 0x364   : > { %3579 = vmatpush.msra.mxu2 %v3286_v51  ;;  %3599 = vmatpush.msra.mxu3 %v3302_v1  ;;  %v3367_v54 = vld [vmem:[#allocation7 + $0x7d0] sm:$0xff]  ;;  %v3350_v51 = vld [vmem:[#allocation7 + $0x748] sm:$0xff] }
 0x365   : > { %3615 = vmatpush.msrb.mxu0 %v3322_v5  ;;  %3635 = vmatpush.msrb.mxu1 %v3338_v7  ;;  %v3366_v1 = vld [vmem:[#allocation7 + $0x7c8] sm:$0xff]  ;;  %v3349_v5 = vld [vmem:[#allocation7 + $0x740] sm:$0xff] }
 0x366   : > { %3580 = vmatpush.msra.mxu2 %v3285_v10  ;;  %3600 = vmatpush.msra.mxu3 %v3301_v2  ;;  %v3365_v7 = vld [vmem:[#allocation7 + $0x7c0] sm:$0xff]  ;;  %v3348_v10 = vld [vmem:[#allocation7 + $0x738] sm:$0xff] }
 0x367   : > { %3616 = vmatpush.msrb.mxu0 %v3321_v8  ;;  %3636 = vmatpush.msrb.mxu1 %v3337_v3  ;;  %v3364_v2 = vld [vmem:[#allocation7 + $0x7b8] sm:$0xff]  ;;  %v3347_v8 = vld [vmem:[#allocation7 + $0x730] sm:$0xff]  ;;  %v3362_v3 = vld [vmem:[#allocation7 + $0x7a8] sm:$0xff] }
 0x368   : > { %3581 = vmatpush.msra.mxu2 %v3284_v12  ;;  %3601 = vmatpush.msra.mxu3 %v3300_v13  ;;  %v3345_v12 = vld [vmem:[#allocation7 + $0x720] sm:$0xff] }
 0x369   : > { %3617 = vmatpush.msrb.mxu0 %v3320_v15  ;;  %3637 = vmatpush.msrb.mxu1 %v3336_v18  ;;  %v3361_v13 = vld [vmem:[#allocation7 + $0x7a0] sm:$0xff]  ;;  %v3344_v15 = vld [vmem:[#allocation7 + $0x718] sm:$0xff] }
 0x36a   : > { %3582 = vmatpush.msra.mxu2 %v3283_v6  ;;  %3602 = vmatpush.msra.mxu3 %v3299_v4  ;;  %v3360_v18 = vld [vmem:[#allocation7 + $0x798] sm:$0xff]  ;;  %v3343_v6 = vld [vmem:[#allocation7 + $0x710] sm:$0xff] }
 0x36b   : > { %3618 = vmatpush.msrb.mxu0 %v3319_v20  ;;  %3638 = vmatpush.msrb.mxu1 %v3335_v21  ;;  %v3359_v4 = vld [vmem:[#allocation7 + $0x790] sm:$0xff]  ;;  %v3342_v20 = vld [vmem:[#allocation7 + $0x708] sm:$0xff] }
 0x36c   : > { %3583 = vmatpush.msra.mxu2 %v3282_v0  ;;  %3603 = vmatpush.msra.mxu3 %v3298_v22  ;;  %v3358_v21 = vld [vmem:[#allocation7 + $0x788] sm:$0xff]  ;;  %v3341_v0 = vld [vmem:[#allocation7 + $0x700] sm:$0xff] }
 0x36d   : > { %3619 = vmatpush.msrb.mxu0 %v3318_v23  ;;  %3639 = vmatpush.msrb.mxu1 %v3334_v24  ;;  %v3357_v22 = vld [vmem:[#allocation7 + $0x780] sm:$0xff]  ;;  %v2814_v23 = vpop.f32.mrf.mxu0  ;;  %v2834_v24 = vpop.f32.mrf.mxu1 }
 0x36e   : > { %3584 = vmatpush.msra.mxu2 %v3281_v27  ;;  %3604 = vmatpush.msra.mxu3 %v3297_v28  ;;  %v2854_v27 = vpop.f32.mrf.mxu2  ;;  %v2874_v28 = vpop.f32.mrf.mxu3 }
 0x36f   : > { %3620 = vmatpush.msrb.mxu0 %v3317_v29  ;;  %3640 = vmatpush.msrb.mxu1 %v3333_v31 }
 0x370   : > { %3585 = vmatpush.msra.mxu2 %v3280_v32  ;;  %3605 = vmatpush.msra.mxu3 %v3296_v36 }
 0x371   : > { %3621 = vmatpush.msrb.mxu0 %v3316_v9  ;;  %3641 = vmatpush.msrb.mxu1 %v3332_v19 }
 0x372   : > { %3586 = vmatpush.msra.mxu2 %v3279_v33  ;;  %3606 = vmatpush.msra.mxu3 %v3295_v43 }
 0x373   : > { %3622 = vmatpush.msrb.mxu0 %v3315_v44  ;;  %3642 = vmatpush.msrb.mxu1 %v3331_v46 }
 0x374   : > { %3587 = vmatpush.msra.mxu2 %v3278_v48  ;;  %3607 = vmatpush.msra.mxu3 %v3294_v49  ;;  %v2835_v48 = vadd.f32 %v2834_v24, %v2814_v23 }
 0x375   : > { %3623 = vmatpush.msrb.mxu0 %v3314_v50  ;;  %3643 = vmatpush.msrb.mxu1 %v3330_v63  ;;  %v2894_v29 = vpop.f32.mrf.mxu0  ;;  %v2914_v31 = vpop.f32.mrf.mxu1 }
 0x376   : > { %3588 = vmatpush.msra.mxu2 %v3277_v52  ;;  %3608 = vmatpush.msra.mxu3 %v3293_v16  ;;  %v2934_v32 = vpop.f32.mrf.mxu2  ;;  %v2954_v36 = vpop.f32.mrf.mxu3  ;;  %v2855_v50 = vadd.f32 %v2854_v27, %v2835_v48 }
 0x377   : > { %3624 = vmatpush.msrb.mxu0 %v3313_v30  ;;  %3644 = vmatpush.msrb.mxu1 %v3329_v53 }
 0x378   : > { %3589 = vmatmul.f32.vlgmr.msra.gmra.mxu2 %v5358_v35  ;;  %3609 = vmatmul.f32.vlgmr.msra.gmra.mxu3 %v5361_v42  ;;  %v3369_v35 = vld [vmem:[#allocation7 + $0x7e0] sm:$0xff] }
 0x379   : > { %3653 = vmatpush.msrb.mxu2 %v3356_v55  ;;  %3673 = vmatpush.msrb.mxu3 %v3372_v56  ;;  %v3309_v42 = vld [vmem:[#allocation7 + $0x600] sm:$0xff] }
 0x37a   : > { %3625 = vmatpush.msrb.mxu0 %v3312_v57  ;;  %3645 = vmatpush.msrb.mxu1 %v3328_v25 }
 0x37b   : > { %3654 = vmatpush.msrb.mxu2 %v3355_v58  ;;  %3674 = vmatpush.msrb.mxu3 %v3371_v60 }
 0x37c   : > { %3626 = vmatpush.msrb.mxu0 %v3311_v61  ;;  %3646 = vmatpush.msrb.mxu1 %v3327_v37 }
 0x37d   : > { %3655 = vmatpush.msrb.mxu2 %v3354_v40  ;;  %3675 = vmatpush.msrb.mxu3 %v3370_v41  ;;  %v2974_v9 = vpop.f32.mrf.mxu0  ;;  %v2994_v19 = vpop.f32.mrf.mxu1 }
 0x37e   : > { %3627 = vmatpush.msrb.mxu0 %v3310_v62  ;;  %3647 = vmatpush.msrb.mxu1 %v3326_v34 }
 0x37f   : > { %3656 = vmatpush.msrb.mxu2 %v3353_v45  ;;  %3676 = vmatpush.msrb.mxu3 %v3369_v35 }
 0x380   : > { %3628 = vmatpush.msrb.mxu0 %v3309_v42  ;;  %3648 = vmatpush.msrb.mxu1 %v3325_v47 }
 0x381   : > { %3629 = vmatmul.f32.vlgmr.msrb.gmra.mxu0 %v5368_v59  ;;  %3649 = vmatmul.f32.vlgmr.msrb.gmra.mxu1 %v5371_v11  ;;  %v3363_v59 = vld [vmem:[#allocation7 + $0x7b0] sm:$0xff]  ;;  %v3346_v11 = vld [vmem:[#allocation7 + $0x728] sm:$0xff] }
 0x382   : > { %3657 = vmatpush.msrb.mxu2 %v3352_v38  ;;  %3677 = vmatpush.msrb.mxu3 %v3368_v14 }
 0x384   : > { %3658 = vmatpush.msrb.mxu2 %v3351_v17  ;;  %3678 = vmatpush.msrb.mxu3 %v3367_v54 }
 0x386   : > { %3659 = vmatpush.msrb.mxu2 %v3350_v51  ;;  %3679 = vmatpush.msrb.mxu3 %v3366_v1 }
 0x388   : > { %3660 = vmatpush.msrb.mxu2 %v3349_v5  ;;  %3680 = vmatpush.msrb.mxu3 %v3365_v7 }
 0x38a   : > { %3661 = vmatpush.msrb.mxu2 %v3348_v10  ;;  %3681 = vmatpush.msrb.mxu3 %v3364_v2 }
 0x38c   : > { %3662 = vmatpush.msrb.mxu2 %v3347_v8  ;;  %3682 = vmatpush.msrb.mxu3 %v3363_v59 }
 0x38e   : > { %3663 = vmatpush.msrb.mxu2 %v3346_v11  ;;  %3683 = vmatpush.msrb.mxu3 %v3362_v3 }
 0x390   : > { %3664 = vmatpush.msrb.mxu2 %v3345_v12  ;;  %3684 = vmatpush.msrb.mxu3 %v3361_v13  ;;  %v4404_v12 = vld [vmem:[%s4709_s16] sm:$0x1]  ;;  %s315_s16 = sand.u32 1, %s4557_s25  }
 0x391   : > { %v3014_v33 = vpop.f32.mrf.mxu2  ;;  %v3034_v43 = vpop.f32.mrf.mxu3  ;;  %v3693_v13 = vmul.f32 0.5, %v4404_v12  ;;  %s316_s8 = scalar_lea.vmem [#allocation8], %s315_s16  ;;  %s3724_s15 = scalar_lea.sflag [#allocation4], %s315_s16 }
 0x392   : > { %3665 = vmatpush.msrb.mxu2 %v3344_v15  ;;  %3685 = vmatpush.msrb.mxu3 %v3360_v18  ;;  %s3734_s9 = sshll.u32 %s316_s8, 4  ;;  %s3735_s9 = int_to_ptr.vmem [resolvable:$true] %s3734_s9 }
 0x394   : > { %3666 = vmatpush.msrb.mxu2 %v3343_v6  ;;  %3686 = vmatpush.msrb.mxu3 %v3359_v4 }
 0x395   : > { %v3054_v44 = vpop.f32.mrf.mxu0  ;;  %v3074_v46 = vpop.f32.mrf.mxu1 }
 0x396   : > { %3667 = vmatpush.msrb.mxu2 %v3342_v20  ;;  %3687 = vmatpush.msrb.mxu3 %v3358_v21 }
 0x398   : > { %3668 = vmatpush.msrb.mxu2 %v3341_v0  ;;  %3688 = vmatpush.msrb.mxu3 %v3357_v22 }
 0x399   : > { %3669 = vmatmul.f32.vlgmr.msrb.gmra.mxu2 %v5378_v39  ;;  %3689 = vmatmul.f32.vlgmr.msrb.gmra.mxu3 %v5381_v26  ;;  %v2875_v39 = vadd.f32 %v2874_v28, %v2855_v50 }
 0x39b   : > { %v2895_v16 = vadd.f32 %v2894_v29, %v2875_v39 }
 0x39d   : > { %v2915_v55 = vadd.f32 %v2914_v31, %v2895_v16 }
 0x39f   : > { %v3390_v26 = vpop.f32.mrf.mxu0  ;;  %v3410_v52 = vpop.f32.mrf.mxu1  ;;  %v2935_v57 = vadd.f32 %v2934_v32, %v2915_v55 }
 0x3a0   : > { %v3411_v53 = vadd.f32 %v3410_v52, %v3390_v26 }
 0x3a1   : > { %v2955_v60 = vadd.f32 %v2954_v36, %v2935_v57 }
 0x3a3   : > { %v2975_v40 = vadd.f32 %v2974_v9, %v2955_v60 }
 0x3a5   : > { %v2995_v45 = vadd.f32 %v2994_v19, %v2975_v40 }
 0x3a7   : > { %v3015_v42 = vadd.f32 %v3014_v33, %v2995_v45 }
 0x3a9   : > { %v3035_v14 = vadd.f32 %v3034_v43, %v3015_v42 }
 0x3ab   : > { %v3055_v51 = vadd.f32 %v3054_v44, %v3035_v14 }
 0x3ad   : > { %v3075_v10 = vadd.f32 %v3074_v46, %v3055_v51 }
 0x3b6   : > { %v3094_v49 = vpop.f32.mrf.mxu2  ;;  %v3114_v63 = vpop.f32.mrf.mxu3 }
 0x3b7   : > { %v3095_v8 = vadd.f32 %v3094_v49, %v3075_v10 }
 0x3b9   : > { %v3115_v3 = vadd.f32 %v3114_v63, %v3095_v8 }
 0x3ba   : > { %v3470_v61 = vpop.f32.mrf.mxu0  ;;  %v3490_v41 = vpop.f32.mrf.mxu1 }
 0x3bb   : > { %v3694_v6 = vmul.f32 %v3693_v13, %v3115_v3 }
 0x3bd   : > { %v3696_v0 = vand.u32 2147483647, %v3694_v6  ;;  %v3695_v63 = vmax.f32 %v3694_v6, 0.0 }
 0x3bf   : > { %v3430_v30 = vpop.f32.mrf.mxu2  ;;  %v3450_v25 = vpop.f32.mrf.mxu3  ;;  %v3697_v27 = vsub.f32 0.0, %v3696_v0 }
 0x3c0   : > { %v3431_v56 = vadd.f32 %v3430_v30, %v3411_v53 }
 0x3c1   : > { %v3698_v31 = vmul.f32 1.442695, %v3697_v27 }
 0x3c2   : > { %v3451_v58 = vadd.f32 %v3450_v25, %v3431_v56 }
 0x3c4   : > { %v3471_v37 = vadd.f32 %v3470_v61, %v3451_v58 }
 0x3c6   : > { %v3491_v34 = vadd.f32 %v3490_v41, %v3471_v37 }
 0x3d9   : > { %v3510_v62 = vpop.f32.mrf.mxu2  ;;  %v3530_v47 = vpop.f32.mrf.mxu3 }
 0x3da   : > { %v3511_v35 = vadd.f32 %v3510_v62, %v3491_v34 }
 0x3dc   : > { %v3531_v38 = vadd.f32 %v3530_v47, %v3511_v35  ;;  %v3550_v17 = vpop.f32.mrf.mxu0  ;;  %v3570_v1 = vpop.f32.mrf.mxu1 }
 0x3de   : > { %v3551_v54 = vadd.f32 %v3550_v17, %v3531_v38 }
 0x3e0   : > { %v3571_v7 = vadd.f32 %v3570_v1, %v3551_v54 }
 0x3fb   : > { %v3590_v5 = vpop.f32.mrf.mxu2  ;;  %v3610_v59 = vpop.f32.mrf.mxu3 }
 0x3fc   : > { %v3591_v2 = vadd.f32 %v3590_v5, %v3571_v7 }
 0x3fe   : > { %v3611_v11 = vadd.f32 %v3610_v59, %v3591_v2  ;;  %v3630_v15 = vpop.f32.mrf.mxu0  ;;  %v3650_v4 = vpop.f32.mrf.mxu1 }
 0x400   : > { %v3631_v18 = vadd.f32 %v3630_v15, %v3611_v11 }
 0x402   : > { %v3651_v20 = vadd.f32 %v3650_v4, %v3631_v18 }
 0x41c   : > { %v3670_v21 = vpop.f32.mrf.mxu2  ;;  %v3690_v23 = vpop.f32.mrf.mxu3 }
 0x41d   : > { %v3671_v22 = vadd.f32 %v3670_v21, %v3651_v20 }
 0x41f   : > { %v3691_v24 = vadd.f32 %v3690_v23, %v3671_v22 }
 0x421   : > { %v3705_v28 = vand.u32 2147483647, %v3691_v24  ;;  %v3704_v44 = vmax.f32 %v3691_v24, 0.0  ;;  %vm3713_vm3 = vcmp.lt.f32.partialorder %v3691_v24, -15.0 }
 0x423   : > { %v3706_v29 = vsub.f32 0.0, %v3705_v28 }
 0x425   : > { %v3707_v32 = vmul.f32 1.442695, %v3706_v29 }
 0x427   : > { %4394 = vpow2.f32 %v3707_v32 }
 0x428   : > { %4396 = vpow2.f32 %v3698_v31 }
 0x42d   : > { %v4395_v36 = vpop.eup %4394 }
 0x42e   : > { %v3709_v9 = vadd.f32 1.0, %v4395_v36  ;;  %v4397_v19 = vpop.eup %4396 }
 0x42f   : > { %v3700_v33 = vadd.f32 1.0, %v4397_v19 }
 0x430   : > { %4398 = vlog2.f32 %v3709_v9 }
 0x431   : > { %4400 = vlog2.f32 %v3700_v33 }
 0x436   : > { %v4399_v43 = vpop.eup %4398 }
 0x437   : > { %v3711_v46 = vmul.f32 0.6931472, %v4399_v43  ;;  %v4401_v50 = vpop.eup %4400 }
 0x438   : > { %v3702_v39 = vmul.f32 0.6931472, %v4401_v50 }
 0x439   : > { %v3712_v48 = vadd.f32 %v3711_v46, %v3704_v44 }
 0x43a   : > { %v3703_v52 = vadd.f32 %v3702_v39, %v3695_v63 }
 0x43b   : > { %v3714_v49 = vmax.f32 %v3712_v48, 1e-30 }
 0x43c   : > { %v3719_v53 = vmul.f32 2.0, %v3703_v52 }
 0x43d   : > { %4402 = vlog2.f32 %v3714_v49 }
 0x443   : > { %v4403_v26 = vpop.eup %4402 }
 0x444   : > { %v3716_v16 = vmul.f32 0.6931472, %v4403_v26 }
 0x446   : > { %v3717_v30 = vsel %vm3713_vm3, %v3691_v24, %v3716_v16 }
 0x447   : > { %v3718_v55 = vadd.f32 %v3717_v30, %v3694_v6 }
 0x449   : > { %v3720_v56 = vsub.f32 %v3718_v55, %v3719_v53 }
 0x44b   : > { %v3721_v57 = vsub.f32 0.0, %v3720_v56 }
 0x44d   : > { %3722 = vst [vmem:[%s316_s8] sm:$0x1] %v3721_v57 }
 0x44e   : > { %4522 = shalt.err (!%p4519_p8)
}
 0x44f   : > { %4003 = dma.vmem_to_hbm [thread:$0]  (%p4654_p5), %s3735_s9, 16, %s3737_s14, %s3724_s15  }
 0x450 PF: > { %p4025_p9 = scmp.ge.s32.totalorder %s4565_s27, 2  ;;  %s3748_s19 = sand.u32 1, %s4553_s24  }
 0x451   : > { %s3749_s21 = scalar_lea.sflag [#allocation4], %s3748_s19 }
 0x452   : > { %p4016_p10 = pnand %p4025_p9, %p4658_p6 }
 0x454   : > { %p4017_p11 = pneg %p4016_p10 }
 0x456   : > { %4548 = dma.done.wait (%p4017_p11), %s3749_s21, 16  }
 0x457   : > { %4550 = vsyncadd (%p4017_p11), %s3749_s21, 4294967280  ;;  %s5453_s16 = sld [smem:[#allocation12_spill]]  ;;  %p19_p12 = scmp.ge.s32.totalorder %s4641_s30, 6  }
 0x458   : > { %s5454_s24 = smov %s4557_s25  ;;  %s5455_s25 = smov %s4561_s26 }
 0x459   : > { %s5457_s27 = smov %s4641_s30  ;;  %21 = sbr.rel (!%p19_p12) target bundleno = 7 (0x7), region = 96 }
 0x45d   : > { %s5456_s26 = smov %s5453_s16 }
 0x45e   :  { %3754 = vsyncpa [#allocation3], 1 }
 0x45f   :  { %3756 = vsyncpa [#allocation3 + $0x1], 1 }
 0x460   :  { %3757 = vsyncpa [#allocation6], 1 }
 0x461   :  { %3758 = vsyncpa [#allocation4], 1 }
 0x462   :  { %3760 = vsyncpa [#allocation4 + $0x1], 1 }

</bundles_post_ra>
